<compile_context>
chip_gen: v7x
topology: tpu7x:2x2x1
jax: 0.10.0
libtpu: 0.0.40
codegen_flags: <defaults>
</compile_context>

<pallas_src>
import jax
import jax.numpy as jnp
from jax import lax
from jax.experimental import pallas as pl
from jax.experimental.pallas import tpu as pltpu

K = 4            # conv kernel size
EPS = 1e-5
LEAKY_SLOPE = 0.2
MXU_DTYPE = jnp.bfloat16     # matmul operand / scratch dtype (accumulation stays f32)


# ------------------------------ Pallas kernels -------------------------------

def _fused_down_up_kernel(x_ref, w1_ref, wup_ref,          # inputs
                          y_ref, sum_ref, ssq_ref,         # outputs
                          zp_ref, hp_ref):                 # VMEM scratch
    """Per image: LeakyReLU -> Conv2d(k4,s2,p1) -> ReLU -> ConvTranspose2d(k4,s2,p1).

    x_ref is the NHWC input pre-reshaped (metadata only) to (1, ho, 2, wo, 2c) =
    (row-pair, row-parity, col-pair, col-parity*channels).  The kernel pads + parity-splits
    it into zp_ref (bf16), builds the (ho*wo, 16c) down-conv patch matrix in VMEM, and runs
    the transposed conv as a 2x2 sub-pixel decomposition (4 stride-1 matmuls, contraction
    4*ci) from a padded bf16 bottleneck scratch.  Emits the un-normalized ConvT output in
    parity layout (one lane-dense store) plus per-image sum / sum-of-squares for the global
    (training-mode) BatchNorm.
    """
    _, ho, _, wo, c2 = x_ref.shape
    c = c2 // 2
    ci = w1_ref.shape[1]
    co = wup_ref.shape[2]

    # ---- LeakyReLU in f32, cast once at the scratch store; pad + row-parity split ----
    xa = x_ref[0]                                               # (ho, 2, wo, 2c) f32
    xa = jnp.where(xa >= 0.0, xa, LEAKY_SLOPE * xa)

    zrow = jnp.zeros((1, wo + 2, c2), MXU_DTYPE)
    zcol = jnp.zeros((ho, 1, c2), MXU_DTYPE)
    for p in range(2):                                          # p = input row parity
        zp_ref[p, 0:1, :, :] = zrow                             # zero only the 1-px border
        zp_ref[p, ho + 1:ho + 2, :, :] = zrow
        zp_ref[p, 1:ho + 1, 0:1, :] = zcol
        zp_ref[p, 1:ho + 1, wo + 1:wo + 2, :] = zcol
        zp_ref[p, 1:ho + 1, 1:wo + 1, :] = xa[:, p].astype(MXU_DTYPE)

    # ---- down conv as a single MXU matmul: (ho*wo, 16c) @ (16c, ci) ----
    # tap (kh, kw) -> plane (kh+1)%2, row offset (kh+1)//2, col offset (kw+1)//2,
    # channel block ((kw+1)%2)*c  (column parity lives in the lane dim).
    taps = []
    for kh in range(4):
        ph, a = (kh + 1) % 2, (kh + 1) // 2
        for kw in range(4):
            b, lo = (kw + 1) // 2, ((kw + 1) % 2) * c
            taps.append(zp_ref[ph, a:a + ho, b:b + wo, lo:lo + c].reshape(ho * wo, c))
    patches = jnp.concatenate(taps, axis=-1)                    # (ho*wo, 16c) bf16
    hb = jnp.dot(patches, w1_ref[...], preferred_element_type=jnp.float32)

    # ---- ReLU + padded bottleneck in bf16; only the 1-px border is zeroed ----
    hrow = jnp.zeros((1, wo + 2, ci), MXU_DTYPE)
    hcol = jnp.zeros((ho, 1, ci), MXU_DTYPE)
    hp_ref[0:1, :, :] = hrow
    hp_ref[ho + 1:ho + 2, :, :] = hrow
    hp_ref[1:ho + 1, 0:1, :] = hcol
    hp_ref[1:ho + 1, wo + 1:wo + 2, :] = hcol
    hp_ref[1:ho + 1, 1:wo + 1, :] = (
        jnp.maximum(hb, 0.0).reshape(ho, wo, ci).astype(MXU_DTYPE))

    # ---- transposed conv: 4 parity matmuls built from 9 hoisted shifted views ----
    views = [[hp_ref[a:a + ho, b:b + wo, :].reshape(ho * wo, ci) for b in range(3)]
             for a in range(3)]
    ys = []
    s_acc = jnp.zeros((1, co), jnp.float32)
    q_acc = jnp.zeros((1, co), jnp.float32)
    for r in range(2):
        for s in range(2):
            pat = jnp.concatenate([views[r][s], views[r][s + 1],
                                   views[r + 1][s], views[r + 1][s + 1]], axis=-1)
            yp = jnp.dot(pat, wup_ref[2 * r + s], preferred_element_type=jnp.float32)
            ys.append(yp)
            s_acc = s_acc + jnp.sum(yp, axis=0, keepdims=True)
            q_acc = q_acc + jnp.sum(yp * yp, axis=0, keepdims=True)
    y_ref[0] = jnp.concatenate(ys, axis=-1)                     # one lane-dense store
    sum_ref[0] = s_acc
    ssq_ref[0] = q_acc


def _bn_concat_kernel(x_ref, y_ref, scale_ref, shift_ref, out_ref):
    """BatchNorm affine (global stats) + skip concat, per image, one lane-dense store.

    Reads the same (1, ho, 2, wo, 2c) input layout as the fused kernel (no pre-shuffled
    copy of x) and the parity-layout ConvT output; writes (ho*wo, 4*(c+co)) with lane
    order (parity, [x channels, y channels]).
    """
    _, ho, _, wo, c2 = x_ref.shape
    c = c2 // 2
    co = scale_ref.shape[1]

    xv = x_ref[0]                       # (ho, 2, wo, 2c)
    yv = y_ref[0]                       # (ho*wo, 4co)
    scale = scale_ref[...]              # (1, co)
    shift = shift_ref[...]

    pieces = []
    for r in range(2):
        for s in range(2):
            q = 2 * r + s
            xq = xv[:, r, :, s * c:(s + 1) * c].reshape(ho * wo, c)
            yq = yv[:, q * co:(q + 1) * co] * scale + shift
            pieces.append(xq)
            pieces.append(yq)
    out_ref[0] = jnp.concatenate(pieces, axis=-1)


# --------------------------------- wrapper -----------------------------------

@jax.jit
def unet_skip_block_innermost(x_nchw, w_down, w_up, gamma, beta):
    n, c, h, w = x_nchw.shape
    ci = w_down.shape[0]          # inner_nc
    co = w_up.shape[1]            # outer_nc
    assert h % 2 == 0 and w % 2 == 0
    ho, wo = h // 2, w // 2

    # NCHW -> NHWC is the only input-side materialization; the trailing reshape to the
    # (row-pair, row-parity, col-pair, col-parity*channels) layout is metadata-only.
    xs2d = (jnp.transpose(x_nchw, (0, 2, 3, 1)).astype(jnp.float32)
            .reshape(n, ho, 2, wo, 2 * c))

    # down-conv weight -> (16c, ci); row order (kh, kw, c) matches the in-kernel tap order
    w1_mat = jnp.transpose(w_down, (2, 3, 1, 0)).reshape(16 * c, ci).astype(MXU_DTYPE)

    # ConvTranspose weight -> 4 parity matrices (2x2 sub-pixel decomposition)
    wt = jnp.flip(w_up, (2, 3)).reshape(ci, co, 2, 2, 2, 2)           # [ci,co,u,r,v,s]
    wpar = jnp.transpose(wt, (3, 5, 2, 4, 0, 1)).reshape(4, 4 * ci, co).astype(MXU_DTYPE)

    y_raw, ysum, yssq = pl.pallas_call(
        _fused_down_up_kernel,
        out_shape=(
            jax.ShapeDtypeStruct((n, ho * wo, 4 * co), jnp.float32),  # parity layout
            jax.ShapeDtypeStruct((n, 1, co), jnp.float32),            # per-image sum
            jax.ShapeDtypeStruct((n, 1, co), jnp.float32),            # per-image sum sq
        ),
        grid=(n,),
        in_specs=[
            pl.BlockSpec((1, ho, 2, wo, 2 * c), lambda i: (i, 0, 0, 0, 0)),
            pl.BlockSpec((16 * c, ci), lambda i: (0, 0)),
            pl.BlockSpec((4, 4 * ci, co), lambda i: (0, 0, 0)),
        ],
        out_specs=(
            pl.BlockSpec((1, ho * wo, 4 * co), lambda i: (i, 0, 0)),
            pl.BlockSpec((1, 1, co), lambda i: (i, 0, 0)),
            pl.BlockSpec((1, 1, co), lambda i: (i, 0, 0)),
        ),
        scratch_shapes=[
            pltpu.VMEM((2, ho + 2, wo + 2, 2 * c), MXU_DTYPE),   # padded parity input
            pltpu.VMEM((ho + 2, wo + 2, ci), MXU_DTYPE),         # padded bottleneck
        ],
        compiler_params=pltpu.CompilerParams(
            dimension_semantics=("parallel",),
            vmem_limit_bytes=48 * 1024 * 1024,
        ),
    )(xs2d, w1_mat, wpar)

    # global training-mode BatchNorm statistics (biased variance); tiny combine in JAX
    count = float(n * h * w)
    mean = jnp.sum(ysum, axis=(0, 1)) / count
    var = jnp.sum(yssq, axis=(0, 1)) / count - mean * mean
    scale = gamma.astype(jnp.float32) * lax.rsqrt(var + EPS)
    shift = beta.astype(jnp.float32) - mean * scale

    cat = pl.pallas_call(
        _bn_concat_kernel,
        out_shape=jax.ShapeDtypeStruct((n, ho * wo, 4 * (c + co)), jnp.float32),
        grid=(n,),
        in_specs=[
            pl.BlockSpec((1, ho, 2, wo, 2 * c), lambda i: (i, 0, 0, 0, 0)),
            pl.BlockSpec((1, ho * wo, 4 * co), lambda i: (i, 0, 0)),
            pl.BlockSpec((1, co), lambda i: (0, 0)),
            pl.BlockSpec((1, co), lambda i: (0, 0)),
        ],
        out_specs=pl.BlockSpec((1, ho * wo, 4 * (c + co)), lambda i: (i, 0, 0)),
        compiler_params=pltpu.CompilerParams(
            dimension_semantics=("parallel",),
            vmem_limit_bytes=48 * 1024 * 1024,
        ),
    )(xs2d, y_raw, scale.reshape(1, co), shift.reshape(1, co))

    # single XLA pass: parity layout -> NCHW (folds de-parity + NHWC->NCHW together)
    out6 = cat.reshape(n, ho, wo, 2, 2, c + co)
    return jnp.transpose(out6, (0, 5, 1, 3, 2, 4)).reshape(n, c + co, h, w)


# ---------------------------- pure-JAX reference -----------------------------

def _reference(x, w_down, w_up, gamma, beta):
    lr = jnp.where(x >= 0, x, LEAKY_SLOPE * x)
    h = lax.conv_general_dilated(lr, w_down, (2, 2), ((1, 1), (1, 1)),
                                 dimension_numbers=("NCHW", "OIHW", "NCHW"))
    h = jnp.maximum(h, 0.0)
    w_eq = jnp.transpose(jnp.flip(w_up, (2, 3)), (1, 0, 2, 3))
    y = lax.conv_general_dilated(h, w_eq, (1, 1), ((2, 2), (2, 2)),
                                 lhs_dilation=(2, 2),
                                 dimension_numbers=("NCHW", "OIHW", "NCHW"))
    mean = y.mean(axis=(0, 2, 3), keepdims=True)
    var = ((y - mean) ** 2).mean(axis=(0, 2, 3), keepdims=True)
    y = (y - mean) * lax.rsqrt(var + EPS)
    y = y * gamma[None, :, None, None] + beta[None, :, None, None]
    return jnp.concatenate([x, y], axis=1)


if __name__ == "__main__":
    N, outer_nc, inner_nc, H, W = 2, 8, 16, 16, 16
    key = jax.random.PRNGKey(0)
    kx, kd, ku, kg, kb = jax.random.split(key, 5)

    x = jax.random.normal(kx, (N, outer_nc, H, W), jnp.float32)
    # Conv2d(outer_nc -> inner_nc, 4, s=2, p=1, bias=False): [inner_nc, outer_nc, 4, 4]
    w_down = 0.05 * jax.random.normal(kd, (inner_nc, outer_nc, K, K), jnp.float32)
    # ConvTranspose2d(inner_nc -> outer_nc, 4, s=2, p=1, bias=False): [inner_nc, outer_nc, 4, 4]
    w_up = 0.05 * jax.random.normal(ku, (inner_nc, outer_nc, K, K), jnp.float32)
    # BatchNorm2d(outer_nc) affine params
    gamma = 1.0 + 0.1 * jax.random.normal(kg, (outer_nc,), jnp.float32)
    beta = 0.1 * jax.random.normal(kb, (outer_nc,), jnp.float32)

    out = unet_skip_block_innermost(x, w_down, w_up, gamma, beta)
    out = jax.block_until_ready(out)

    ref = _reference(x, w_down, w_up, gamma, beta)
    assert out.shape == (N, 2 * outer_nc, H, W)
    # skip half is a pure f32 copy of x -> tight check
    assert jnp.allclose(out[:, :outer_nc], x, atol=1e-5, rtol=1e-5)
    # conv/BN half uses bf16 MXU operands (f32 accumulation) -> slightly loosened tolerance
    max_err = float(jnp.max(jnp.abs(out - ref)))
    assert jnp.allclose(out, ref, atol=3e-2, rtol=3e-2), max_err
    print("KERNEL_OK")
</pallas_src>

<mosaic_0001>
module attributes {stable_mosaic.version = 11 : i64} {
  func.func @_fused_down_up_kernel(%arg0: i32, %arg1: memref<1x8x2x8x16xf32, #tpu.memory_space<vmem>>, %arg2: memref<128x16xbf16, #tpu.memory_space<vmem>>, %arg3: memref<4x64x8xbf16, #tpu.memory_space<vmem>>, %arg4: memref<1x64x32xf32, #tpu.memory_space<vmem>>, %arg5: memref<1x1x8xf32, #tpu.memory_space<vmem>>, %arg6: memref<1x1x8xf32, #tpu.memory_space<vmem>>, %arg7: memref<2x10x10x16xbf16, #tpu.memory_space<vmem>>, %arg8: memref<10x10x16xbf16, #tpu.memory_space<vmem>>) attributes {dimension_semantics = [#tpu.dimension_semantics<parallel>], iteration_bounds = array<i64: 2>, scalar_prefetch = 0 : i64, scratch_operands = 2 : i64, tpu.core_type = #tpu.core_type<tc>, window_params = [{transform_indices = @transform_0, window_bounds = array<i64: 1, 8, 2, 8, 16>}, {pipeline_mode = #tpu.pipeline_mode<synchronous>, transform_indices = @transform_1, window_bounds = array<i64: 128, 16>}, {pipeline_mode = #tpu.pipeline_mode<synchronous>, transform_indices = @transform_2, window_bounds = array<i64: 4, 64, 8>}, {transform_indices = @transform_3, window_bounds = array<i64: 1, 64, 32>}, {transform_indices = @transform_4, window_bounds = array<i64: 1, 1, 8>}, {transform_indices = @transform_5, window_bounds = array<i64: 1, 1, 8>}]} {
    %c0 = arith.constant 0 : index
    %c0_0 = arith.constant 0 : index
    %c0_1 = arith.constant 0 : index
    %c0_2 = arith.constant 0 : index
    %c0_3 = arith.constant 0 : index
    %0 = vector.load %arg1[%c0, %c0_0, %c0_1, %c0_2, %c0_3] : memref<1x8x2x8x16xf32, #tpu.memory_space<vmem>>, vector<1x8x2x8x16xf32>
    %1 = vector.shape_cast %0 : vector<1x8x2x8x16xf32> to vector<8x2x8x16xf32>
    %cst = arith.constant 0.000000e+00 : f32
    %2 = vector.broadcast %cst : f32 to vector<8x2x8x16xf32>
    %3 = arith.cmpf oge, %1, %2 : vector<8x2x8x16xf32>
    %cst_4 = arith.constant 2.000000e-01 : f32
    %4 = vector.broadcast %cst_4 : f32 to vector<8x2x8x16xf32>
    %5 = arith.mulf %4, %1 : vector<8x2x8x16xf32>
    %6 = arith.select %3, %1, %5 : vector<8x2x8x16xi1>, vector<8x2x8x16xf32>
    %cst_5 = arith.constant 0.000000e+00 : bf16
    %7 = vector.broadcast %cst_5 : bf16 to vector<1x10x16xbf16>
    %cst_6 = arith.constant 0.000000e+00 : bf16
    %8 = vector.broadcast %cst_6 : bf16 to vector<8x1x16xbf16>
    %c0_7 = arith.constant 0 : index
    %c0_8 = arith.constant 0 : index
    %c0_9 = arith.constant 0 : index
    %c0_10 = arith.constant 0 : index
    %9 = vector.load %arg7[%c0_7, %c0_8, %c0_9, %c0_10] : memref<2x10x10x16xbf16, #tpu.memory_space<vmem>>, vector<1x1x10x16xbf16>
    %10 = vector.shape_cast %9 : vector<1x1x10x16xbf16> to vector<1x10x16xbf16>
    %11 = vector.shape_cast %7 : vector<1x10x16xbf16> to vector<1x1x10x16xbf16>
    tpu.vector_store %arg7[%c0_7, %c0_8, %c0_9, %c0_10], %11 {strides = array<i32>} : memref<2x10x10x16xbf16, #tpu.memory_space<vmem>>, vector<1x1x10x16xbf16>,
    %c0_11 = arith.constant 0 : index
    %c9 = arith.constant 9 : index
    %c0_12 = arith.constant 0 : index
    %c0_13 = arith.constant 0 : index
    %12 = vector.load %arg7[%c0_11, %c9, %c0_12, %c0_13] : memref<2x10x10x16xbf16, #tpu.memory_space<vmem>>, vector<1x1x10x16xbf16>
    %13 = vector.shape_cast %12 : vector<1x1x10x16xbf16> to vector<1x10x16xbf16>
    %14 = vector.shape_cast %7 : vector<1x10x16xbf16> to vector<1x1x10x16xbf16>
    tpu.vector_store %arg7[%c0_11, %c9, %c0_12, %c0_13], %14 {strides = array<i32>} : memref<2x10x10x16xbf16, #tpu.memory_space<vmem>>, vector<1x1x10x16xbf16>,
    %c0_14 = arith.constant 0 : index
    %c1 = arith.constant 1 : index
    %c0_15 = arith.constant 0 : index
    %c0_16 = arith.constant 0 : index
    %15 = vector.load %arg7[%c0_14, %c1, %c0_15, %c0_16] : memref<2x10x10x16xbf16, #tpu.memory_space<vmem>>, vector<1x8x1x16xbf16>
    %16 = vector.shape_cast %15 : vector<1x8x1x16xbf16> to vector<8x1x16xbf16>
    %17 = vector.shape_cast %8 : vector<8x1x16xbf16> to vector<1x8x1x16xbf16>
    tpu.vector_store %arg7[%c0_14, %c1, %c0_15, %c0_16], %17 {strides = array<i32>} : memref<2x10x10x16xbf16, #tpu.memory_space<vmem>>, vector<1x8x1x16xbf16>,
    %c0_17 = arith.constant 0 : index
    %c1_18 = arith.constant 1 : index
    %c9_19 = arith.constant 9 : index
    %c0_20 = arith.constant 0 : index
    %18 = vector.load %arg7[%c0_17, %c1_18, %c9_19, %c0_20] : memref<2x10x10x16xbf16, #tpu.memory_space<vmem>>, vector<1x8x1x16xbf16>
    %19 = vector.shape_cast %18 : vector<1x8x1x16xbf16> to vector<8x1x16xbf16>
    %20 = vector.shape_cast %8 : vector<8x1x16xbf16> to vector<1x8x1x16xbf16>
    tpu.vector_store %arg7[%c0_17, %c1_18, %c9_19, %c0_20], %20 {strides = array<i32>} : memref<2x10x10x16xbf16, #tpu.memory_space<vmem>>, vector<1x8x1x16xbf16>,
    %21 = vector.extract_strided_slice %6 {offsets = [0, 0, 0, 0], sizes = [8, 1, 8, 16], strides = [1, 1, 1, 1]} : vector<8x2x8x16xf32> to vector<8x1x8x16xf32>
    %22 = vector.shape_cast %21 : vector<8x1x8x16xf32> to vector<8x8x16xf32>
    %23 = arith.truncf %22 : vector<8x8x16xf32> to vector<8x8x16xbf16>
    %c0_21 = arith.constant 0 : index
    %c1_22 = arith.constant 1 : index
    %c1_23 = arith.constant 1 : index
    %c0_24 = arith.constant 0 : index
    %24 = vector.load %arg7[%c0_21, %c1_22, %c1_23, %c0_24] : memref<2x10x10x16xbf16, #tpu.memory_space<vmem>>, vector<1x8x8x16xbf16>
    %25 = vector.shape_cast %24 : vector<1x8x8x16xbf16> to vector<8x8x16xbf16>
    %26 = vector.shape_cast %23 : vector<8x8x16xbf16> to vector<1x8x8x16xbf16>
    tpu.vector_store %arg7[%c0_21, %c1_22, %c1_23, %c0_24], %26 {strides = array<i32>} : memref<2x10x10x16xbf16, #tpu.memory_space<vmem>>, vector<1x8x8x16xbf16>,
    %c1_25 = arith.constant 1 : index
    %c0_26 = arith.constant 0 : index
    %c0_27 = arith.constant 0 : index
    %c0_28 = arith.constant 0 : index
    %27 = vector.load %arg7[%c1_25, %c0_26, %c0_27, %c0_28] : memref<2x10x10x16xbf16, #tpu.memory_space<vmem>>, vector<1x1x10x16xbf16>
    %28 = vector.shape_cast %27 : vector<1x1x10x16xbf16> to vector<1x10x16xbf16>
    %29 = vector.shape_cast %7 : vector<1x10x16xbf16> to vector<1x1x10x16xbf16>
    tpu.vector_store %arg7[%c1_25, %c0_26, %c0_27, %c0_28], %29 {strides = array<i32>} : memref<2x10x10x16xbf16, #tpu.memory_space<vmem>>, vector<1x1x10x16xbf16>,
    %c1_29 = arith.constant 1 : index
    %c9_30 = arith.constant 9 : index
    %c0_31 = arith.constant 0 : index
    %c0_32 = arith.constant 0 : index
    %30 = vector.load %arg7[%c1_29, %c9_30, %c0_31, %c0_32] : memref<2x10x10x16xbf16, #tpu.memory_space<vmem>>, vector<1x1x10x16xbf16>
    %31 = vector.shape_cast %30 : vector<1x1x10x16xbf16> to vector<1x10x16xbf16>
    %32 = vector.shape_cast %7 : vector<1x10x16xbf16> to vector<1x1x10x16xbf16>
    tpu.vector_store %arg7[%c1_29, %c9_30, %c0_31, %c0_32], %32 {strides = array<i32>} : memref<2x10x10x16xbf16, #tpu.memory_space<vmem>>, vector<1x1x10x16xbf16>,
    %c1_33 = arith.constant 1 : index
    %c1_34 = arith.constant 1 : index
    %c0_35 = arith.constant 0 : index
    %c0_36 = arith.constant 0 : index
    %33 = vector.load %arg7[%c1_33, %c1_34, %c0_35, %c0_36] : memref<2x10x10x16xbf16, #tpu.memory_space<vmem>>, vector<1x8x1x16xbf16>
    %34 = vector.shape_cast %33 : vector<1x8x1x16xbf16> to vector<8x1x16xbf16>
    %35 = vector.shape_cast %8 : vector<8x1x16xbf16> to vector<1x8x1x16xbf16>
    tpu.vector_store %arg7[%c1_33, %c1_34, %c0_35, %c0_36], %35 {strides = array<i32>} : memref<2x10x10x16xbf16, #tpu.memory_space<vmem>>, vector<1x8x1x16xbf16>,
    %c1_37 = arith.constant 1 : index
    %c1_38 = arith.constant 1 : index
    %c9_39 = arith.constant 9 : index
    %c0_40 = arith.constant 0 : index
    %36 = vector.load %arg7[%c1_37, %c1_38, %c9_39, %c0_40] : memref<2x10x10x16xbf16, #tpu.memory_space<vmem>>, vector<1x8x1x16xbf16>
    %37 = vector.shape_cast %36 : vector<1x8x1x16xbf16> to vector<8x1x16xbf16>
    %38 = vector.shape_cast %8 : vector<8x1x16xbf16> to vector<1x8x1x16xbf16>
    tpu.vector_store %arg7[%c1_37, %c1_38, %c9_39, %c0_40], %38 {strides = array<i32>} : memref<2x10x10x16xbf16, #tpu.memory_space<vmem>>, vector<1x8x1x16xbf16>,
    %39 = vector.extract_strided_slice %6 {offsets = [0, 1, 0, 0], sizes = [8, 1, 8, 16], strides = [1, 1, 1, 1]} : vector<8x2x8x16xf32> to vector<8x1x8x16xf32>
    %40 = vector.shape_cast %39 : vector<8x1x8x16xf32> to vector<8x8x16xf32>
    %41 = arith.truncf %40 : vector<8x8x16xf32> to vector<8x8x16xbf16>
    %c1_41 = arith.constant 1 : index
    %c1_42 = arith.constant 1 : index
    %c1_43 = arith.constant 1 : index
    %c0_44 = arith.constant 0 : index
    %42 = vector.load %arg7[%c1_41, %c1_42, %c1_43, %c0_44] : memref<2x10x10x16xbf16, #tpu.memory_space<vmem>>, vector<1x8x8x16xbf16>
    %43 = vector.shape_cast %42 : vector<1x8x8x16xbf16> to vector<8x8x16xbf16>
    %44 = vector.shape_cast %41 : vector<8x8x16xbf16> to vector<1x8x8x16xbf16>
    tpu.vector_store %arg7[%c1_41, %c1_42, %c1_43, %c0_44], %44 {strides = array<i32>} : memref<2x10x10x16xbf16, #tpu.memory_space<vmem>>, vector<1x8x8x16xbf16>,
    %c1_45 = arith.constant 1 : index
    %c0_46 = arith.constant 0 : index
    %c0_47 = arith.constant 0 : index
    %c8 = arith.constant 8 : index
    %45 = vector.load %arg7[%c1_45, %c0_46, %c0_47, %c8] : memref<2x10x10x16xbf16, #tpu.memory_space<vmem>>, vector<1x8x8x8xbf16>
    %46 = vector.shape_cast %45 : vector<1x8x8x8xbf16> to vector<8x8x8xbf16>
    %47 = vector.shape_cast %46 : vector<8x8x8xbf16> to vector<64x8xbf16>
    %c1_48 = arith.constant 1 : index
    %c0_49 = arith.constant 0 : index
    %c1_50 = arith.constant 1 : index
    %c0_51 = arith.constant 0 : index
    %48 = vector.load %arg7[%c1_48, %c0_49, %c1_50, %c0_51] : memref<2x10x10x16xbf16, #tpu.memory_space<vmem>>, vector<1x8x8x8xbf16>
    %49 = vector.shape_cast %48 : vector<1x8x8x8xbf16> to vector<8x8x8xbf16>
    %50 = vector.shape_cast %49 : vector<8x8x8xbf16> to vector<64x8xbf16>
    %c1_52 = arith.constant 1 : index
    %c0_53 = arith.constant 0 : index
    %c1_54 = arith.constant 1 : index
    %c8_55 = arith.constant 8 : index
    %51 = vector.load %arg7[%c1_52, %c0_53, %c1_54, %c8_55] : memref<2x10x10x16xbf16, #tpu.memory_space<vmem>>, vector<1x8x8x8xbf16>
    %52 = vector.shape_cast %51 : vector<1x8x8x8xbf16> to vector<8x8x8xbf16>
    %53 = vector.shape_cast %52 : vector<8x8x8xbf16> to vector<64x8xbf16>
    %c1_56 = arith.constant 1 : index
    %c0_57 = arith.constant 0 : index
    %c2 = arith.constant 2 : index
    %c0_58 = arith.constant 0 : index
    %54 = vector.load %arg7[%c1_56, %c0_57, %c2, %c0_58] : memref<2x10x10x16xbf16, #tpu.memory_space<vmem>>, vector<1x8x8x8xbf16>
    %55 = vector.shape_cast %54 : vector<1x8x8x8xbf16> to vector<8x8x8xbf16>
    %56 = vector.shape_cast %55 : vector<8x8x8xbf16> to vector<64x8xbf16>
    %c0_59 = arith.constant 0 : index
    %c1_60 = arith.constant 1 : index
    %c0_61 = arith.constant 0 : index
    %c8_62 = arith.constant 8 : index
    %57 = vector.load %arg7[%c0_59, %c1_60, %c0_61, %c8_62] : memref<2x10x10x16xbf16, #tpu.memory_space<vmem>>, vector<1x8x8x8xbf16>
    %58 = vector.shape_cast %57 : vector<1x8x8x8xbf16> to vector<8x8x8xbf16>
    %59 = vector.shape_cast %58 : vector<8x8x8xbf16> to vector<64x8xbf16>
    %c0_63 = arith.constant 0 : index
    %c1_64 = arith.constant 1 : index
    %c1_65 = arith.constant 1 : index
    %c0_66 = arith.constant 0 : index
    %60 = vector.load %arg7[%c0_63, %c1_64, %c1_65, %c0_66] : memref<2x10x10x16xbf16, #tpu.memory_space<vmem>>, vector<1x8x8x8xbf16>
    %61 = vector.shape_cast %60 : vector<1x8x8x8xbf16> to vector<8x8x8xbf16>
    %62 = vector.shape_cast %61 : vector<8x8x8xbf16> to vector<64x8xbf16>
    %c0_67 = arith.constant 0 : index
    %c1_68 = arith.constant 1 : index
    %c1_69 = arith.constant 1 : index
    %c8_70 = arith.constant 8 : index
    %63 = vector.load %arg7[%c0_67, %c1_68, %c1_69, %c8_70] : memref<2x10x10x16xbf16, #tpu.memory_space<vmem>>, vector<1x8x8x8xbf16>
    %64 = vector.shape_cast %63 : vector<1x8x8x8xbf16> to vector<8x8x8xbf16>
    %65 = vector.shape_cast %64 : vector<8x8x8xbf16> to vector<64x8xbf16>
    %c0_71 = arith.constant 0 : index
    %c1_72 = arith.constant 1 : index
    %c2_73 = arith.constant 2 : index
    %c0_74 = arith.constant 0 : index
    %66 = vector.load %arg7[%c0_71, %c1_72, %c2_73, %c0_74] : memref<2x10x10x16xbf16, #tpu.memory_space<vmem>>, vector<1x8x8x8xbf16>
    %67 = vector.shape_cast %66 : vector<1x8x8x8xbf16> to vector<8x8x8xbf16>
    %68 = vector.shape_cast %67 : vector<8x8x8xbf16> to vector<64x8xbf16>
    %c1_75 = arith.constant 1 : index
    %c1_76 = arith.constant 1 : index
    %c0_77 = arith.constant 0 : index
    %c8_78 = arith.constant 8 : index
    %69 = vector.load %arg7[%c1_75, %c1_76, %c0_77, %c8_78] : memref<2x10x10x16xbf16, #tpu.memory_space<vmem>>, vector<1x8x8x8xbf16>
    %70 = vector.shape_cast %69 : vector<1x8x8x8xbf16> to vector<8x8x8xbf16>
    %71 = vector.shape_cast %70 : vector<8x8x8xbf16> to vector<64x8xbf16>
    %c1_79 = arith.constant 1 : index
    %c1_80 = arith.constant 1 : index
    %c1_81 = arith.constant 1 : index
    %c0_82 = arith.constant 0 : index
    %72 = vector.load %arg7[%c1_79, %c1_80, %c1_81, %c0_82] : memref<2x10x10x16xbf16, #tpu.memory_space<vmem>>, vector<1x8x8x8xbf16>
    %73 = vector.shape_cast %72 : vector<1x8x8x8xbf16> to vector<8x8x8xbf16>
    %74 = vector.shape_cast %73 : vector<8x8x8xbf16> to vector<64x8xbf16>
    %c1_83 = arith.constant 1 : index
    %c1_84 = arith.constant 1 : index
    %c1_85 = arith.constant 1 : index
    %c8_86 = arith.constant 8 : index
    %75 = vector.load %arg7[%c1_83, %c1_84, %c1_85, %c8_86] : memref<2x10x10x16xbf16, #tpu.memory_space<vmem>>, vector<1x8x8x8xbf16>
    %76 = vector.shape_cast %75 : vector<1x8x8x8xbf16> to vector<8x8x8xbf16>
    %77 = vector.shape_cast %76 : vector<8x8x8xbf16> to vector<64x8xbf16>
    %c1_87 = arith.constant 1 : index
    %c1_88 = arith.constant 1 : index
    %c2_89 = arith.constant 2 : index
    %c0_90 = arith.constant 0 : index
    %78 = vector.load %arg7[%c1_87, %c1_88, %c2_89, %c0_90] : memref<2x10x10x16xbf16, #tpu.memory_space<vmem>>, vector<1x8x8x8xbf16>
    %79 = vector.shape_cast %78 : vector<1x8x8x8xbf16> to vector<8x8x8xbf16>
    %80 = vector.shape_cast %79 : vector<8x8x8xbf16> to vector<64x8xbf16>
    %c0_91 = arith.constant 0 : index
    %c2_92 = arith.constant 2 : index
    %c0_93 = arith.constant 0 : index
    %c8_94 = arith.constant 8 : index
    %81 = vector.load %arg7[%c0_91, %c2_92, %c0_93, %c8_94] : memref<2x10x10x16xbf16, #tpu.memory_space<vmem>>, vector<1x8x8x8xbf16>
    %82 = vector.shape_cast %81 : vector<1x8x8x8xbf16> to vector<8x8x8xbf16>
    %83 = vector.shape_cast %82 : vector<8x8x8xbf16> to vector<64x8xbf16>
    %c0_95 = arith.constant 0 : index
    %c2_96 = arith.constant 2 : index
    %c1_97 = arith.constant 1 : index
    %c0_98 = arith.constant 0 : index
    %84 = vector.load %arg7[%c0_95, %c2_96, %c1_97, %c0_98] : memref<2x10x10x16xbf16, #tpu.memory_space<vmem>>, vector<1x8x8x8xbf16>
    %85 = vector.shape_cast %84 : vector<1x8x8x8xbf16> to vector<8x8x8xbf16>
    %86 = vector.shape_cast %85 : vector<8x8x8xbf16> to vector<64x8xbf16>
    %c0_99 = arith.constant 0 : index
    %c2_100 = arith.constant 2 : index
    %c1_101 = arith.constant 1 : index
    %c8_102 = arith.constant 8 : index
    %87 = vector.load %arg7[%c0_99, %c2_100, %c1_101, %c8_102] : memref<2x10x10x16xbf16, #tpu.memory_space<vmem>>, vector<1x8x8x8xbf16>
    %88 = vector.shape_cast %87 : vector<1x8x8x8xbf16> to vector<8x8x8xbf16>
    %89 = vector.shape_cast %88 : vector<8x8x8xbf16> to vector<64x8xbf16>
    %c0_103 = arith.constant 0 : index
    %c2_104 = arith.constant 2 : index
    %c2_105 = arith.constant 2 : index
    %c0_106 = arith.constant 0 : index
    %90 = vector.load %arg7[%c0_103, %c2_104, %c2_105, %c0_106] : memref<2x10x10x16xbf16, #tpu.memory_space<vmem>>, vector<1x8x8x8xbf16>
    %91 = vector.shape_cast %90 : vector<1x8x8x8xbf16> to vector<8x8x8xbf16>
    %92 = vector.shape_cast %91 : vector<8x8x8xbf16> to vector<64x8xbf16>
    %93 = tpu.concatenate %47, %50, %53, %56, %59, %62, %65, %68, %71, %74, %77, %80, %83, %86, %89, %92 in 1 : vector<64x8xbf16>, vector<64x8xbf16>, vector<64x8xbf16>, vector<64x8xbf16>, vector<64x8xbf16>, vector<64x8xbf16>, vector<64x8xbf16>, vector<64x8xbf16>, vector<64x8xbf16>, vector<64x8xbf16>, vector<64x8xbf16>, vector<64x8xbf16>, vector<64x8xbf16>, vector<64x8xbf16>, vector<64x8xbf16>, vector<64x8xbf16> -> vector<64x128xbf16>
    %c0_107 = arith.constant 0 : index
    %c0_108 = arith.constant 0 : index
    %94 = vector.load %arg2[%c0_107, %c0_108] : memref<128x16xbf16, #tpu.memory_space<vmem>>, vector<128x16xbf16>
    %cst_109 = arith.constant dense<0.000000e+00> : vector<64x16xf32>
    %95 = tpu.matmul %93, %94, %cst_109 {dimension_numbers = #tpu.dot_dimension_numbers<[1], [0], [0], [1], [0, 0, 1, 1], [], []>} : vector<64x128xbf16>, vector<128x16xbf16>, vector<64x16xf32> -> vector<64x16xf32>
    %cst_110 = arith.constant 0.000000e+00 : bf16
    %96 = vector.broadcast %cst_110 : bf16 to vector<1x10x16xbf16>
    %cst_111 = arith.constant 0.000000e+00 : bf16
    %97 = vector.broadcast %cst_111 : bf16 to vector<8x1x16xbf16>
    %c0_112 = arith.constant 0 : index
    %c0_113 = arith.constant 0 : index
    %c0_114 = arith.constant 0 : index
    %98 = vector.load %arg8[%c0_112, %c0_113, %c0_114] : memref<10x10x16xbf16, #tpu.memory_space<vmem>>, vector<1x10x16xbf16>
    tpu.vector_store %arg8[%c0_112, %c0_113, %c0_114], %96 {strides = array<i32>} : memref<10x10x16xbf16, #tpu.memory_space<vmem>>, vector<1x10x16xbf16>,
    %c9_115 = arith.constant 9 : index
    %c0_116 = arith.constant 0 : index
    %c0_117 = arith.constant 0 : index
    %99 = vector.load %arg8[%c9_115, %c0_116, %c0_117] : memref<10x10x16xbf16, #tpu.memory_space<vmem>>, vector<1x10x16xbf16>
    tpu.vector_store %arg8[%c9_115, %c0_116, %c0_117], %96 {strides = array<i32>} : memref<10x10x16xbf16, #tpu.memory_space<vmem>>, vector<1x10x16xbf16>,
    %c1_118 = arith.constant 1 : index
    %c0_119 = arith.constant 0 : index
    %c0_120 = arith.constant 0 : index
    %100 = vector.load %arg8[%c1_118, %c0_119, %c0_120] : memref<10x10x16xbf16, #tpu.memory_space<vmem>>, vector<8x1x16xbf16>
    tpu.vector_store %arg8[%c1_118, %c0_119, %c0_120], %97 {strides = array<i32>} : memref<10x10x16xbf16, #tpu.memory_space<vmem>>, vector<8x1x16xbf16>,
    %c1_121 = arith.constant 1 : index
    %c9_122 = arith.constant 9 : index
    %c0_123 = arith.constant 0 : index
    %101 = vector.load %arg8[%c1_121, %c9_122, %c0_123] : memref<10x10x16xbf16, #tpu.memory_space<vmem>>, vector<8x1x16xbf16>
    tpu.vector_store %arg8[%c1_121, %c9_122, %c0_123], %97 {strides = array<i32>} : memref<10x10x16xbf16, #tpu.memory_space<vmem>>, vector<8x1x16xbf16>,
    %cst_124 = arith.constant 0.000000e+00 : f32
    %102 = vector.broadcast %cst_124 : f32 to vector<64x16xf32>
    %103 = arith.maximumf %95, %102 : vector<64x16xf32>
    %104 = vector.shape_cast %103 : vector<64x16xf32> to vector<8x8x16xf32>
    %105 = arith.truncf %104 : vector<8x8x16xf32> to vector<8x8x16xbf16>
    %c1_125 = arith.constant 1 : index
    %c1_126 = arith.constant 1 : index
    %c0_127 = arith.constant 0 : index
    %106 = vector.load %arg8[%c1_125, %c1_126, %c0_127] : memref<10x10x16xbf16, #tpu.memory_space<vmem>>, vector<8x8x16xbf16>
    tpu.vector_store %arg8[%c1_125, %c1_126, %c0_127], %105 {strides = array<i32>} : memref<10x10x16xbf16, #tpu.memory_space<vmem>>, vector<8x8x16xbf16>,
    %c0_128 = arith.constant 0 : index
    %c0_129 = arith.constant 0 : index
    %c0_130 = arith.constant 0 : index
    %107 = vector.load %arg8[%c0_128, %c0_129, %c0_130] : memref<10x10x16xbf16, #tpu.memory_space<vmem>>, vector<8x8x16xbf16>
    %108 = vector.shape_cast %107 : vector<8x8x16xbf16> to vector<64x16xbf16>
    %c0_131 = arith.constant 0 : index
    %c1_132 = arith.constant 1 : index
    %c0_133 = arith.constant 0 : index
    %109 = vector.load %arg8[%c0_131, %c1_132, %c0_133] : memref<10x10x16xbf16, #tpu.memory_space<vmem>>, vector<8x8x16xbf16>
    %110 = vector.shape_cast %109 : vector<8x8x16xbf16> to vector<64x16xbf16>
    %c0_134 = arith.constant 0 : index
    %c2_135 = arith.constant 2 : index
    %c0_136 = arith.constant 0 : index
    %111 = vector.load %arg8[%c0_134, %c2_135, %c0_136] : memref<10x10x16xbf16, #tpu.memory_space<vmem>>, vector<8x8x16xbf16>
    %112 = vector.shape_cast %111 : vector<8x8x16xbf16> to vector<64x16xbf16>
    %c1_137 = arith.constant 1 : index
    %c0_138 = arith.constant 0 : index
    %c0_139 = arith.constant 0 : index
    %113 = vector.load %arg8[%c1_137, %c0_138, %c0_139] : memref<10x10x16xbf16, #tpu.memory_space<vmem>>, vector<8x8x16xbf16>
    %114 = vector.shape_cast %113 : vector<8x8x16xbf16> to vector<64x16xbf16>
    %c1_140 = arith.constant 1 : index
    %c1_141 = arith.constant 1 : index
    %c0_142 = arith.constant 0 : index
    %115 = vector.load %arg8[%c1_140, %c1_141, %c0_142] : memref<10x10x16xbf16, #tpu.memory_space<vmem>>, vector<8x8x16xbf16>
    %116 = vector.shape_cast %115 : vector<8x8x16xbf16> to vector<64x16xbf16>
    %c1_143 = arith.constant 1 : index
    %c2_144 = arith.constant 2 : index
    %c0_145 = arith.constant 0 : index
    %117 = vector.load %arg8[%c1_143, %c2_144, %c0_145] : memref<10x10x16xbf16, #tpu.memory_space<vmem>>, vector<8x8x16xbf16>
    %118 = vector.shape_cast %117 : vector<8x8x16xbf16> to vector<64x16xbf16>
    %c2_146 = arith.constant 2 : index
    %c0_147 = arith.constant 0 : index
    %c0_148 = arith.constant 0 : index
    %119 = vector.load %arg8[%c2_146, %c0_147, %c0_148] : memref<10x10x16xbf16, #tpu.memory_space<vmem>>, vector<8x8x16xbf16>
    %120 = vector.shape_cast %119 : vector<8x8x16xbf16> to vector<64x16xbf16>
    %c2_149 = arith.constant 2 : index
    %c1_150 = arith.constant 1 : index
    %c0_151 = arith.constant 0 : index
    %121 = vector.load %arg8[%c2_149, %c1_150, %c0_151] : memref<10x10x16xbf16, #tpu.memory_space<vmem>>, vector<8x8x16xbf16>
    %122 = vector.shape_cast %121 : vector<8x8x16xbf16> to vector<64x16xbf16>
    %c2_152 = arith.constant 2 : index
    %c2_153 = arith.constant 2 : index
    %c0_154 = arith.constant 0 : index
    %123 = vector.load %arg8[%c2_152, %c2_153, %c0_154] : memref<10x10x16xbf16, #tpu.memory_space<vmem>>, vector<8x8x16xbf16>
    %124 = vector.shape_cast %123 : vector<8x8x16xbf16> to vector<64x16xbf16>
    %cst_155 = arith.constant 0.000000e+00 : f32
    %125 = vector.broadcast %cst_155 : f32 to vector<1x8xf32>
    %cst_156 = arith.constant 0.000000e+00 : f32
    %126 = vector.broadcast %cst_156 : f32 to vector<1x8xf32>
    %127 = tpu.concatenate %108, %110, %114, %116 in 1 : vector<64x16xbf16>, vector<64x16xbf16>, vector<64x16xbf16>, vector<64x16xbf16> -> vector<64x64xbf16>
    %c0_157 = arith.constant 0 : index
    %c0_158 = arith.constant 0 : index
    %c0_159 = arith.constant 0 : index
    %128 = vector.load %arg3[%c0_157, %c0_158, %c0_159] : memref<4x64x8xbf16, #tpu.memory_space<vmem>>, vector<1x64x8xbf16>
    %129 = vector.shape_cast %128 : vector<1x64x8xbf16> to vector<64x8xbf16>
    %cst_160 = arith.constant dense<0.000000e+00> : vector<64x8xf32>
    %130 = tpu.matmul %127, %129, %cst_160 {dimension_numbers = #tpu.dot_dimension_numbers<[1], [0], [0], [1], [0, 0, 1, 1], [], []>} : vector<64x64xbf16>, vector<64x8xbf16>, vector<64x8xf32> -> vector<64x8xf32>
    %cst_161 = arith.constant dense<0.000000e+00> : vector<8xf32>
    %131 = vector.multi_reduction <add>, %130, %cst_161 [0] : vector<64x8xf32> to vector<8xf32>
    %132 = vector.shape_cast %131 : vector<8xf32> to vector<1x8xf32>
    %133 = arith.addf %125, %132 : vector<1x8xf32>
    %134 = arith.mulf %130, %130 : vector<64x8xf32>
    %cst_162 = arith.constant dense<0.000000e+00> : vector<8xf32>
    %135 = vector.multi_reduction <add>, %134, %cst_162 [0] : vector<64x8xf32> to vector<8xf32>
    %136 = vector.shape_cast %135 : vector<8xf32> to vector<1x8xf32>
    %137 = arith.addf %126, %136 : vector<1x8xf32>
    %138 = tpu.concatenate %110, %112, %116, %118 in 1 : vector<64x16xbf16>, vector<64x16xbf16>, vector<64x16xbf16>, vector<64x16xbf16> -> vector<64x64xbf16>
    %c1_163 = arith.constant 1 : index
    %c0_164 = arith.constant 0 : index
    %c0_165 = arith.constant 0 : index
    %139 = vector.load %arg3[%c1_163, %c0_164, %c0_165] : memref<4x64x8xbf16, #tpu.memory_space<vmem>>, vector<1x64x8xbf16>
    %140 = vector.shape_cast %139 : vector<1x64x8xbf16> to vector<64x8xbf16>
    %cst_166 = arith.constant dense<0.000000e+00> : vector<64x8xf32>
    %141 = tpu.matmul %138, %140, %cst_166 {dimension_numbers = #tpu.dot_dimension_numbers<[1], [0], [0], [1], [0, 0, 1, 1], [], []>} : vector<64x64xbf16>, vector<64x8xbf16>, vector<64x8xf32> -> vector<64x8xf32>
    %cst_167 = arith.constant dense<0.000000e+00> : vector<8xf32>
    %142 = vector.multi_reduction <add>, %141, %cst_167 [0] : vector<64x8xf32> to vector<8xf32>
    %143 = vector.shape_cast %142 : vector<8xf32> to vector<1x8xf32>
    %144 = arith.addf %133, %143 : vector<1x8xf32>
    %145 = arith.mulf %141, %141 : vector<64x8xf32>
    %cst_168 = arith.constant dense<0.000000e+00> : vector<8xf32>
    %146 = vector.multi_reduction <add>, %145, %cst_168 [0] : vector<64x8xf32> to vector<8xf32>
    %147 = vector.shape_cast %146 : vector<8xf32> to vector<1x8xf32>
    %148 = arith.addf %137, %147 : vector<1x8xf32>
    %149 = tpu.concatenate %114, %116, %120, %122 in 1 : vector<64x16xbf16>, vector<64x16xbf16>, vector<64x16xbf16>, vector<64x16xbf16> -> vector<64x64xbf16>
    %c2_169 = arith.constant 2 : index
    %c0_170 = arith.constant 0 : index
    %c0_171 = arith.constant 0 : index
    %150 = vector.load %arg3[%c2_169, %c0_170, %c0_171] : memref<4x64x8xbf16, #tpu.memory_space<vmem>>, vector<1x64x8xbf16>
    %151 = vector.shape_cast %150 : vector<1x64x8xbf16> to vector<64x8xbf16>
    %cst_172 = arith.constant dense<0.000000e+00> : vector<64x8xf32>
    %152 = tpu.matmul %149, %151, %cst_172 {dimension_numbers = #tpu.dot_dimension_numbers<[1], [0], [0], [1], [0, 0, 1, 1], [], []>} : vector<64x64xbf16>, vector<64x8xbf16>, vector<64x8xf32> -> vector<64x8xf32>
    %cst_173 = arith.constant dense<0.000000e+00> : vector<8xf32>
    %153 = vector.multi_reduction <add>, %152, %cst_173 [0] : vector<64x8xf32> to vector<8xf32>
    %154 = vector.shape_cast %153 : vector<8xf32> to vector<1x8xf32>
    %155 = arith.addf %144, %154 : vector<1x8xf32>
    %156 = arith.mulf %152, %152 : vector<64x8xf32>
    %cst_174 = arith.constant dense<0.000000e+00> : vector<8xf32>
    %157 = vector.multi_reduction <add>, %156, %cst_174 [0] : vector<64x8xf32> to vector<8xf32>
    %158 = vector.shape_cast %157 : vector<8xf32> to vector<1x8xf32>
    %159 = arith.addf %148, %158 : vector<1x8xf32>
    %160 = tpu.concatenate %116, %118, %122, %124 in 1 : vector<64x16xbf16>, vector<64x16xbf16>, vector<64x16xbf16>, vector<64x16xbf16> -> vector<64x64xbf16>
    %c3 = arith.constant 3 : index
    %c0_175 = arith.constant 0 : index
    %c0_176 = arith.constant 0 : index
    %161 = vector.load %arg3[%c3, %c0_175, %c0_176] : memref<4x64x8xbf16, #tpu.memory_space<vmem>>, vector<1x64x8xbf16>
    %162 = vector.shape_cast %161 : vector<1x64x8xbf16> to vector<64x8xbf16>
    %cst_177 = arith.constant dense<0.000000e+00> : vector<64x8xf32>
    %163 = tpu.matmul %160, %162, %cst_177 {dimension_numbers = #tpu.dot_dimension_numbers<[1], [0], [0], [1], [0, 0, 1, 1], [], []>} : vector<64x64xbf16>, vector<64x8xbf16>, vector<64x8xf32> -> vector<64x8xf32>
    %cst_178 = arith.constant dense<0.000000e+00> : vector<8xf32>
    %164 = vector.multi_reduction <add>, %163, %cst_178 [0] : vector<64x8xf32> to vector<8xf32>
    %165 = vector.shape_cast %164 : vector<8xf32> to vector<1x8xf32>
    %166 = arith.addf %155, %165 : vector<1x8xf32>
    %167 = arith.mulf %163, %163 : vector<64x8xf32>
    %cst_179 = arith.constant dense<0.000000e+00> : vector<8xf32>
    %168 = vector.multi_reduction <add>, %167, %cst_179 [0] : vector<64x8xf32> to vector<8xf32>
    %169 = vector.shape_cast %168 : vector<8xf32> to vector<1x8xf32>
    %170 = arith.addf %159, %169 : vector<1x8xf32>
    %171 = tpu.concatenate %130, %141, %152, %163 in 1 : vector<64x8xf32>, vector<64x8xf32>, vector<64x8xf32>, vector<64x8xf32> -> vector<64x32xf32>
    %c0_180 = arith.constant 0 : index
    %c0_181 = arith.constant 0 : index
    %c0_182 = arith.constant 0 : index
    %172 = vector.load %arg4[%c0_180, %c0_181, %c0_182] : memref<1x64x32xf32, #tpu.memory_space<vmem>>, vector<1x64x32xf32>
    %173 = vector.shape_cast %172 : vector<1x64x32xf32> to vector<64x32xf32>
    %174 = vector.shape_cast %171 : vector<64x32xf32> to vector<1x64x32xf32>
    tpu.vector_store %arg4[%c0_180, %c0_181, %c0_182], %174 {strides = array<i32>} : memref<1x64x32xf32, #tpu.memory_space<vmem>>, vector<1x64x32xf32>,
    %c0_183 = arith.constant 0 : index
    %c0_184 = arith.constant 0 : index
    %c0_185 = arith.constant 0 : index
    %175 = vector.load %arg5[%c0_183, %c0_184, %c0_185] : memref<1x1x8xf32, #tpu.memory_space<vmem>>, vector<1x1x8xf32>
    %176 = vector.shape_cast %175 : vector<1x1x8xf32> to vector<1x8xf32>
    %177 = vector.shape_cast %166 : vector<1x8xf32> to vector<1x1x8xf32>
    tpu.vector_store %arg5[%c0_183, %c0_184, %c0_185], %177 {strides = array<i32>} : memref<1x1x8xf32, #tpu.memory_space<vmem>>, vector<1x1x8xf32>,
    %c0_186 = arith.constant 0 : index
    %c0_187 = arith.constant 0 : index
    %c0_188 = arith.constant 0 : index
    %178 = vector.load %arg6[%c0_186, %c0_187, %c0_188] : memref<1x1x8xf32, #tpu.memory_space<vmem>>, vector<1x1x8xf32>
    %179 = vector.shape_cast %178 : vector<1x1x8xf32> to vector<1x8xf32>
    %180 = vector.shape_cast %170 : vector<1x8xf32> to vector<1x1x8xf32>
    tpu.vector_store %arg6[%c0_186, %c0_187, %c0_188], %180 {strides = array<i32>} : memref<1x1x8xf32, #tpu.memory_space<vmem>>, vector<1x1x8xf32>,
    return
  }
  func.func @transform_0(%arg0: i32) -> (i32, i32, i32, i32, i32) {
    %c0_i32 = arith.constant 0 : i32
    %c0_i32_0 = arith.constant 0 : i32
    %c0_i32_1 = arith.constant 0 : i32
    %c0_i32_2 = arith.constant 0 : i32
    %c0_i32_3 = arith.constant 0 : i32
    return %arg0, %c0_i32, %c0_i32_0, %c0_i32_1, %c0_i32_2 : i32, i32, i32, i32, i32
  }
  func.func @transform_1(%arg0: i32) -> (i32, i32) {
    %c0_i32 = arith.constant 0 : i32
    %c0_i32_0 = arith.constant 0 : i32
    %c0_i32_1 = arith.constant 0 : i32
    return %c0_i32, %c0_i32_0 : i32, i32
  }
  func.func @transform_2(%arg0: i32) -> (i32, i32, i32) {
    %c0_i32 = arith.constant 0 : i32
    %c0_i32_0 = arith.constant 0 : i32
    %c0_i32_1 = arith.constant 0 : i32
    %c0_i32_2 = arith.constant 0 : i32
    return %c0_i32, %c0_i32_0, %c0_i32_1 : i32, i32, i32
  }
  func.func @transform_3(%arg0: i32) -> (i32, i32, i32) {
    %c0_i32 = arith.constant 0 : i32
    %c0_i32_0 = arith.constant 0 : i32
    %c0_i32_1 = arith.constant 0 : i32
    return %arg0, %c0_i32, %c0_i32_0 : i32, i32, i32
  }
  func.func @transform_4(%arg0: i32) -> (i32, i32, i32) {
    %c0_i32 = arith.constant 0 : i32
    %c0_i32_0 = arith.constant 0 : i32
    %c0_i32_1 = arith.constant 0 : i32
    return %arg0, %c0_i32, %c0_i32_0 : i32, i32, i32
  }
  func.func @transform_5(%arg0: i32) -> (i32, i32, i32) {
    %c0_i32 = arith.constant 0 : i32
    %c0_i32_0 = arith.constant 0 : i32
    %c0_i32_1 = arith.constant 0 : i32
    return %arg0, %c0_i32, %c0_i32_0 : i32, i32, i32
  }
}

module attributes {stable_mosaic.version = 11 : i64} {
  func.func @_bn_concat_kernel(%arg0: i32, %arg1: memref<1x8x2x8x16xf32, #tpu.memory_space<vmem>>, %arg2: memref<1x64x32xf32, #tpu.memory_space<vmem>>, %arg3: memref<1x8xf32, #tpu.memory_space<vmem>>, %arg4: memref<1x8xf32, #tpu.memory_space<vmem>>, %arg5: memref<1x64x64xf32, #tpu.memory_space<vmem>>) attributes {dimension_semantics = [#tpu.dimension_semantics<parallel>], iteration_bounds = array<i64: 2>, scalar_prefetch = 0 : i64, scratch_operands = 0 : i64, tpu.core_type = #tpu.core_type<tc>, window_params = [{transform_indices = @transform_0, window_bounds = array<i64: 1, 8, 2, 8, 16>}, {transform_indices = @transform_1, window_bounds = array<i64: 1, 64, 32>}, {pipeline_mode = #tpu.pipeline_mode<synchronous>, transform_indices = @transform_2, window_bounds = array<i64: 1, 8>}, {pipeline_mode = #tpu.pipeline_mode<synchronous>, transform_indices = @transform_3, window_bounds = array<i64: 1, 8>}, {transform_indices = @transform_4, window_bounds = array<i64: 1, 64, 64>}]} {
    %c0 = arith.constant 0 : index
    %c0_0 = arith.constant 0 : index
    %c0_1 = arith.constant 0 : index
    %c0_2 = arith.constant 0 : index
    %c0_3 = arith.constant 0 : index
    %0 = vector.load %arg1[%c0, %c0_0, %c0_1, %c0_2, %c0_3] : memref<1x8x2x8x16xf32, #tpu.memory_space<vmem>>, vector<1x8x2x8x16xf32>
    %1 = vector.shape_cast %0 : vector<1x8x2x8x16xf32> to vector<8x2x8x16xf32>
    %c0_4 = arith.constant 0 : index
    %c0_5 = arith.constant 0 : index
    %c0_6 = arith.constant 0 : index
    %2 = vector.load %arg2[%c0_4, %c0_5, %c0_6] : memref<1x64x32xf32, #tpu.memory_space<vmem>>, vector<1x64x32xf32>
    %3 = vector.shape_cast %2 : vector<1x64x32xf32> to vector<64x32xf32>
    %c0_7 = arith.constant 0 : index
    %c0_8 = arith.constant 0 : index
    %4 = vector.load %arg3[%c0_7, %c0_8] : memref<1x8xf32, #tpu.memory_space<vmem>>, vector<1x8xf32>
    %c0_9 = arith.constant 0 : index
    %c0_10 = arith.constant 0 : index
    %5 = vector.load %arg4[%c0_9, %c0_10] : memref<1x8xf32, #tpu.memory_space<vmem>>, vector<1x8xf32>
    %6 = vector.extract_strided_slice %1 {offsets = [0, 0, 0, 0], sizes = [8, 1, 8, 8], strides = [1, 1, 1, 1]} : vector<8x2x8x16xf32> to vector<8x1x8x8xf32>
    %7 = vector.shape_cast %6 : vector<8x1x8x8xf32> to vector<8x8x8xf32>
    %8 = vector.shape_cast %7 : vector<8x8x8xf32> to vector<64x8xf32>
    %9 = vector.extract_strided_slice %3 {offsets = [0, 0], sizes = [64, 8], strides = [1, 1]} : vector<64x32xf32> to vector<64x8xf32>
    %10 = vector.broadcast %4 : vector<1x8xf32> to vector<64x8xf32>
    %11 = arith.mulf %9, %10 : vector<64x8xf32>
    %12 = vector.broadcast %5 : vector<1x8xf32> to vector<64x8xf32>
    %13 = arith.addf %11, %12 : vector<64x8xf32>
    %14 = vector.extract_strided_slice %1 {offsets = [0, 0, 0, 8], sizes = [8, 1, 8, 8], strides = [1, 1, 1, 1]} : vector<8x2x8x16xf32> to vector<8x1x8x8xf32>
    %15 = vector.shape_cast %14 : vector<8x1x8x8xf32> to vector<8x8x8xf32>
    %16 = vector.shape_cast %15 : vector<8x8x8xf32> to vector<64x8xf32>
    %17 = vector.extract_strided_slice %3 {offsets = [0, 8], sizes = [64, 8], strides = [1, 1]} : vector<64x32xf32> to vector<64x8xf32>
    %18 = vector.broadcast %4 : vector<1x8xf32> to vector<64x8xf32>
    %19 = arith.mulf %17, %18 : vector<64x8xf32>
    %20 = vector.broadcast %5 : vector<1x8xf32> to vector<64x8xf32>
    %21 = arith.addf %19, %20 : vector<64x8xf32>
    %22 = vector.extract_strided_slice %1 {offsets = [0, 1, 0, 0], sizes = [8, 1, 8, 8], strides = [1, 1, 1, 1]} : vector<8x2x8x16xf32> to vector<8x1x8x8xf32>
    %23 = vector.shape_cast %22 : vector<8x1x8x8xf32> to vector<8x8x8xf32>
    %24 = vector.shape_cast %23 : vector<8x8x8xf32> to vector<64x8xf32>
    %25 = vector.extract_strided_slice %3 {offsets = [0, 16], sizes = [64, 8], strides = [1, 1]} : vector<64x32xf32> to vector<64x8xf32>
    %26 = vector.broadcast %4 : vector<1x8xf32> to vector<64x8xf32>
    %27 = arith.mulf %25, %26 : vector<64x8xf32>
    %28 = vector.broadcast %5 : vector<1x8xf32> to vector<64x8xf32>
    %29 = arith.addf %27, %28 : vector<64x8xf32>
    %30 = vector.extract_strided_slice %1 {offsets = [0, 1, 0, 8], sizes = [8, 1, 8, 8], strides = [1, 1, 1, 1]} : vector<8x2x8x16xf32> to vector<8x1x8x8xf32>
    %31 = vector.shape_cast %30 : vector<8x1x8x8xf32> to vector<8x8x8xf32>
    %32 = vector.shape_cast %31 : vector<8x8x8xf32> to vector<64x8xf32>
    %33 = vector.extract_strided_slice %3 {offsets = [0, 24], sizes = [64, 8], strides = [1, 1]} : vector<64x32xf32> to vector<64x8xf32>
    %34 = vector.broadcast %4 : vector<1x8xf32> to vector<64x8xf32>
    %35 = arith.mulf %33, %34 : vector<64x8xf32>
    %36 = vector.broadcast %5 : vector<1x8xf32> to vector<64x8xf32>
    %37 = arith.addf %35, %36 : vector<64x8xf32>
    %38 = tpu.concatenate %8, %13, %16, %21, %24, %29, %32, %37 in 1 : vector<64x8xf32>, vector<64x8xf32>, vector<64x8xf32>, vector<64x8xf32>, vector<64x8xf32>, vector<64x8xf32>, vector<64x8xf32>, vector<64x8xf32> -> vector<64x64xf32>
    %c0_11 = arith.constant 0 : index
    %c0_12 = arith.constant 0 : index
    %c0_13 = arith.constant 0 : index
    %39 = vector.load %arg5[%c0_11, %c0_12, %c0_13] : memref<1x64x64xf32, #tpu.memory_space<vmem>>, vector<1x64x64xf32>
    %40 = vector.shape_cast %39 : vector<1x64x64xf32> to vector<64x64xf32>
    %41 = vector.shape_cast %38 : vector<64x64xf32> to vector<1x64x64xf32>
    tpu.vector_store %arg5[%c0_11, %c0_12, %c0_13], %41 {strides = array<i32>} : memref<1x64x64xf32, #tpu.memory_space<vmem>>, vector<1x64x64xf32>,
    return
  }
  func.func @transform_0(%arg0: i32) -> (i32, i32, i32, i32, i32) {
    %c0_i32 = arith.constant 0 : i32
    %c0_i32_0 = arith.constant 0 : i32
    %c0_i32_1 = arith.constant 0 : i32
    %c0_i32_2 = arith.constant 0 : i32
    %c0_i32_3 = arith.constant 0 : i32
    return %arg0, %c0_i32, %c0_i32_0, %c0_i32_1, %c0_i32_2 : i32, i32, i32, i32, i32
  }
  func.func @transform_1(%arg0: i32) -> (i32, i32, i32) {
    %c0_i32 = arith.constant 0 : i32
    %c0_i32_0 = arith.constant 0 : i32
    %c0_i32_1 = arith.constant 0 : i32
    return %arg0, %c0_i32, %c0_i32_0 : i32, i32, i32
  }
  func.func @transform_2(%arg0: i32) -> (i32, i32) {
    %c0_i32 = arith.constant 0 : i32
    %c0_i32_0 = arith.constant 0 : i32
    %c0_i32_1 = arith.constant 0 : i32
    return %c0_i32, %c0_i32_0 : i32, i32
  }
  func.func @transform_3(%arg0: i32) -> (i32, i32) {
    %c0_i32 = arith.constant 0 : i32
    %c0_i32_0 = arith.constant 0 : i32
    %c0_i32_1 = arith.constant 0 : i32
    return %c0_i32, %c0_i32_0 : i32, i32
  }
  func.func @transform_4(%arg0: i32) -> (i32, i32, i32) {
    %c0_i32 = arith.constant 0 : i32
    %c0_i32_0 = arith.constant 0 : i32
    %c0_i32_1 = arith.constant 0 : i32
    return %arg0, %c0_i32, %c0_i32_0 : i32, i32, i32
  }
}

</mosaic_0001>

<bundles_post_ra>
// kernel: unet_skip_block_innermost.3
= control target key start
LH: loop header
LB: loop body
LE: loop exit
PB: predicated region body
PF: predicated region fallthrough
CT: control target
= control target key end

     0   :  { %s762_s15 = smov 0   ;;  %s1094_s0 = inlined_call_operand.vmem [shape: f32[2,8,2,8,16], index: 0, kind: input, shape index: {}]   ;;  %s1095_s1 = inlined_call_operand.vmem [shape: f32[2,64,32], index: 1, kind: input, shape index: {}]   ;;  %s1096_s2 = inlined_call_operand.vmem [shape: f32[1,8], index: 2, kind: input, shape index: {}]   ;;  %s1097_s3 = inlined_call_operand.vmem [shape: f32[1,8], index: 3, kind: input, shape index: {}]   ;;  %s1098_s4 = inlined_call_operand.vmem [shape: f32[2,64,64], index: 4, kind: output, shape index: {}]  }
   0x1 LB: > { %s693_s16 = sadd.s32 4294967295, %s730_s15   ;;  %p697_p0 = scmp.ge.s32.totalorder %s730_s15, 1  ;;  %s730_s15 = sphi %s762_s15, %s14_s15  }
   0x2   : > { %p172_p1 = scmp.lt.s32.totalorder %s730_s15, 3 }
   0x4   : > { %p173_p2 = pnand %p697_p0, %p172_p1 }
   0x5   : > { %v704_v0 = vld [vmem:[%s1096_s2] ss:$0 sm:$0xff] (!%p173_p2)  ;;  %s732_s19 = smov (!%p173_p2), 8   ;;  %s733_s20 = smov (!%p173_p2), 16   ;;  %vm554_vm0 = vcmask (!%p173_p2), 64512   ;;  %vm563_vm1 = vcmask (!%p173_p2), 130048  }
   0x6   : > { %176 = sbr.rel (%p173_p2) target bundleno = 288 (0x120), region = 36  ;;  %272 = vrot.lane.b32.xlu0 (!%p173_p2), %v704_v0, %s732_s19  ;;  %294 = vrot.lane.b32.xlu1 (!%p173_p2), %v704_v0, %s733_s20  ;;  %p203_p3 = scmp.lt.s32.totalorder (!%p173_p2), %s693_s16, 1  ;;  %v705_v1 = vld [vmem:[%s1097_s3] ss:$0 sm:$0xff] (!%p173_p2)  ;;  %vm572_vm2 = vcmask (!%p173_p2), 195584   ;;  %vm581_vm3 = vcmask (!%p173_p2), 261120  }
   0x7   : > { %s734_s27 = smov (!%p173_p2), 24   ;;  %s735_s6 = smov (!%p173_p2), 32   ;;  %vm590_vm4 = vcmask (!%p173_p2), 326656   ;;  %vm599_vm5 = vcmask (!%p173_p2), 392192   ;;  %vm608_vm6 = vcmask (!%p173_p2), 457728   ;;  %vm617_vm7 = vcmask (!%p173_p2), 523264  }
   0x8   : > { %s736_s7 = smov (!%p173_p2), 40  }
   0xa   : > { %283 = vrot.lane.b32.xlu0 (!%p173_p2), %v705_v1, %s732_s19  ;;  %305 = vrot.lane.b32.xlu1 (!%p173_p2), %v705_v1, %s733_s20 }
   0xd   : > { %s1100_s16 = smov (!%p203_p3, %s693_s16), 1 }
   0xe   : > { %s709_s23 = sshll.u32 %s1100_s16, 6  ;;  %316 = vrot.lane.b32.xlu0 %v704_v0, %s734_s27  ;;  %327 = vrot.lane.b32.xlu1 %v705_v1, %s734_s27  ;;  %s708_s28 = sshll.u32 %s1100_s16, 7 }
   0xf   : > { %s212_s26 = scalar_lea.vmem %s1095_s1, %s709_s23  ;;  %s824_s5 = scalar_lea.vmem %s1094_s0, %s708_s28 }
  0x10   : > { %v788_v2 = vld [vmem:[%s212_s26 + $0x8] sm:$0xff]  ;;  %v790_v3 = vld [vmem:[%s212_s26] sm:$0xff]  ;;  %v792_v4 = vld [vmem:[%s212_s26 + $0x18] sm:$0xff]  ;;  %s1033_s10 = scalar_lea.vmem %s1098_s4, %s709_s23 }
  0x11   : > { %v251_v5 = vmul.f32 %v704_v0, %v788_v2  ;;  %v250_v6 = vmul.f32 %v704_v0, %v790_v3  ;;  %v796_v7 = vld [vmem:[%s212_s26 + $0x10] sm:$0xff]  ;;  %v253_v8 = vmul.f32 %v704_v0, %v792_v4  ;;  %v802_v10 = vld [vmem:[%s212_s26 + $0x28] sm:$0xff]  ;;  %v804_v13 = vld [vmem:[%s212_s26 + $0x20] sm:$0xff] }
  0x12   : > { %v252_v9 = vmul.f32 %v704_v0, %v796_v7  ;;  %v255_v14 = vmul.f32 %v704_v0, %v802_v10  ;;  %v254_v17 = vmul.f32 %v704_v0, %v804_v13  ;;  %v810_v18 = vld [vmem:[%s212_s26 + $0x38] sm:$0xff]  ;;  %v812_v19 = vld [vmem:[%s212_s26 + $0x30] sm:$0xff]  ;;  %v832_v27 = vld [vmem:[%s824_s5] sm:$0xff] }
  0x13   : > { %v265_v11 = vadd.f32 %v705_v1, %v251_v5  ;;  %v264_v12 = vadd.f32 %v705_v1, %v250_v6  ;;  %v267_v15 = vadd.f32 %v705_v1, %v253_v8  ;;  %v257_v20 = vmul.f32 %v704_v0, %v810_v18  ;;  %v829_v26 = vld [vmem:[%s824_s5 + $0x10] sm:$0xff]  ;;  %v842_v29 = vld [vmem:[%s824_s5 + $0x20] sm:$0xff]  ;;  %v221_v34 = vld [vmem:[%s824_s5 + $0x18] sm:$0xff] }
  0x14   : > { %v266_v16 = vadd.f32 %v705_v1, %v252_v9  ;;  %v269_v21 = vadd.f32 %v705_v1, %v255_v14  ;;  %v268_v22 = vadd.f32 %v705_v1, %v254_v17  ;;  %v256_v23 = vmul.f32 %v704_v0, %v812_v19  ;;  %v839_v28 = vld [vmem:[%s824_s5 + $0x30] sm:$0xff]  ;;  %v852_v31 = vld [vmem:[%s824_s5 + $0x40] sm:$0xff]  ;;  %v219_v35 = vld [vmem:[%s824_s5 + $0x8] sm:$0xff] }
  0x15   : > { %348 = vrot.lane.b32.xlu1 %v265_v11, %s732_s19  ;;  %346 = vrot.lane.b32.xlu0 %v264_v12, %s732_s19  ;;  %v271_v24 = vadd.f32 %v705_v1, %v257_v20  ;;  %v849_v30 = vld [vmem:[%s824_s5 + $0x50] sm:$0xff]  ;;  %v862_v33 = vld [vmem:[%s824_s5 + $0x60] sm:$0xff] }
  0x16   : > { %v270_v25 = vadd.f32 %v705_v1, %v256_v23  ;;  %v859_v32 = vld [vmem:[%s824_s5 + $0x70] sm:$0xff]  ;;  %v225_v36 = vld [vmem:[%s824_s5 + $0x38] sm:$0xff]  ;;  %v223_v37 = vld [vmem:[%s824_s5 + $0x28] sm:$0xff] }
  0x17   : > { %v229_v38 = vld [vmem:[%s824_s5 + $0x58] sm:$0xff]  ;;  %v227_v39 = vld [vmem:[%s824_s5 + $0x48] sm:$0xff] }
  0x18   : > { %v233_v40 = vld [vmem:[%s824_s5 + $0x78] sm:$0xff]  ;;  %v231_v41 = vld [vmem:[%s824_s5 + $0x68] sm:$0xff] }
  0x19   : > { %352 = vrot.lane.b32.xlu1 %v267_v15, %s732_s19  ;;  %350 = vrot.lane.b32.xlu0 %v266_v16, %s732_s19 }
  0x1d   : > { %356 = vrot.lane.b32.xlu1 %v269_v21, %s732_s19  ;;  %354 = vrot.lane.b32.xlu0 %v268_v22, %s732_s19 }
  0x21   : > { %360 = vrot.lane.b32.xlu1 %v271_v24, %s732_s19  ;;  %358 = vrot.lane.b32.xlu0 %v270_v25, %s732_s19 }
  0x25   : > { %380 = vrot.lane.b32.xlu1 %v829_v26, %s732_s19  ;;  %378 = vrot.lane.b32.xlu0 %v832_v27, %s732_s19 }
  0x29   : > { %384 = vrot.lane.b32.xlu1 %v839_v28, %s732_s19  ;;  %382 = vrot.lane.b32.xlu0 %v842_v29, %s732_s19 }
  0x2d   : > { %388 = vrot.lane.b32.xlu1 %v849_v30, %s732_s19  ;;  %386 = vrot.lane.b32.xlu0 %v852_v31, %s732_s19 }
  0x31   : > { %392 = vrot.lane.b32.xlu1 %v859_v32, %s732_s19  ;;  %390 = vrot.lane.b32.xlu0 %v862_v33, %s732_s19 }
  0x35   : > { %444 = vrot.lane.b32.xlu1 %v221_v34, %s735_s6  ;;  %442 = vrot.lane.b32.xlu0 %v219_v35, %s735_s6 }
  0x39   : > { %448 = vrot.lane.b32.xlu1 %v225_v36, %s735_s6  ;;  %446 = vrot.lane.b32.xlu0 %v223_v37, %s735_s6 }
  0x3d   : > { %452 = vrot.lane.b32.xlu1 %v229_v38, %s735_s6  ;;  %450 = vrot.lane.b32.xlu0 %v227_v39, %s735_s6 }
  0x41   : > { %456 = vrot.lane.b32.xlu1 %v233_v40, %s735_s6  ;;  %454 = vrot.lane.b32.xlu0 %v231_v41, %s735_s6 }
  0x45   : > { %500 = vrot.lane.b32.xlu1 %v221_v34, %s736_s7  ;;  %498 = vrot.lane.b32.xlu0 %v219_v35, %s736_s7 }
  0x49   : > { %504 = vrot.lane.b32.xlu1 %v225_v36, %s736_s7  ;;  %502 = vrot.lane.b32.xlu0 %v223_v37, %s736_s7 }
  0x4d   : > { %508 = vrot.lane.b32.xlu1 %v229_v38, %s736_s7  ;;  %506 = vrot.lane.b32.xlu0 %v227_v39, %s736_s7 }
  0x51   : > { %512 = vrot.lane.b32.xlu1 %v233_v40, %s736_s7  ;;  %510 = vrot.lane.b32.xlu0 %v231_v41, %s736_s7 }
  0x78   : > { %v273_v42 = vpop.permute.xlu0 %272  ;;  %v295_v43 = vpop.permute.xlu1 %294 }
  0x79   : > { %v276_v44 = vmul.f32 %v273_v42, %v788_v2  ;;  %v275_v45 = vmul.f32 %v273_v42, %v790_v3  ;;  %v278_v50 = vmul.f32 %v273_v42, %v792_v4  ;;  %v277_v51 = vmul.f32 %v273_v42, %v796_v7 }
  0x7a   : > { %v280_v56 = vmul.f32 %v273_v42, %v802_v10  ;;  %v279_v57 = vmul.f32 %v273_v42, %v804_v13  ;;  %v282_v62 = vmul.f32 %v273_v42, %v810_v18  ;;  %v281_v63 = vmul.f32 %v273_v42, %v812_v19 }
  0x7b   : > { %v298_v8 = vmul.f32 %v295_v43, %v788_v2  ;;  %v297_v9 = vmul.f32 %v295_v43, %v790_v3  ;;  %v300_v16 = vmul.f32 %v295_v43, %v792_v4  ;;  %v299_v17 = vmul.f32 %v295_v43, %v796_v7 }
  0x7c   : > { %v284_v46 = vpop.permute.xlu0 %283  ;;  %v886_v47 = vpop.permute.xlu1 %305  ;;  %v302_v24 = vmul.f32 %v295_v43, %v802_v10  ;;  %v301_v25 = vmul.f32 %v295_v43, %v804_v13  ;;  %v304_v36 = vmul.f32 %v295_v43, %v810_v18  ;;  %v303_v37 = vmul.f32 %v295_v43, %v812_v19 }
  0x7d   : > { %v287_v48 = vadd.f32 %v284_v46, %v276_v44  ;;  %v286_v49 = vadd.f32 %v284_v46, %v275_v45  ;;  %v289_v54 = vadd.f32 %v284_v46, %v278_v50  ;;  %v288_v55 = vadd.f32 %v284_v46, %v277_v51 }
  0x7e   : > { %v291_v60 = vadd.f32 %v284_v46, %v280_v56  ;;  %v290_v61 = vadd.f32 %v284_v46, %v279_v57  ;;  %v293_v5 = vadd.f32 %v284_v46, %v282_v62  ;;  %v292_v6 = vadd.f32 %v284_v46, %v281_v63 }
  0x7f   : > { %412 = vrot.lane.b32.xlu1 %v287_v48, %s733_s20  ;;  %410 = vrot.lane.b32.xlu0 %v286_v49, %s733_s20  ;;  %v309_v14 = vadd.f32 %v886_v47, %v298_v8  ;;  %v308_v15 = vadd.f32 %v886_v47, %v297_v9  ;;  %v311_v22 = vadd.f32 %v886_v47, %v300_v16 }
  0x80   : > { %v892_v52 = vpop.permute.xlu0 %316  ;;  %v894_v53 = vpop.permute.xlu1 %327  ;;  %v310_v23 = vadd.f32 %v886_v47, %v299_v17  ;;  %v313_v40 = vadd.f32 %v886_v47, %v302_v24  ;;  %v312_v41 = vadd.f32 %v886_v47, %v301_v25  ;;  %v315_v49 = vadd.f32 %v886_v47, %v304_v36 }
  0x81   : > { %v320_v43 = vmul.f32 %v892_v52, %v788_v2  ;;  %v319_v45 = vmul.f32 %v892_v52, %v790_v3  ;;  %v314_v50 = vadd.f32 %v886_v47, %v303_v37  ;;  %v322_v56 = vmul.f32 %v892_v52, %v792_v4 }
  0x82   : > { %v321_v57 = vmul.f32 %v892_v52, %v796_v7  ;;  %v324_v4 = vmul.f32 %v892_v52, %v802_v10  ;;  %v323_v7 = vmul.f32 %v892_v52, %v804_v13 }
  0x83   : > { %416 = vrot.lane.b32.xlu1 %v289_v54, %s733_s20  ;;  %414 = vrot.lane.b32.xlu0 %v288_v55, %s733_s20  ;;  %v331_v3 = vadd.f32 %v894_v53, %v320_v43  ;;  %v330_v47 = vadd.f32 %v894_v53, %v319_v45  ;;  %v333_v62 = vadd.f32 %v894_v53, %v322_v56 }
  0x84   : > { %v332_v63 = vadd.f32 %v894_v53, %v321_v57  ;;  %v335_v10 = vadd.f32 %v894_v53, %v324_v4  ;;  %v334_v13 = vadd.f32 %v894_v53, %v323_v7 }
  0x87   : > { %v349_v58 = vpop.permute.xlu1 %348  ;;  %v347_v59 = vpop.permute.xlu0 %346  ;;  %420 = vrot.lane.b32.xlu1 %v291_v60, %s733_s20  ;;  %418 = vrot.lane.b32.xlu0 %v290_v61, %s733_s20 }
  0x88   : > { %v556_v34 = vsel %vm554_vm0, %v829_v26, %v349_v58  ;;  %v555_v35 = vsel %vm554_vm0, %v832_v27, %v347_v59 }
  0x8b   : > { %v353_v0 = vpop.permute.xlu1 %352  ;;  %v351_v1 = vpop.permute.xlu0 %350  ;;  %424 = vrot.lane.b32.xlu1 %v293_v5, %s733_s20  ;;  %422 = vrot.lane.b32.xlu0 %v292_v6, %s733_s20 }
  0x8c   : > { %v558_v42 = vsel %vm554_vm0, %v839_v28, %v353_v0  ;;  %v557_v44 = vsel %vm554_vm0, %v842_v29, %v351_v1  ;;  %v326_v0 = vmul.f32 %v892_v52, %v810_v18  ;;  %v325_v1 = vmul.f32 %v892_v52, %v812_v19 }
  0x8e   : > { %v337_v5 = vadd.f32 %v894_v53, %v326_v0  ;;  %v336_v6 = vadd.f32 %v894_v53, %v325_v1 }
  0x8f   : > { %v357_v11 = vpop.permute.xlu1 %356  ;;  %v355_v12 = vpop.permute.xlu0 %354  ;;  %476 = vrot.lane.b32.xlu1 %v309_v14, %s734_s27  ;;  %474 = vrot.lane.b32.xlu0 %v308_v15, %s734_s27 }
  0x90   : > { %v560_v51 = vsel %vm554_vm0, %v849_v30, %v357_v11  ;;  %v559_v2 = vsel %vm554_vm0, %v852_v31, %v355_v12 }
  0x93   : > { %v361_v20 = vpop.permute.xlu1 %360  ;;  %v359_v21 = vpop.permute.xlu0 %358  ;;  %480 = vrot.lane.b32.xlu1 %v311_v22, %s734_s27  ;;  %478 = vrot.lane.b32.xlu0 %v310_v23, %s734_s27 }
  0x94   : > { %v562_v58 = vsel %vm554_vm0, %v859_v32, %v361_v20  ;;  %v561_v59 = vsel %vm554_vm0, %v862_v33, %v359_v21 }
  0x97   : > { %v381_v38 = vpop.permute.xlu1 %380  ;;  %v379_v39 = vpop.permute.xlu0 %378  ;;  %484 = vrot.lane.b32.xlu1 %v313_v40, %s734_s27  ;;  %482 = vrot.lane.b32.xlu0 %v312_v41, %s734_s27 }
  0x98   : > { %v929_v26 = vsel %vm563_vm1, %v556_v34, %v381_v38  ;;  %v932_v27 = vsel %vm563_vm1, %v555_v35, %v379_v39 }
  0x9b   : > { %v385_v46 = vpop.permute.xlu1 %384  ;;  %v383_v48 = vpop.permute.xlu0 %382  ;;  %488 = vrot.lane.b32.xlu1 %v315_v49, %s734_s27  ;;  %486 = vrot.lane.b32.xlu0 %v314_v50, %s734_s27 }
  0x9c   : > { %v947_v28 = vsel %vm563_vm1, %v558_v42, %v385_v46  ;;  %v950_v29 = vsel %vm563_vm1, %v557_v44, %v383_v48 }
  0x9f   : > { %v389_v54 = vpop.permute.xlu1 %388  ;;  %v387_v55 = vpop.permute.xlu0 %386  ;;  %532 = vrot.lane.b32.xlu1 %v331_v3, %s735_s6  ;;  %530 = vrot.lane.b32.xlu0 %v330_v47, %s735_s6 }
  0xa0   : > { %v965_v30 = vsel %vm563_vm1, %v560_v51, %v389_v54  ;;  %v968_v31 = vsel %vm563_vm1, %v559_v2, %v387_v55 }
  0xa3   : > { %v393_v60 = vpop.permute.xlu1 %392  ;;  %v391_v61 = vpop.permute.xlu0 %390  ;;  %536 = vrot.lane.b32.xlu1 %v333_v62, %s735_s6  ;;  %534 = vrot.lane.b32.xlu0 %v332_v63, %s735_s6 }
  0xa4   : > { %v983_v32 = vsel %vm563_vm1, %v562_v58, %v393_v60  ;;  %v986_v33 = vsel %vm563_vm1, %v561_v59, %v391_v61 }
  0xa7   : > { %540 = vrot.lane.b32.xlu1 %v335_v10, %s735_s6  ;;  %538 = vrot.lane.b32.xlu0 %v334_v13, %s735_s6  ;;  %v445_v8 = vpop.permute.xlu1 %444  ;;  %v443_v9 = vpop.permute.xlu0 %442 }
  0xab   : > { %544 = vrot.lane.b32.xlu1 %v337_v5, %s735_s6  ;;  %542 = vrot.lane.b32.xlu0 %v336_v6, %s735_s6  ;;  %v449_v11 = vpop.permute.xlu1 %448  ;;  %v447_v12 = vpop.permute.xlu0 %446 }
  0xaf   : > { %v453_v18 = vpop.permute.xlu1 %452  ;;  %v451_v14 = vpop.permute.xlu0 %450 }
  0xb3   : > { %v1002_v15 = vpop.permute.xlu1 %456  ;;  %v1004_v19 = vpop.permute.xlu0 %454 }
  0xb7   : > { %v501_v52 = vpop.permute.xlu1 %500  ;;  %v499_v16 = vpop.permute.xlu0 %498 }
  0xbb   : > { %v505_v17 = vpop.permute.xlu1 %504  ;;  %v503_v20 = vpop.permute.xlu0 %502 }
  0xbf   : > { %v1006_v21 = vpop.permute.xlu1 %508  ;;  %v1008_v53 = vpop.permute.xlu0 %506 }
  0xc3   : > { %v1010_v22 = vpop.permute.xlu1 %512  ;;  %v1012_v23 = vpop.permute.xlu0 %510 }
  0xf1   : > { %v413_v24 = vpop.permute.xlu1 %412  ;;  %v411_v25 = vpop.permute.xlu0 %410 }
  0xf2   : > { %v574_v46 = vsel %vm572_vm2, %v929_v26, %v413_v24  ;;  %v573_v48 = vsel %vm572_vm2, %v932_v27, %v411_v25 }
  0xf3   : > { %v583_v51 = vsel %vm581_vm3, %v574_v46, %v445_v8  ;;  %v582_v2 = vsel %vm581_vm3, %v573_v48, %v443_v9 }
  0xf5   : > { %v417_v34 = vpop.permute.xlu1 %416  ;;  %v415_v35 = vpop.permute.xlu0 %414 }
  0xf6   : > { %v576_v49 = vsel %vm572_vm2, %v947_v28, %v417_v34  ;;  %v575_v50 = vsel %vm572_vm2, %v950_v29, %v415_v35 }
  0xf7   : > { %v585_v27 = vsel %vm581_vm3, %v576_v49, %v449_v11  ;;  %v584_v55 = vsel %vm581_vm3, %v575_v50, %v447_v12 }
  0xf9   : > { %v421_v36 = vpop.permute.xlu1 %420  ;;  %v419_v37 = vpop.permute.xlu0 %418 }
  0xfa   : > { %v578_v28 = vsel %vm572_vm2, %v965_v30, %v421_v36  ;;  %v577_v29 = vsel %vm572_vm2, %v968_v31, %v419_v37 }
  0xfb   : > { %v587_v30 = vsel %vm581_vm3, %v578_v28, %v453_v18  ;;  %v586_v31 = vsel %vm581_vm3, %v577_v29, %v451_v14 }
  0xfd   : > { %v425_v38 = vpop.permute.xlu1 %424  ;;  %v423_v39 = vpop.permute.xlu0 %422 }
  0xfe   : > { %v580_v62 = vsel %vm572_vm2, %v983_v32, %v425_v38  ;;  %v579_v63 = vsel %vm572_vm2, %v986_v33, %v423_v39 }
  0xff   : > { %v589_v32 = vsel %vm581_vm3, %v580_v62, %v1002_v15  ;;  %v588_v33 = vsel %vm581_vm3, %v579_v63, %v1004_v19 }
 0x101   : > { %v477_v40 = vpop.permute.xlu1 %476  ;;  %v475_v41 = vpop.permute.xlu0 %474 }
 0x102   : > { %v592_v26 = vsel %vm590_vm4, %v583_v51, %v477_v40  ;;  %v591_v54 = vsel %vm590_vm4, %v582_v2, %v475_v41 }
 0x103   : > { %v601_v57 = vsel %vm599_vm5, %v592_v26, %v501_v52  ;;  %v600_v59 = vsel %vm599_vm5, %v591_v54, %v499_v16 }
 0x105   : > { %v481_v42 = vpop.permute.xlu1 %480  ;;  %v479_v44 = vpop.permute.xlu0 %478 }
 0x106   : > { %v594_v4 = vsel %vm590_vm4, %v585_v27, %v481_v42  ;;  %v593_v7 = vsel %vm590_vm4, %v584_v55, %v479_v44 }
 0x107   : > { %v603_v10 = vsel %vm599_vm5, %v594_v4, %v505_v17  ;;  %v602_v0 = vsel %vm599_vm5, %v593_v7, %v503_v20 }
 0x109   : > { %v485_v43 = vpop.permute.xlu1 %484  ;;  %v483_v45 = vpop.permute.xlu0 %482 }
 0x10a   : > { %v596_v5 = vsel %vm590_vm4, %v587_v30, %v485_v43  ;;  %v595_v6 = vsel %vm590_vm4, %v586_v31, %v483_v45 }
 0x10b   : > { %v605_v11 = vsel %vm599_vm5, %v596_v5, %v1006_v21  ;;  %v604_v18 = vsel %vm599_vm5, %v595_v6, %v1008_v53 }
 0x10d   : > { %v489_v3 = vpop.permute.xlu1 %488  ;;  %v487_v47 = vpop.permute.xlu0 %486 }
 0x10e   : > { %v598_v52 = vsel %vm590_vm4, %v589_v32, %v489_v3  ;;  %v597_v16 = vsel %vm590_vm4, %v588_v33, %v487_v47 }
 0x10f   : > { %v607_v19 = vsel %vm599_vm5, %v598_v52, %v1010_v22  ;;  %v606_v21 = vsel %vm599_vm5, %v597_v16, %v1012_v23 }
 0x111   : > { %v533_v56 = vpop.permute.xlu1 %532  ;;  %v531_v58 = vpop.permute.xlu0 %530 }
 0x112   : > { %v610_v60 = vsel %vm608_vm6, %v601_v57, %v533_v56  ;;  %v609_v61 = vsel %vm608_vm6, %v600_v59, %v531_v58 }
 0x113   : > { %619 = vst.msk [vmem:[%s1033_s10 + $0x8] sm:$0xff] %vm617_vm7, %v610_v60  ;;  %618 = vst.msk [vmem:[%s1033_s10] sm:$0xff] %vm617_vm7, %v609_v61 }
 0x115   : > { %v537_v13 = vpop.permute.xlu1 %536  ;;  %v535_v1 = vpop.permute.xlu0 %534 }
 0x116   : > { %v612_v8 = vsel %vm608_vm6, %v603_v10, %v537_v13  ;;  %v611_v9 = vsel %vm608_vm6, %v602_v0, %v535_v1 }
 0x117   : > { %621 = vst.msk [vmem:[%s1033_s10 + $0x18] sm:$0xff] %vm617_vm7, %v612_v8  ;;  %620 = vst.msk [vmem:[%s1033_s10 + $0x10] sm:$0xff] %vm617_vm7, %v611_v9 }
 0x119   : > { %v541_v12 = vpop.permute.xlu1 %540  ;;  %v539_v14 = vpop.permute.xlu0 %538 }
 0x11a   : > { %v614_v17 = vsel %vm608_vm6, %v605_v11, %v541_v12  ;;  %v613_v15 = vsel %vm608_vm6, %v604_v18, %v539_v14 }
 0x11b   : > { %623 = vst.msk [vmem:[%s1033_s10 + $0x28] sm:$0xff] %vm617_vm7, %v614_v17  ;;  %622 = vst.msk [vmem:[%s1033_s10 + $0x20] sm:$0xff] %vm617_vm7, %v613_v15 }
 0x11d   : > { %v545_v20 = vpop.permute.xlu1 %544  ;;  %v543_v53 = vpop.permute.xlu0 %542 }
 0x11e   : > { %v616_v24 = vsel %vm608_vm6, %v607_v19, %v545_v20  ;;  %v615_v25 = vsel %vm608_vm6, %v606_v21, %v543_v53 }
 0x11f   : > { %625 = vst.msk [vmem:[%s1033_s10 + $0x38] sm:$0xff] %vm617_vm7, %v616_v24  ;;  %624 = vst.msk [vmem:[%s1033_s10 + $0x30] sm:$0xff] %vm617_vm7, %v615_v25 }
 0x120 PF: > { %s14_s15 = sadd.s32 1, %s730_s15  }
 0x121   : > { %p11_p4 = scmp.ge.s32.totalorder %s14_s15, 4  }
 0x123   :  { %13 = sbr.rel (!%p11_p4) target bundleno = 1 (0x1), region = 69 }

// kernel: unet_skip_block_innermost.2
= control target key start
LH: loop header
LB: loop body
LE: loop exit
PB: predicated region body
PF: predicated region fallthrough
CT: control target
= control target key end

     0   :  { %s4518_s18 = smov 0   ;;  %s6484_s0 = inlined_call_operand.vmem [shape: f32[2,8,2,8,16], index: 0, kind: input, shape index: {}]   ;;  %s6485_s1 = inlined_call_operand.vmem [shape: bf16[128,16], index: 1, kind: input, shape index: {}]   ;;  %s6486_s2 = inlined_call_operand.vmem [shape: bf16[4,64,8], index: 2, kind: input, shape index: {}]   ;;  %s6487_s3 = inlined_call_operand.vmem [shape: f32[2,64,32], index: 3, kind: output, shape index: {0}]   ;;  %s6488_s4 = inlined_call_operand.vmem [shape: f32[2,1,8], index: 4, kind: output, shape index: {1}]   ;;  %s6489_s5 = inlined_call_operand.vmem [shape: f32[2,1,8], index: 5, kind: output, shape index: {2}]  }
   0x1 LB: > { %s3998_s19 = sadd.s32 4294967295, %s4474_s18   ;;  %p4002_p0 = scmp.ge.s32.totalorder %s4474_s18, 1  ;;  %s4474_s18 = sphi %s4518_s18, %s16_s18  }
   0x2   : > { %p192_p1 = scmp.lt.s32.totalorder %s4474_s18, 3 }
   0x4   : > { %p193_p2 = pnand %p4002_p0, %p192_p1 }
   0x5   : > { %p226_p3 = scmp.lt.s32.totalorder (!%p193_p2), %s3998_s19, 1  ;;  %vm309_vm0 = vcmask (!%p193_p2), 122880   ;;  %vm316_vm1 = vsmask.f32 (!%p193_p2), 256  ;;  %vm307_vm2 = vcmask (!%p193_p2), 125952   ;;  %v4476_v6 = vmov (!%p193_p2), 0  }
   0x6   : > { %196 = sbr.rel (%p193_p2) target bundleno = 1115 (0x45b), region = 32  ;;  %vm4527_vm3 = vmand (!%p193_p2), %vm309_vm0, %vm316_vm1  ;;  %v540_v1 = vld [vmem:[#allocation2 + $0x60] sm:$0x1] (!%p193_p2)  ;;  %v543_v2 = vld [vmem:[#allocation2 + $0x68] sm:$0x1] (!%p193_p2)  ;;  %s4477_s24 = smov (!%p193_p2), 120  }
   0x7   : > { %v541_v3 = vsel (!%p193_p2), %vm4527_vm3, 0, %v540_v1  ;;  %v544_v4 = vsel (!%p193_p2), %vm4527_vm3, 0, %v543_v2  ;;  %v537_v5 = vld [vmem:[#allocation2 + $0x58] sm:$0x1] (!%p193_p2)  ;;  %531 = vst.msk [vmem:[#allocation2 + $0x50] sm:$0xf] (!%p193_p2), %vm307_vm2, %v4476_v6 }
   0x8   : > { %542 = vst [vmem:[#allocation2 + $0x60] sm:$0x1] (!%p193_p2), %v541_v3  ;;  %545 = vst [vmem:[#allocation2 + $0x68] sm:$0x1] (!%p193_p2), %v544_v4  ;;  %v538_v7 = vsel (!%p193_p2), %vm4527_vm3, 0, %v537_v5  ;;  %vm900_vm15 = vcmask (!%p193_p2), 1042432  }
   0x9   : > { %312 = vst.msk [vmem:[#allocation2 + $0x48] sm:$0xf] (!%p193_p2), %vm307_vm2, %v4476_v6  ;;  %2016 = vst.msk [vmem:[#allocation3] sm:$0xf] (!%p193_p2), %vm307_vm2, %v4476_v6  ;;  %v324_v8 = vld [vmem:[#allocation2 + $0x18] sm:$0x1] (!%p193_p2) }
   0xa   : > { %313 = vst.msk [vmem:[#allocation2 + $0x4c] sm:$0x1] (!%p193_p2), %vm309_vm0, %v4476_v6  ;;  %532 = vst.msk [vmem:[#allocation2 + $0x54] sm:$0x1] (!%p193_p2), %vm309_vm0, %v4476_v6  ;;  %v327_v9 = vld [vmem:[#allocation2 + $0x20] sm:$0x1] (!%p193_p2) }
   0xb   : > { %2017 = vst.msk [vmem:[#allocation3 + $0x4] sm:$0x1] (!%p193_p2), %vm309_vm0, %v4476_v6  ;;  %2020 = vst.msk [vmem:[#allocation3 + $0x4c] sm:$0x1] (!%p193_p2), %vm309_vm0, %v4476_v6  ;;  %v325_v10 = vsel (!%p193_p2), %vm4527_vm3, 0, %v324_v8  ;;  %v328_v11 = vsel (!%p193_p2), %vm4527_vm3, 0, %v327_v9 }
   0xc   : > { %2019 = vst.msk [vmem:[#allocation3 + $0x48] sm:$0xf] (!%p193_p2), %vm307_vm2, %v4476_v6  ;;  %539 = vst [vmem:[#allocation2 + $0x58] sm:$0x1] (!%p193_p2), %v538_v7  ;;  %v318_v12 = vld [vmem:[#allocation2 + $0x8] sm:$0x1] (!%p193_p2) }
   0xd   : > { %s6698_s19 = smov (!%p226_p3, %s3998_s19), 1  ;;  %326 = vst [vmem:[#allocation2 + $0x18] sm:$0x1] %v325_v10  ;;  %329 = vst [vmem:[#allocation2 + $0x20] sm:$0x1] %v328_v11  ;;  %v319_v13 = vsel %vm4527_vm3, 0, %v318_v12 }
   0xe   : > { %s4237_s20 = sshll.u32 %s6698_s19, 7  ;;  %v321_v14 = vld [vmem:[#allocation2 + $0x10] sm:$0x1]  ;;  %320 = vst [vmem:[#allocation2 + $0x8] sm:$0x1] %v319_v13  ;;  %vm901_vm1 = vcmask 1046532   ;;  %s238_s17 = scalar_lea.vmem %s6488_s4, %s6698_s19 }
   0xf   : > { %s4555_s23 = scalar_lea.vmem %s6484_s0, %s4237_s20  ;;  %v546_v15 = vld [vmem:[#allocation2 + $0x70] sm:$0x1]  ;;  %v322_v19 = vsel %vm4527_vm3, 0, %v321_v14  ;;  %vm342_vm7 = vsmask.f32 7938  ;;  %s4478_s25 = smov 24  }
  0x10   : > { %v246_v16 = vld [vmem:[%s4555_s23 + $0x18] sm:$0xff]  ;;  %v248_v17 = vld [vmem:[%s4555_s23 + $0x28] sm:$0xff]  ;;  %v547_v20 = vsel %vm4527_vm3, 0, %v546_v15  ;;  %323 = vst [vmem:[#allocation2 + $0x10] sm:$0x1] %v322_v19  ;;  %v247_v24 = vld [vmem:[%s4555_s23 + $0x20] sm:$0xff]  ;;  %s241_s22 = scalar_lea.vmem %s6489_s5, %s6698_s19 }
  0x11   : > { %v244_v18 = vld [vmem:[%s4555_s23 + $0x8] sm:$0xff]  ;;  %vm262_vm4 = vcmp.ge.f32.partialorder %v246_v16, 0.0  ;;  %vm264_vm5 = vcmp.ge.f32.partialorder %v248_v17, 0.0  ;;  %v278_v21 = vmul.f32 0.2, %v246_v16  ;;  %v249_v25 = vld [vmem:[%s4555_s23 + $0x30] sm:$0xff]  ;;  %vm4580_vm10 = vmand %vm307_vm2, %vm342_vm7 }
  0x12   : > { %v280_v22 = vmul.f32 0.2, %v248_v17  ;;  %548 = vst [vmem:[#allocation2 + $0x70] sm:$0x1] %v547_v20  ;;  %vm260_vm6 = vcmp.ge.f32.partialorder %v244_v18, 0.0  ;;  %vm263_vm8 = vcmp.ge.f32.partialorder %v247_v24, 0.0  ;;  %vm4668_vm2 = vmand %vm309_vm0, %vm342_vm7 }
  0x13   : > { %v276_v23 = vmul.f32 0.2, %v244_v18  ;;  %v294_v26 = vsel %vm262_vm4, %v246_v16, %v278_v21  ;;  %v4568_v31 = vld [vmem:[#allocation2 + $0x50] sm:$0xf]  ;;  %vm265_vm9 = vcmp.ge.f32.partialorder %v249_v25, 0.0  ;;  %v243_v44 = vld [vmem:[%s4555_s23] sm:$0xff]  ;;  %vm4712_vm0 = vmor %vm900_vm15, %vm901_vm1 }
  0x14   : > { %v296_v27 = vsel %vm264_vm5, %v248_v17, %v280_v22  ;;  %v4248_v28 = vpack.c.bf16 %v294_v26, %v294_v26  ;;  %v765_v33 = vshrl.u32 %v4568_v31, 16  ;;  %v768_v34 = vshll.u32 %v4568_v31, 16  ;;  %v703_v50 = vld [vmem:[#allocation2 + $0x60] sm:$0xf]  ;;  %v709_v51 = vld [vmem:[#allocation2 + $0x68] sm:$0xf] }
  0x15   : > { %v4249_v29 = vpack.c.bf16 %v296_v27, %v296_v27  ;;  %v292_v30 = vsel %vm260_vm6, %v244_v18, %v276_v23  ;;  %v279_v35 = vmul.f32 0.2, %v247_v24  ;;  %v281_v47 = vmul.f32 0.2, %v249_v25  ;;  %v697_v58 = vld [vmem:[#allocation2 + $0x58] sm:$0xf] }
  0x16   : > { %v4247_v32 = vpack.c.bf16 %v292_v30, %v292_v30  ;;  %v626_v36 = vshrl.u32 %v4248_v28, 16  ;;  %v629_v37 = vshll.u32 %v4248_v28, 16  ;;  %v767_v42 = vrot.slane %v765_v33, 4  ;;  %v245_v59 = vld [vmem:[%s4555_s23 + $0x10] sm:$0xff]  ;;  %v250_v5 = vld [vmem:[%s4555_s23 + $0x38] sm:$0xff]  ;;  %v252_v6 = vld [vmem:[%s4555_s23 + $0x48] sm:$0xff] }
  0x17   : > { %v634_v38 = vshrl.u32 %v4249_v29, 16  ;;  %v637_v39 = vshll.u32 %v4249_v29, 16  ;;  %v770_v43 = vrot.slane %v768_v34, 5  ;;  %v295_v48 = vsel %vm263_vm8, %v247_v24, %v279_v35  ;;  %v494_v9 = vld [vmem:[#allocation2 + $0x18] sm:$0xf]  ;;  %s4479_s26 = smov 56  }
  0x18   : > { %v618_v40 = vshrl.u32 %v4247_v32, 16  ;;  %v621_v41 = vshll.u32 %v4247_v32, 16  ;;  %v4573_v45 = vrot.slane %v626_v36, 7  ;;  %v4241_v54 = vpack.c.bf16 %v295_v48, %v295_v48  ;;  %v549_v18 = vld [vmem:[#allocation2 + $0x78] sm:$0x1]  ;;  %s4480_s27 = smov 8  }
  0x19   : > { %v4575_v46 = vrot.slane %v634_v38, 7  ;;  %v771_v53 = vor.u32 %v770_v43, %v767_v42  ;;  %vm259_vm11 = vcmp.ge.f32.partialorder %v243_v44, 0.0  ;;  %v297_v63 = vsel %vm265_vm9, %v249_v25, %v281_v47  ;;  %v500_v22 = vld [vmem:[#allocation2 + $0x20] sm:$0xf]  ;;  %s4481_s28 = smov 40   ;;  %s4482_s29 = smov 72  }
  0x1a   : > { %v4584_v52 = vrot.slane %v618_v40, 7  ;;  %v631_v55 = vor.u32 %v629_v37, %v4573_v45  ;;  %v4242_v3 = vpack.c.bf16 %v297_v63, %v297_v63  ;;  %v417_v4 = vshrl.u32 %v4241_v54, 16  ;;  %s4483_s30 = smov 88   ;;  %s4484_s16 = smov 104  }
  0x1b   : > { %v639_v57 = vor.u32 %v637_v39, %v4575_v46  ;;  %v420_v8 = vshll.u32 %v4241_v54, 16  ;;  %vm261_vm12 = vcmp.ge.f32.partialorder %v245_v59, 0.0  ;;  %v275_v10 = vmul.f32 0.2, %v243_v44 }
  0x1c   : > { %v623_v61 = vor.u32 %v621_v41, %v4584_v52  ;;  %v624_v62 = vrot.slane %v4584_v52, 4  ;;  %v704_v1 = vsel %vm4580_vm10, %v631_v55, %v703_v50  ;;  %v4602_v11 = vrot.slane %v417_v4, 7 }
  0x1d   : > { %v710_v2 = vsel %vm4580_vm10, %v639_v57, %v709_v51  ;;  %705 = vst [vmem:[#allocation2 + $0x60] sm:$0xf] %v704_v1  ;;  %v425_v12 = vshrl.u32 %v4242_v3, 16  ;;  %v428_v13 = vshll.u32 %v4242_v3, 16  ;;  %v277_v14 = vmul.f32 0.2, %v245_v59 }
  0x1e   : > { %711 = vst [vmem:[#allocation2 + $0x68] sm:$0xf] %v710_v2  ;;  %v698_v7 = vsel %vm4580_vm10, %v623_v61, %v697_v58  ;;  %v4604_v15 = vrot.slane %v771_v53, 4  ;;  %v291_v16 = vsel %vm259_vm11, %v243_v44, %v275_v10  ;;  %vm266_vm13 = vcmp.ge.f32.partialorder %v250_v5, 0.0  ;;  %v482_v3 = vld [vmem:[#allocation2 + $0x8] sm:$0xf] }
  0x1f   : > { %699 = vst [vmem:[#allocation2 + $0x58] sm:$0xf] %v698_v7  ;;  %v282_v17 = vmul.f32 0.2, %v250_v5  ;;  %v422_v19 = vor.u32 %v420_v8, %v4602_v11  ;;  %v4608_v20 = vrot.slane %v425_v12, 7  ;;  %v293_v21 = vsel %vm261_vm12, %v245_v59, %v277_v14 }
  0x20   : > { %vm268_vm14 = vcmp.ge.f32.partialorder %v252_v6, 0.0  ;;  %v4239_v23 = vpack.c.bf16 %v291_v16, %v291_v16  ;;  %v4240_v24 = vpack.c.bf16 %v293_v21, %v293_v21  ;;  %v284_v25 = vmul.f32 0.2, %v252_v6 }
  0x21   : > { %v298_v26 = vsel %vm266_vm13, %v250_v5, %v282_v17  ;;  %v430_v28 = vor.u32 %v428_v13, %v4608_v20  ;;  %v495_v29 = vsel %vm4580_vm10, %v422_v19, %v494_v9  ;;  %v550_v30 = vsel %vm4527_vm3, 0, %v549_v18 }
  0x22   : > { %496 = vst [vmem:[#allocation2 + $0x18] sm:$0xf] %v495_v29  ;;  %v401_v33 = vshrl.u32 %v4239_v23, 16  ;;  %v404_v34 = vshll.u32 %v4239_v23, 16  ;;  %v409_v35 = vshrl.u32 %v4240_v24, 16  ;;  %v412_v39 = vshll.u32 %v4240_v24, 16 }
  0x23   : > { %551 = vst [vmem:[#allocation2 + $0x78] sm:$0x1] %v550_v30  ;;  %v501_v38 = vsel %vm4580_vm10, %v430_v28, %v500_v22  ;;  %v300_v40 = vsel %vm268_vm14, %v252_v6, %v284_v25  ;;  %v4620_v41 = vpack.c.bf16 %v298_v26, %v298_v26  ;;  %v488_v6 = vld [vmem:[#allocation2 + $0x10] sm:$0xf]  ;;  %vm761_vm6 = vsmask.f32 3328 }
  0x24   : > { %v747_v36 = vld [vmem:[#allocation2 + $0x60] sm:$0xf]  ;;  %502 = vst [vmem:[#allocation2 + $0x20] sm:$0xf] %v501_v38  ;;  %v4624_v59 = vrot.slane %v401_v33, 7  ;;  %v4627_v2 = vrot.slane %v409_v35, 7  ;;  %v4251_v7 = vpack.c.bf16 %v300_v40, %v300_v40 }
  0x25   : > { %v748_v37 = vld [vmem:[#allocation2 + $0x68] sm:$0xf]  ;;  %v793_v47 = vshrl.u32 %v747_v36, 16  ;;  %v796_v50 = vshll.u32 %v747_v36, 16  ;;  %v642_v24 = vshrl.u32 %v4620_v41, 16  ;;  %v645_v35 = vshll.u32 %v4620_v41, 16 }
  0x26   : > { %v807_v42 = vshrl.u32 %v748_v37, 16  ;;  %v810_v43 = vshll.u32 %v748_v37, 16  ;;  %v4056_v44 = vcombine.low %v747_v36, %v748_v37  ;;  %v746_v48 = vld [vmem:[#allocation2 + $0x58] sm:$0xf]  ;;  %v407_v5 = vrot.slane %v4624_v59, 4 }
  0x27   : > { %v4055_v51 = vcombine.low %v4568_v31, %v746_v48  ;;  %v779_v53 = vshrl.u32 %v746_v48, 16  ;;  %v782_v54 = vshll.u32 %v746_v48, 16  ;;  %v795_v58 = vrot.slane %v793_v47, 4  ;;  %v4648_v30 = vld [vmem:[#allocation2 + $0x60] sm:$0xf] }
  0x28   : > { %v809_v55 = vrot.slane %v807_v42, 4  ;;  %v812_v57 = vrot.slane %v810_v43, 5  ;;  %1510 = vrot.lane.b32.xlu1 %v4056_v44, %s4477_s24  ;;  %v798_v61 = vrot.slane %v796_v50, 5  ;;  %v406_v31 = vor.u32 %v404_v34, %v4624_v59  ;;  %v4653_v37 = vld [vmem:[#allocation2 + $0x58] sm:$0xf] }
  0x29   : > { %1508 = vrot.lane.b32.xlu0 %v4055_v51, %s4477_s24  ;;  %v781_v63 = vrot.slane %v779_v53, 4  ;;  %v784_v1 = vrot.slane %v782_v54, 5  ;;  %v937_v10 = vld [vmem:[#allocation2 + $0x18] sm:$0xf]  ;;  %v414_v12 = vor.u32 %v412_v39, %v4627_v2  ;;  %v415_v13 = vrot.slane %v4627_v2, 4 }
  0x2a   : > { %v813_v4 = vor.u32 %v812_v57, %v809_v55  ;;  %v799_v8 = vor.u32 %v798_v61, %v795_v58  ;;  %v980_v16 = vshrl.u32 %v937_v10, 16  ;;  %v983_v17 = vshll.u32 %v937_v10, 16  ;;  %v715_v42 = vld [vmem:[#allocation2 + $0x70] sm:$0xf]  ;;  %v561_v50 = vld [vmem:[#allocation2 + $0x5c] sm:$0x1] }
  0x2b   : > { %v785_v9 = vor.u32 %v784_v1, %v781_v63  ;;  %v483_v18 = vsel %vm4580_vm10, %v406_v31, %v482_v3  ;;  %v938_v22 = vld [vmem:[#allocation2 + $0x20] sm:$0xf]  ;;  %v489_v23 = vsel %vm4580_vm10, %v414_v12, %v488_v6  ;;  %v4650_v34 = vrot.slane %v642_v24, 7  ;;  %v721_v53 = vld [vmem:[#allocation2 + $0x78] sm:$0xf] }
  0x2c   : > { %v4633_v14 = vrot.slane %v813_v4, 4  ;;  %v4637_v19 = vrot.slane %v799_v8, 4  ;;  %484 = vst [vmem:[#allocation2 + $0x8] sm:$0xf] %v483_v18  ;;  %v4644_v25 = vrot.slane %v980_v16, 4  ;;  %v4646_v26 = vrot.slane %v983_v17, 5 }
  0x2d   : > { %v4639_v21 = vrot.slane %v785_v9, 4  ;;  %v994_v28 = vshrl.u32 %v938_v22, 16  ;;  %v997_v29 = vshll.u32 %v938_v22, 16  ;;  %490 = vst [vmem:[#allocation2 + $0x10] sm:$0xf] %v489_v23  ;;  %v4068_v33 = vcombine.low %v937_v10, %v938_v22 }
  0x2e   : > { %v650_v36 = vshrl.u32 %v4251_v7, 16  ;;  %v653_v40 = vshll.u32 %v4251_v7, 16  ;;  %v1136_v43 = vshrl.u32 %v4653_v37, 16  ;;  %v647_v44 = vor.u32 %v645_v35, %v4650_v34  ;;  %v876_v61 = vld [vmem:[#allocation2 + $0x50] sm:$0xe] }
  0x2f   : > { %v4655_v38 = vrot.slane %v994_v28, 4  ;;  %v4657_v39 = vrot.slane %v997_v29, 5  ;;  %1578 = vrot.lane.b32.xlu1 %v4068_v33, %s4478_s25  ;;  %v1139_v41 = vshll.u32 %v4653_v37, 16  ;;  %v1150_v55 = vshrl.u32 %v4648_v30, 16  ;;  %v4684_v31 = vld [vmem:[#allocation2 + $0x68] sm:$0xf] }
  0x30   : > { %v4663_v48 = vrot.slane %v650_v36, 7  ;;  %v4672_v54 = vrot.slane %v1136_v43, 4  ;;  %v1153_v57 = vshll.u32 %v4648_v30, 16  ;;  %v4079_v58 = vcombine.low %v4653_v37, %v4648_v30  ;;  %v4686_v6 = vld [vmem:[#allocation2 + $0x54] sm:$0x1]  ;;  %v254_v28 = vld [vmem:[%s4555_s23 + $0x58] sm:$0xff] }
  0x31   : > { %v716_v3 = vsel %vm4580_vm10, %v647_v44, %v715_v42  ;;  %v4682_v4 = vrot.slane %v1139_v41, 5  ;;  %v4688_v7 = vld [vmem:[#allocation2 + $0x58] sm:$0xe]  ;;  %v4690_v9 = vrot.slane %v1150_v55, 4  ;;  %v1164_v12 = vshrl.u32 %v4684_v31, 16  ;;  %v256_v43 = vld [vmem:[%s4555_s23 + $0x68] sm:$0xff] }
  0x32   : > { %v655_v63 = vor.u32 %v653_v40, %v4663_v48  ;;  %717 = vst [vmem:[#allocation2 + $0x70] sm:$0xf] %v716_v3  ;;  %v4692_v10 = vrot.slane %v1153_v57, 5  ;;  %v1167_v16 = vshll.u32 %v4684_v31, 16  ;;  %v562_v24 = vsel %vm4668_vm2, 0, %v561_v50 }
  0x33   : > { %v935_v8 = vld [vmem:[#allocation2 + $0x8] sm:$0xf]  ;;  %v552_v29 = vld [vmem:[#allocation2 + $0x80] sm:$0x1]  ;;  %v4701_v42 = vrot.slane %v1164_v12, 4  ;;  %v4023_v57 = vrot.slane %v876_v61, 9 }
  0x34   : > { %v936_v17 = vld [vmem:[#allocation2 + $0x10] sm:$0xf]  ;;  %v952_v18 = vshrl.u32 %v935_v8, 16  ;;  %v955_v22 = vshll.u32 %v935_v8, 16  ;;  %v722_v23 = vsel %vm4580_vm10, %v655_v63, %v721_v53  ;;  %v555_v33 = vld [vmem:[#allocation2 + $0x88] sm:$0x1] }
  0x35   : > { %v966_v35 = vshrl.u32 %v936_v17, 16  ;;  %v969_v36 = vshll.u32 %v936_v17, 16  ;;  %v4067_v40 = vcombine.low %v935_v8, %v936_v17  ;;  %723 = vst [vmem:[#allocation2 + $0x78] sm:$0xf] %v722_v23  ;;  %563 = vst [vmem:[#allocation2 + $0x5c] sm:$0x1] %v562_v24 }
  0x36   : > { %v344_v44 = vld [vmem:[#allocation2 + $0xc] sm:$0x1]  ;;  %v4704_v41 = vrot.slane %v952_v18, 4  ;;  %v4706_v55 = vrot.slane %v955_v22, 5  ;;  %v4708_v53 = vrot.slane %v1167_v16, 5  ;;  %v905_v12 = vrot.slane %v4686_v6, 5 }
  0x37   : > { %v347_v63 = vld [vmem:[#allocation2 + $0x14] sm:$0x1]  ;;  %v4716_v3 = vrot.slane %v966_v35, 4  ;;  %v4718_v8 = vrot.slane %v969_v36, 5  ;;  %1576 = vrot.lane.b32.xlu0 %v4067_v40, %s4478_s25  ;;  %v4723_v16 = vld [vmem:[#allocation2 + $0x8] sm:$0xe] }
  0x38   : > { %vm270_vm4 = vcmp.ge.f32.partialorder %v254_v28, 0.0  ;;  %vm272_vm5 = vcmp.ge.f32.partialorder %v256_v43, 0.0  ;;  %v286_v18 = vmul.f32 0.2, %v254_v28  ;;  %v288_v22 = vmul.f32 0.2, %v256_v43 }
  0x39   : > { %v4727_v61 = vsel %vm4712_vm0, %v4023_v57, %v905_v12  ;;  %v553_v23 = vsel %vm4527_vm3, 0, %v552_v29  ;;  %v556_v24 = vsel %vm4527_vm3, 0, %v555_v33  ;;  %v345_v35 = vsel %vm4668_vm2, 0, %v344_v44  ;;  %v4735_v36 = vld [vmem:[#allocation2 + $0x10] sm:$0xe] }
  0x3a   : > { %v749_v40 = vld [vmem:[#allocation2 + $0x70] sm:$0xf]  ;;  %v302_v47 = vsel %vm270_vm4, %v254_v28, %v286_v18  ;;  %v304_v32 = vsel %vm272_vm5, %v256_v43, %v288_v22  ;;  %554 = vst [vmem:[#allocation2 + $0x80] sm:$0x1] %v553_v23  ;;  %557 = vst [vmem:[#allocation2 + $0x88] sm:$0x1] %v556_v24 }
  0x3b   : > { %v4737_v1 = vld [vmem:[#allocation2 + $0x70] sm:$0xf]  ;;  %346 = vst [vmem:[#allocation2 + $0xc] sm:$0x1] %v345_v35  ;;  %v348_v57 = vsel %vm4668_vm2, 0, %v347_v63  ;;  %v821_v12 = vshrl.u32 %v749_v40, 16  ;;  %1644 = vrot.lane.b32.xlu0 %v4079_v58, %s4479_s26  ;;  %v4252_v23 = vpack.c.bf16 %v302_v47, %v302_v47  ;;  %v4253_v24 = vpack.c.bf16 %v304_v32, %v304_v32 }
  0x3c   : > { %v824_v33 = vshll.u32 %v749_v40, 16  ;;  %v1178_v44 = vshrl.u32 %v4737_v1, 16  ;;  %v1181_v28 = vshll.u32 %v4737_v1, 16  ;;  %349 = vst [vmem:[#allocation2 + $0x14] sm:$0x1] %v348_v57  ;;  %v4080_v63 = vcombine.low %v4684_v31, %v4737_v1 }
  0x3d   : > { %v564_v43 = vld [vmem:[#allocation2 + $0x64] sm:$0x1]  ;;  %v750_v18 = vld [vmem:[#allocation2 + $0x78] sm:$0xf]  ;;  %v700_v22 = vld [vmem:[#allocation2 + $0x5c] sm:$0x1] }
  0x3e   : > { %v4751_v27 = vrot.slane %v821_v12, 4  ;;  %v4753_v29 = vrot.slane %v824_v33, 5  ;;  %v835_v30 = vshrl.u32 %v750_v18, 16  ;;  %v838_v37 = vshll.u32 %v750_v18, 16  ;;  %v567_v58 = vld [vmem:[#allocation2 + $0x6c] sm:$0x1] }
  0x3f   : > { %v4057_v60 = vcombine.low %v749_v40, %v750_v18  ;;  %v4755_v56 = vrot.slane %v1178_v44, 4  ;;  %v4757_v57 = vrot.slane %v1181_v28, 5  ;;  %v701_v47 = vsel %vm4527_vm3, %v624_v62, %v700_v22  ;;  %v4763_v32 = vld [vmem:[#allocation2 + $0x60] sm:$0xe]  ;;  %v4769_v35 = vld [vmem:[#allocation2 + $0x68] sm:$0xe] }
  0x40   : > { %v4765_v1 = vrot.slane %v835_v30, 4  ;;  %v4767_v31 = vrot.slane %v838_v37, 5  ;;  %702 = vst [vmem:[#allocation2 + $0x5c] sm:$0x1] %v701_v47  ;;  %v658_v12 = vshrl.u32 %v4252_v23, 16  ;;  %v661_v33 = vshll.u32 %v4252_v23, 16 }
  0x41   : > { %1512 = vrot.lane.b32.xlu1 %v4057_v60, %s4477_s24  ;;  %v666_v40 = vshrl.u32 %v4253_v24, 16  ;;  %v669_v44 = vshll.u32 %v4253_v24, 16  ;;  %v565_v52 = vsel %vm4668_vm2, 0, %v564_v43  ;;  %v568_v62 = vsel %vm4668_vm2, 0, %v567_v58  ;;  %v350_v28 = vld [vmem:[#allocation2 + $0x1c] sm:$0x1] }
  0x42   : > { %v353_v18 = vld [vmem:[#allocation2 + $0x24] sm:$0x1]  ;;  %v4776_v22 = vrot.slane %v658_v12, 7  ;;  %v727_v30 = vld [vmem:[#allocation2 + $0x80] sm:$0xf]  ;;  %v958_v60 = vor.u32 %v4706_v55, %v4704_v41  ;;  %v972_v43 = vor.u32 %v4718_v8, %v4716_v3  ;;  %v4026_v12 = vrot.slane %v4769_v35, 9 }
  0x43   : > { %566 = vst [vmem:[#allocation2 + $0x64] sm:$0x1] %v565_v52  ;;  %569 = vst [vmem:[#allocation2 + $0x6c] sm:$0x1] %v568_v62  ;;  %v4779_v37 = vld [vmem:[#allocation2 + $0x18] sm:$0xe]  ;;  %v827_v52 = vor.u32 %v4753_v29, %v4751_v27  ;;  %v841_v62 = vor.u32 %v4767_v31, %v4765_v1 }
  0x44   : > { %v4785_v24 = vrot.slane %v666_v40, 7  ;;  %v485_v58 = vld [vmem:[#allocation2 + $0xc] sm:$0x1]  ;;  %v491_v47 = vld [vmem:[#allocation2 + $0x14] sm:$0x1]  ;;  %v663_v23 = vor.u32 %v661_v33, %v4776_v22  ;;  %v664_v17 = vrot.slane %v4776_v22, 4 }
  0x45   : > { %v733_v41 = vld [vmem:[#allocation2 + $0x88] sm:$0xf]  ;;  %v486_v55 = vsel %vm4527_vm3, %v407_v5, %v485_v58  ;;  %v492_v3 = vsel %vm4527_vm3, %v415_v13, %v491_v47  ;;  %v4802_v8 = vld [vmem:[#allocation2 + $0x20] sm:$0xe]  ;;  %v570_v27 = vld [vmem:[#allocation2 + $0x74] sm:$0x1]  ;;  %1646 = vrot.lane.b32.xlu1 %v4080_v63, %s4479_s26 }
  0x46   : > { %v671_v29 = vor.u32 %v669_v44, %v4785_v24  ;;  %v672_v1 = vrot.slane %v4785_v24, 4  ;;  %487 = vst [vmem:[#allocation2 + $0xc] sm:$0x1] %v486_v55  ;;  %493 = vst [vmem:[#allocation2 + $0x14] sm:$0x1] %v492_v3  ;;  %v728_v59 = vsel %vm4580_vm10, %v663_v23, %v727_v30  ;;  %v774_v2 = vshll.u32 %v4686_v6, 16 }
  0x47   : > { %vm762_vm7 = vsmask.f32 7440  ;;  %v351_v5 = vsel %vm4668_vm2, 0, %v350_v28  ;;  %v354_v13 = vsel %vm4668_vm2, 0, %v353_v18  ;;  %v573_v63 = vld [vmem:[#allocation2 + $0x7c] sm:$0x1] }
  0x48   : > { %v754_v31 = vld [vmem:[#allocation2 + $0x5c] sm:$0x1]  ;;  %729 = vst [vmem:[#allocation2 + $0x80] sm:$0xf] %v728_v59  ;;  %v734_v33 = vsel %vm4580_vm10, %v671_v29, %v733_v41  ;;  %vm4816_vm8 = vmor %vm761_vm6, %vm762_vm7  ;;  %v4033_v6 = vrot.slane %v4779_v37, 9  ;;  %v4034_v44 = vrot.slane %v4802_v8, 9  ;;  %v986_v29 = vor.u32 %v4646_v26, %v4644_v25 }
  0x49   : > { %352 = vst [vmem:[#allocation2 + $0x1c] sm:$0x1] %v351_v5  ;;  %355 = vst [vmem:[#allocation2 + $0x24] sm:$0x1] %v354_v13  ;;  %v4822_v28 = vrot.slane %v958_v60, 4  ;;  %v909_v30 = vrot.slane %v754_v31, 5  ;;  %v1000_v60 = vor.u32 %v4657_v39, %v4655_v38 }
  0x4a   : > { %735 = vst [vmem:[#allocation2 + $0x88] sm:$0xf] %v734_v33  ;;  %v776_v18 = vrot.slane %v774_v2, 5  ;;  %v788_v23 = vshll.u32 %v754_v31, 16  ;;  %v4824_v58 = vrot.slane %v972_v43, 4  ;;  %v571_v55 = vsel %vm4668_vm2, 0, %v570_v27 }
  0x4b   : > { %v706_v47 = vld [vmem:[#allocation2 + $0x64] sm:$0x1]  ;;  %v712_v41 = vld [vmem:[#allocation2 + $0x6c] sm:$0x1]  ;;  %v574_v3 = vsel %vm4668_vm2, 0, %v573_v63  ;;  %v6512_v59 = vrot.slane %v4688_v7, 9 }
  0x4c   : > { %v6513_v2 = vrot.slane %v4573_v45, 4  ;;  %v6514_v27 = vrot.slane %v4575_v46, 4  ;;  %v777_v25 = vsel %vm4816_vm8, %v4604_v15, %v776_v18  ;;  %572 = vst [vmem:[#allocation2 + $0x74] sm:$0x1] %v571_v55  ;;  %575 = vst [vmem:[#allocation2 + $0x7c] sm:$0x1] %v574_v3 }
  0x4d   : > { %v910_v43 = vsel %vm4712_vm0, %v6512_v59, %v909_v30  ;;  %v790_v38 = vrot.slane %v788_v23, 5  ;;  %v4850_v45 = vrot.slane %v827_v52, 4  ;;  %v4852_v39 = vrot.slane %v841_v62, 4  ;;  %v943_v7 = vld [vmem:[#allocation2 + $0xc] sm:$0x1] }
  0x4e   : > { %v707_v5 = vsel %vm4527_vm3, %v6513_v2, %v706_v47  ;;  %v713_v13 = vsel %vm4527_vm3, %v6514_v27, %v712_v41  ;;  %v4063_v26 = vcombine.low %v4727_v61, %v910_v43  ;;  %v944_v46 = vld [vmem:[#allocation2 + $0x14] sm:$0x1]  ;;  %v4854_v63 = vrot.slane %v986_v29, 4 }
  0x4f   : > { %708 = vst [vmem:[#allocation2 + $0x64] sm:$0x1] %v707_v5  ;;  %714 = vst [vmem:[#allocation2 + $0x6c] sm:$0x1] %v713_v13  ;;  %v4856_v31 = vrot.slane %v1000_v60, 4  ;;  %v1089_v15 = vrot.slane %v943_v7, 5  ;;  %v791_v61 = vsel %vm4816_vm8, %v4639_v21, %v790_v38  ;;  %v1142_v47 = vor.u32 %v4682_v4, %v4672_v54 }
  0x50   : > { %1548 = vrot.lane.b32.xlu0 %v4063_v26, %s4478_s25  ;;  %v1093_v33 = vrot.slane %v944_v46, 5  ;;  %v961_v30 = vshll.u32 %v943_v7, 16  ;;  %v751_v18 = vld [vmem:[#allocation2 + $0x80] sm:$0xf]  ;;  %v4059_v52 = vcombine.low %v777_v25, %v791_v61  ;;  %v497_v23 = vld [vmem:[#allocation2 + $0x1c] sm:$0x1]  ;;  %v1156_v41 = vor.u32 %v4692_v10, %v4690_v9 }
  0x51   : > { %v503_v62 = vld [vmem:[#allocation2 + $0x24] sm:$0x1]  ;;  %v752_v55 = vld [vmem:[#allocation2 + $0x88] sm:$0xf]  ;;  %v849_v3 = vshrl.u32 %v751_v18, 16  ;;  %v852_v29 = vshll.u32 %v751_v18, 16  ;;  %v1170_v4 = vor.u32 %v4708_v53, %v4701_v42 }
  0x52   : > { %v6515_v60 = vrot.slane %v4723_v16, 9  ;;  %v6516_v21 = vrot.slane %v4735_v36, 9  ;;  %v863_v2 = vshrl.u32 %v752_v55, 16  ;;  %v4058_v5 = vcombine.low %v751_v18, %v752_v55  ;;  %v4874_v54 = vld [vmem:[#allocation2 + $0x5c] sm:$0x1] }
  0x53   : > { %v4878_v9 = vrot.slane %v849_v3, 4  ;;  %v866_v10 = vshll.u32 %v752_v55, 16  ;;  %v6517_v16 = vrot.slane %v4602_v11, 4  ;;  %v6518_v36 = vrot.slane %v4608_v20, 4  ;;  %v718_v26 = vld [vmem:[#allocation2 + $0x74] sm:$0x1] }
  0x54   : > { %v1090_v59 = vsel %vm4712_vm0, %v6515_v60, %v1089_v15  ;;  %v1094_v43 = vsel %vm4712_vm0, %v6516_v21, %v1093_v33  ;;  %v724_v38 = vld [vmem:[#allocation2 + $0x7c] sm:$0x1]  ;;  %v4888_v7 = vrot.slane %v852_v29, 5  ;;  %v4890_v15 = vrot.slane %v863_v2, 4  ;;  %1514 = vrot.lane.b32.xlu1 %v4058_v5, %s4477_s24 }
  0x55   : > { %v4075_v27 = vcombine.low %v1090_v59, %v1094_v43  ;;  %v498_v13 = vsel %vm4527_vm3, %v6517_v16, %v497_v23  ;;  %v504_v25 = vsel %vm4527_vm3, %v6518_v36, %v503_v62  ;;  %v6519_v53 = vrot.slane %v4650_v34, 4 }
  0x56   : > { %v755_v42 = vld [vmem:[#allocation2 + $0x64] sm:$0x1]  ;;  %v756_v11 = vld [vmem:[#allocation2 + $0x6c] sm:$0x1]  ;;  %499 = vst [vmem:[#allocation2 + $0x1c] sm:$0x1] %v498_v13 }
  0x57   : > { %1616 = vrot.lane.b32.xlu0 %v4075_v27, %s4479_s26  ;;  %505 = vst [vmem:[#allocation2 + $0x24] sm:$0x1] %v504_v25  ;;  %v719_v20 = vsel %vm4527_vm3, %v6519_v53, %v718_v26  ;;  %v6520_v33 = vrot.slane %v4663_v48, 4  ;;  %v913_v18 = vrot.slane %v755_v42, 5  ;;  %v917_v23 = vrot.slane %v756_v11, 5 }
  0x58   : > { %v963_v62 = vrot.slane %v961_v30, 5  ;;  %v975_v55 = vshll.u32 %v944_v46, 16  ;;  %720 = vst [vmem:[#allocation2 + $0x74] sm:$0x1] %v719_v20  ;;  %v802_v3 = vshll.u32 %v755_v42, 16  ;;  %v816_v29 = vshll.u32 %v756_v11, 16 }
  0x59   : > { %v725_v61 = vsel %vm4527_vm3, %v6520_v33, %v724_v38  ;;  %v4902_v60 = vld [vmem:[#allocation2 + $0x64] sm:$0x1]  ;;  %v4904_v59 = vrot.slane %v1142_v47, 4  ;;  %v1145_v34 = vshll.u32 %v4874_v54, 16  ;;  %v6521_v21 = vrot.slane %v4763_v32, 9 }
  0x5a   : > { %726 = vst [vmem:[#allocation2 + $0x7c] sm:$0x1] %v725_v61  ;;  %v918_v46 = vsel %vm4712_vm0, %v4026_v12, %v917_v23  ;;  %v964_v30 = vsel %vm4816_vm8, %v4822_v28, %v963_v62  ;;  %v977_v43 = vrot.slane %v975_v55, 5  ;;  %v804_v47 = vrot.slane %v802_v3, 5  ;;  %v4919_v27 = vld [vmem:[#allocation2 + $0x6c] sm:$0x1] }
  0x5b   : > { %v914_v48 = vsel %vm4712_vm0, %v6521_v21, %v913_v18  ;;  %1528 = vrot.lane.b32.xlu0 %v4059_v52, %s4480_s27  ;;  %v818_v5 = vrot.slane %v816_v29, 5  ;;  %v1147_v32 = vrot.slane %v1145_v34, 5  ;;  %v4921_v16 = vrot.slane %v866_v10, 5  ;;  %v576_v55 = vld [vmem:[#allocation2 + $0x84] sm:$0x1] }
  0x5c   : > { %v4064_v2 = vcombine.low %v914_v48, %v918_v46  ;;  %v978_v35 = vsel %vm4816_vm8, %v4824_v58, %v977_v43  ;;  %v1157_v12 = vrot.slane %v1156_v41, 4  ;;  %v1159_v13 = vshll.u32 %v4902_v60, 16  ;;  %v579_v21 = vld [vmem:[#allocation2 + $0x8c] sm:$0x1]  ;;  %v1247_v46 = vld [vmem:[#allocation2 + $0x58] sm:$0xe] }
  0x5d   : > { %v4071_v28 = vcombine.low %v964_v30, %v978_v35  ;;  %v805_v52 = vsel %vm4816_vm8, %v4637_v19, %v804_v47  ;;  %v819_v36 = vsel %vm4816_vm8, %v4633_v14, %v818_v5  ;;  %v4934_v10 = vrot.slane %v1170_v4, 4  ;;  %v945_v25 = vld [vmem:[#allocation2 + $0x1c] sm:$0x1] }
  0x5e   : > { %1550 = vrot.lane.b32.xlu1 %v4064_v2, %s4478_s25  ;;  %v946_v26 = vld [vmem:[#allocation2 + $0x24] sm:$0x1]  ;;  %v1161_v38 = vrot.slane %v1159_v13, 5  ;;  %v1173_v58 = vshll.u32 %v4919_v27, 16  ;;  %v1184_v41 = vor.u32 %v4757_v57, %v4755_v56  ;;  %v1097_v42 = vrot.slane %v945_v25, 5 }
  0x5f   : > { %v1101_v11 = vrot.slane %v946_v26, 5  ;;  %1596 = vrot.lane.b32.xlu0 %v4071_v28, %s4481_s28  ;;  %v4060_v19 = vcombine.low %v805_v52, %v819_v36  ;;  %v4940_v53 = vld [vmem:[#allocation2 + $0x74] sm:$0x1]  ;;  %v1148_v14 = vsel %vm4816_vm8, %v4904_v59, %v1147_v32  ;;  %v989_v61 = vshll.u32 %v945_v25, 16  ;;  %v1248_v2 = vld [vmem:[#allocation2 + $0x60] sm:$0xe] }
  0x60   : > { %v830_v4 = vshll.u32 %v4940_v53, 16  ;;  %v1003_v56 = vshll.u32 %v946_v26, 16  ;;  %v1098_v57 = vsel %vm4712_vm0, %v4033_v6, %v1097_v42  ;;  %v4957_v23 = vld [vmem:[#allocation2 + $0x74] sm:$0x1]  ;;  %v4959_v62 = vrot.slane %v1173_v58, 5  ;;  %v251_v32 = vld [vmem:[%s4555_s23 + $0x40] sm:$0xff] }
  0x61   : > { %v4942_v20 = vld [vmem:[#allocation2 + $0x7c] sm:$0x1]  ;;  %v1102_v18 = vsel %vm4712_vm0, %v4034_v44, %v1101_v11  ;;  %v855_v3 = vor.u32 %v4888_v7, %v4878_v9  ;;  %v991_v37 = vrot.slane %v989_v61, 5  ;;  %v1162_v8 = vsel %vm4816_vm8, %v1157_v12, %v1161_v38  ;;  %v253_v52 = vld [vmem:[%s4555_s23 + $0x50] sm:$0xff]  ;;  %v330_v36 = vld [vmem:[#allocation2 + $0x28] sm:$0x1] }
  0x62   : > { %v844_v33 = vshll.u32 %v4942_v20, 16  ;;  %v4076_v29 = vcombine.low %v1098_v57, %v1102_v18  ;;  %v832_v59 = vrot.slane %v830_v4, 5  ;;  %v1005_v48 = vrot.slane %v1003_v56, 5 }
  0x63   : > { %v1185_v6 = vrot.slane %v1184_v41, 4  ;;  %v869_v44 = vor.u32 %v4921_v16, %v4890_v15  ;;  %v992_v30 = vsel %vm4816_vm8, %v4854_v63, %v991_v37  ;;  %v1187_v43 = vshll.u32 %v4957_v23, 16  ;;  %v880_v15 = vld [vmem:[#allocation2 + $0x70] sm:$0xe]  ;;  %v4988_v63 = vld [vmem:[#allocation2 + $0x18] sm:$0xf] }
  0x64   : > { %v846_v34 = vrot.slane %v844_v33, 5  ;;  %1618 = vrot.lane.b32.xlu1 %v4076_v29, %s4479_s26  ;;  %v833_v9 = vsel %vm4816_vm8, %v4850_v45, %v832_v59  ;;  %v1006_v5 = vsel %vm4816_vm8, %v4856_v31, %v1005_v48  ;;  %v577_v45 = vsel %vm4668_vm2, 0, %v576_v55  ;;  %v4986_v16 = vld [vmem:[#allocation2 + $0x10] sm:$0xf]  ;;  %v881_v31 = vld [vmem:[#allocation2 + $0x78] sm:$0xe] }
  0x65   : > { %v4072_v35 = vcombine.low %v992_v30, %v1006_v5  ;;  %v4083_v12 = vcombine.low %v1148_v14, %v1162_v8  ;;  %v1176_v13 = vsel %vm4816_vm8, %v4934_v10, %v4959_v62  ;;  %v1189_v28 = vrot.slane %v1187_v43, 5  ;;  %578 = vst [vmem:[#allocation2 + $0x84] sm:$0x1] %v577_v45  ;;  %v333_v41 = vld [vmem:[#allocation2 + $0x30] sm:$0x1] }
  0x66   : > { %v847_v7 = vsel %vm4816_vm8, %v4852_v39, %v846_v34  ;;  %v580_v39 = vsel %vm4668_vm2, 0, %v579_v21  ;;  %v4039_v25 = vrot.slane %v1247_v46, 9  ;;  %v1273_v26 = vrot.slane %v4874_v54, 5  ;;  %v5047_v30 = vld [vmem:[#allocation2 + $0x70] sm:$0xe] }
  0x67   : > { %v4061_v47 = vcombine.low %v833_v9, %v847_v7  ;;  %581 = vst [vmem:[#allocation2 + $0x8c] sm:$0x1] %v580_v39  ;;  %v4040_v38 = vrot.slane %v1248_v2, 9  ;;  %v1277_v58 = vrot.slane %v4902_v60, 5  ;;  %v4999_v42 = vrot.slane %v855_v3, 4 }
  0x68   : > { %1530 = vrot.lane.b32.xlu1 %v4060_v19, %s4480_s27  ;;  %v5001_v10 = vrot.slane %v869_v44, 4  ;;  %v4027_v11 = vrot.slane %v880_v15, 9  ;;  %v921_v14 = vrot.slane %v4940_v53, 5  ;;  %v1190_v4 = vsel %vm4816_vm8, %v1185_v6, %v1189_v28  ;;  %v5014_v19 = vld [vmem:[#allocation2 + $0x80] sm:$0xe] }
  0x69   : > { %1532 = vrot.lane.b32.xlu0 %v4061_v47, %s4480_s27  ;;  %v5008_v33 = vsel %vm4712_vm0, %v4039_v25, %v1273_v26  ;;  %v5012_v54 = vsel %vm4712_vm0, %v4040_v38, %v1277_v58  ;;  %v4028_v60 = vrot.slane %v881_v31, 9  ;;  %vm267_vm9 = vcmp.ge.f32.partialorder %v251_v32, 0.0  ;;  %v5037_v6 = vld [vmem:[#allocation2 + $0x68] sm:$0xe]  ;;  %v356_v43 = vld [vmem:[#allocation2 + $0x2c] sm:$0x1] }
  0x6a   : > { %vm269_vm11 = vcmp.ge.f32.partialorder %v253_v52, 0.0  ;;  %v4091_v61 = vcombine.low %v4986_v16, %v4988_v63  ;;  %v925_v53 = vrot.slane %v4942_v20, 5  ;;  %v283_v56 = vmul.f32 0.2, %v251_v32  ;;  %v5031_v20 = vld [vmem:[#allocation2 + $0x88] sm:$0xe] }
  0x6b   : > { %v285_v57 = vmul.f32 0.2, %v253_v52  ;;  %v331_v18 = vsel %vm4527_vm3, 0, %v330_v36  ;;  %v4084_v62 = vcombine.low %v1176_v13, %v1190_v4  ;;  %v4087_v55 = vcombine.low %v5008_v33, %v5012_v54  ;;  %v359_v2 = vld [vmem:[#allocation2 + $0x34] sm:$0x1] }
  0x6c   : > { %1598 = vrot.lane.b32.xlu1 %v4072_v35, %s4481_s28  ;;  %v5027_v3 = vsel %vm4712_vm0, %v4027_v11, %v921_v14  ;;  %332 = vst [vmem:[#allocation2 + $0x28] sm:$0x1] %v331_v18  ;;  %v334_v29 = vsel %vm4527_vm3, 0, %v333_v41  ;;  %v730_v59 = vld [vmem:[#allocation2 + $0x84] sm:$0x1]  ;;  %v299_v37 = vsel %vm267_vm9, %v251_v32, %v283_v56  ;;  %v1321_v48 = vshrl.u32 %v4986_v16, 16 }
  0x6d   : > { %1664 = vrot.lane.b32.xlu0 %v4083_v12, %s4482_s29  ;;  %v301_v21 = vsel %vm269_vm11, %v253_v52, %v285_v57  ;;  %335 = vst [vmem:[#allocation2 + $0x30] sm:$0x1] %v334_v29  ;;  %v1324_v8 = vshll.u32 %v4986_v16, 16  ;;  %v731_v44 = vsel %vm4527_vm3, %v664_v17, %v730_v59  ;;  %v4243_v9 = vpack.c.bf16 %v299_v37, %v299_v37  ;;  %v257_v32 = vld [vmem:[%s4555_s23 + $0x70] sm:$0xff]  ;;  %v336_v31 = vld [vmem:[#allocation2 + $0x38] sm:$0x1] }
  0x6e   : > { %v736_v34 = vld [vmem:[#allocation2 + $0x8c] sm:$0x1]  ;;  %v4244_v7 = vpack.c.bf16 %v301_v21, %v301_v21  ;;  %732 = vst [vmem:[#allocation2 + $0x84] sm:$0x1] %v731_v44  ;;  %v5051_v22 = vsel %vm4712_vm0, %v4028_v60, %v925_v53  ;;  %v4029_v17 = vrot.slane %v5014_v19, 9  ;;  %v1335_v24 = vshrl.u32 %v4988_v63, 16 }
  0x6f   : > { %v737_v46 = vsel %vm4527_vm3, %v672_v1, %v736_v34  ;;  %v1338_v15 = vshll.u32 %v4988_v63, 16  ;;  %v255_v1 = vld [vmem:[%s4555_s23 + $0x60] sm:$0xff]  ;;  %v433_v47 = vshrl.u32 %v4243_v9, 16  ;;  %v436_v5 = vshll.u32 %v4243_v9, 16  ;;  %v5100_v9 = vld [vmem:[#allocation2 + $0x14] sm:$0x1] }
  0x70   : > { %738 = vst [vmem:[#allocation2 + $0x8c] sm:$0x1] %v737_v46  ;;  %1666 = vrot.lane.b32.xlu1 %v4084_v62, %s4482_s29  ;;  %v441_v45 = vshrl.u32 %v4244_v7, 16  ;;  %v444_v39 = vshll.u32 %v4244_v7, 16  ;;  %v4030_v35 = vrot.slane %v5031_v20, 9  ;;  %v5060_v12 = vrot.slane %v1321_v48, 4 }
  0x71   : > { %v5062_v13 = vrot.slane %v1324_v8, 5  ;;  %v5064_v28 = vrot.slane %v1335_v24, 4  ;;  %v5066_v52 = vrot.slane %v433_v47, 7  ;;  %v5070_v25 = vrot.slane %v1338_v15, 5  ;;  %v339_v4 = vld [vmem:[#allocation2 + $0x40] sm:$0x1] }
  0x72   : > { %v5068_v36 = vrot.slane %v441_v45, 7  ;;  %v4041_v26 = vrot.slane %v5037_v6, 9  ;;  %v1281_v58 = vrot.slane %v4919_v27, 5  ;;  %v4042_v41 = vrot.slane %v5047_v30, 9  ;;  %v4431_v18 = vld [vmem:[%s6485_s1] sm:$0xff]   ;;  %v4432_v24 = vld [vmem:[%s6485_s1 + $0x8] sm:$0xff]  }
  0x73   : > { %v506_v38 = vld [vmem:[#allocation2 + $0x28] sm:$0xf]  ;;  %v357_v11 = vsel %vm4668_vm2, 0, %v356_v43  ;;  %v360_v14 = vsel %vm4668_vm2, 0, %v359_v2  ;;  %v438_v33 = vor.u32 %v436_v5, %v5066_v52  ;;  %v1285_v53 = vrot.slane %v4957_v23, 5  ;;  %4307 = vmatprep.subr.bf16.mxu0 %v4431_v18  ;;  %v4435_v16 = vld [vmem:[%s6485_s1 + $0x20] sm:$0xff]  }
  0x74   : > { %1684 = vrot.lane.b32.xlu1 %v4087_v55, %s4483_s30  ;;  %v446_v54 = vor.u32 %v444_v39, %v5068_v36  ;;  %v512_v60 = vld [vmem:[#allocation2 + $0x30] sm:$0xf]  ;;  %358 = vst [vmem:[#allocation2 + $0x2c] sm:$0x1] %v357_v11  ;;  %361 = vst [vmem:[#allocation2 + $0x34] sm:$0x1] %v360_v14  ;;  %v4065_v27 = vcombine.low %v5027_v3, %v5051_v22  ;;  %4308 = vmatpush3.bf16.msra.mxu0 %v4431_v18 }
  0x75   : > { %vm271_vm12 = vcmp.ge.f32.partialorder %v255_v1, 0.0  ;;  %vm273_vm13 = vcmp.ge.f32.partialorder %v257_v32, 0.0  ;;  %v287_v56 = vmul.f32 0.2, %v255_v1  ;;  %v289_v57 = vmul.f32 0.2, %v257_v32  ;;  %4309 = vmatprep.subr.bf16.mxu0 %v4432_v24 }
  0x76   : > { %v759_v62 = vld [vmem:[#allocation2 + $0x84] sm:$0x1]  ;;  %v439_v29 = vrot.slane %v5066_v52, 4  ;;  %v507_v23 = vsel %vm4580_vm10, %v438_v33, %v506_v38  ;;  %v513_v20 = vsel %vm4580_vm10, %v446_v54, %v512_v60  ;;  %v337_v59 = vsel %vm4527_vm3, 0, %v336_v31  ;;  %v4433_v38 = vld [vmem:[%s6485_s1 + $0x10] sm:$0xff]  }
  0x77   : > { %v760_v55 = vld [vmem:[#allocation2 + $0x8c] sm:$0x1]  ;;  %v858_v34 = vshll.u32 %v759_v62, 16  ;;  %508 = vst [vmem:[#allocation2 + $0x28] sm:$0xf] %v507_v23  ;;  %v929_v21 = vrot.slane %v759_v62, 5  ;;  %v303_v6 = vsel %vm271_vm12, %v255_v1, %v287_v56  ;;  %v305_v44 = vsel %vm273_vm13, %v257_v32, %v289_v57 }
  0x78   : > { %v872_v37 = vshll.u32 %v760_v55, 16  ;;  %514 = vst [vmem:[#allocation2 + $0x30] sm:$0xf] %v513_v20  ;;  %v933_v48 = vrot.slane %v760_v55, 5  ;;  %338 = vst [vmem:[#allocation2 + $0x38] sm:$0x1] %v337_v59  ;;  %v5104_v43 = vsel %vm4712_vm0, %v4041_v26, %v1281_v58  ;;  %v1327_v2 = vor.u32 %v5062_v13, %v5060_v12  ;;  %4310 = vmatpush3.bf16.msra.mxu0 %v4432_v24 }
  0x79   : > { %v447_v8 = vrot.slane %v5068_v36, 4  ;;  %v340_v46 = vsel %vm4527_vm3, 0, %v339_v4  ;;  %v860_v7 = vrot.slane %v858_v34, 5  ;;  %v5115_v15 = vsel %vm4712_vm0, %v4029_v17, %v929_v21  ;;  %v5150_v54 = vld [vmem:[#allocation2 + $0x20] sm:$0xf]  ;;  %4311 = vmatprep.subr.bf16.mxu0 %v4433_v38 }
  0x7a   : > { %v874_v30 = vrot.slane %v872_v37, 5  ;;  %341 = vst [vmem:[#allocation2 + $0x40] sm:$0x1] %v340_v46  ;;  %v5119_v1 = vsel %vm4712_vm0, %v4042_v41, %v1285_v53  ;;  %v4245_v47 = vpack.c.bf16 %v303_v6, %v303_v6  ;;  %v4246_v5 = vpack.c.bf16 %v305_v44, %v305_v44  ;;  %v5155_v20 = vld [vmem:[#allocation2 + $0x1c] sm:$0x1] }
  0x7b   : > { %v861_v45 = vsel %vm4816_vm8, %v4999_v42, %v860_v7  ;;  %v5129_v19 = vsel %vm4712_vm0, %v4030_v35, %v933_v48  ;;  %v509_v17 = vld [vmem:[#allocation2 + $0x2c] sm:$0x1]  ;;  %v515_v32 = vld [vmem:[#allocation2 + $0x34] sm:$0x1]  ;;  %v1330_v12 = vshll.u32 %v5100_v9, 16  ;;  %v5138_v26 = vrot.slane %v1327_v2, 4 }
  0x7c   : > { %v875_v39 = vsel %vm4816_vm8, %v5001_v10, %v874_v30  ;;  %v510_v31 = vsel %vm4527_vm3, %v439_v29, %v509_v17  ;;  %v516_v42 = vsel %vm4527_vm3, %v447_v8, %v515_v32  ;;  %v449_v52 = vshrl.u32 %v4245_v47, 16  ;;  %4312 = vmatpush3.bf16.msra.mxu0 %v4433_v38  ;;  %v5170_v24 = vld [vmem:[#allocation2 + $0x24] sm:$0x1]  ;;  %v362_v3 = vld [vmem:[#allocation2 + $0x3c] sm:$0x1] }
  0x7d   : > { %v4062_v13 = vcombine.low %v861_v45, %v875_v39  ;;  %v4088_v10 = vcombine.low %v5104_v43, %v5119_v1  ;;  %511 = vst [vmem:[#allocation2 + $0x2c] sm:$0x1] %v510_v31  ;;  %517 = vst [vmem:[#allocation2 + $0x34] sm:$0x1] %v516_v42  ;;  %v452_v35 = vshll.u32 %v4245_v47, 16  ;;  %v457_v36 = vshrl.u32 %v4246_v5, 16 }
  0x7e   : > { %v939_v58 = vld [vmem:[#allocation2 + $0x28] sm:$0xf]  ;;  %v4066_v11 = vcombine.low %v5115_v15, %v5129_v19  ;;  %v5146_v14 = vrot.slane %v449_v52, 7  ;;  %v460_v4 = vshll.u32 %v4246_v5, 16  ;;  %v1341_v33 = vor.u32 %v5070_v25, %v5064_v28 }
  0x7f   : > { %1534 = vrot.lane.b32.xlu0 %v4062_v13, %s4480_s27  ;;  %v940_v41 = vld [vmem:[#allocation2 + $0x30] sm:$0xf]  ;;  %v1008_v60 = vshrl.u32 %v939_v58, 16  ;;  %v1011_v53 = vshll.u32 %v939_v58, 16  ;;  %v518_v18 = vld [vmem:[#allocation2 + $0x38] sm:$0xf] }
  0x80   : > { %v1022_v56 = vshrl.u32 %v940_v41, 16  ;;  %v1025_v57 = vshll.u32 %v940_v41, 16  ;;  %v4069_v62 = vcombine.low %v939_v58, %v940_v41  ;;  %v454_v55 = vor.u32 %v452_v35, %v5146_v14  ;;  %v5157_v21 = vld [vmem:[#allocation2 + $0x28] sm:$0xf]  ;;  %v365_v35 = vld [vmem:[#allocation2 + $0x44] sm:$0x1] }
  0x81   : > { %v5153_v29 = vrot.slane %v457_v36, 7  ;;  %v524_v23 = vld [vmem:[#allocation2 + $0x40] sm:$0xf]  ;;  %v1332_v59 = vrot.slane %v1330_v12, 5  ;;  %v1010_v34 = vrot.slane %v1008_v60, 4  ;;  %v1013_v28 = vrot.slane %v1011_v53, 5 }
  0x82   : > { %v1024_v25 = vrot.slane %v1022_v56, 4  ;;  %v1027_v37 = vrot.slane %v1025_v57, 5  ;;  %1580 = vrot.lane.b32.xlu1 %v4069_v62, %s4478_s25  ;;  %v455_v48 = vrot.slane %v5146_v14, 4  ;;  %v519_v6 = vsel %vm4580_vm10, %v454_v55, %v518_v18  ;;  %v1432_v41 = vld [vmem:[#allocation2 + $0x10] sm:$0xe] }
  0x83   : > { %1552 = vrot.lane.b32.xlu0 %v4065_v27, %s4478_s25  ;;  %v462_v8 = vor.u32 %v460_v4, %v5153_v29  ;;  %v1342_v44 = vrot.slane %v1341_v33, 4  ;;  %v1014_v46 = vor.u32 %v1013_v28, %v1010_v34  ;;  %520 = vst [vmem:[#allocation2 + $0x38] sm:$0xf] %v519_v6  ;;  %v1344_v30 = vshll.u32 %v5155_v20, 16  ;;  %v1433_v4 = vld [vmem:[#allocation2 + $0x18] sm:$0xe] }
  0x84   : > { %v1028_v7 = vor.u32 %v1027_v37, %v1024_v25  ;;  %v1349_v2 = vshrl.u32 %v5150_v54, 16  ;;  %v5172_v22 = vld [vmem:[#allocation2 + $0x2c] sm:$0x1]  ;;  %v5174_v27 = vld [vmem:[#allocation2 + $0x34] sm:$0x1]  ;;  %v1333_v47 = vsel %vm4816_vm8, %v5138_v26, %v1332_v59  ;;  %v1352_v5 = vshll.u32 %v5150_v54, 16 }
  0x85   : > { %v525_v15 = vsel %vm4580_vm10, %v462_v8, %v524_v23  ;;  %v1363_v45 = vshrl.u32 %v5157_v21, 16  ;;  %v1015_v39 = vrot.slane %v1014_v46, 4  ;;  %v1017_v19 = vshll.u32 %v5172_v22, 16  ;;  %v5185_v12 = vld [vmem:[#allocation2 + $0x2c] sm:$0x1] }
  0x86   : > { %v1029_v17 = vrot.slane %v1028_v7, 4  ;;  %v1031_v32 = vshll.u32 %v5174_v27, 16  ;;  %526 = vst [vmem:[#allocation2 + $0x40] sm:$0xf] %v525_v15  ;;  %1712 = vrot.lane.b32.xlu1 %v4091_v61, %s4483_s30  ;;  %v1346_v13 = vrot.slane %v1344_v30, 5  ;;  %v1351_v31 = vrot.slane %v1349_v2, 4 }
  0x87   : > { %1554 = vrot.lane.b32.xlu0 %v4066_v11, %s4478_s25  ;;  %v1354_v42 = vrot.slane %v1352_v5, 5  ;;  %v1365_v52 = vrot.slane %v1363_v45, 4  ;;  %v1019_v36 = vrot.slane %v1017_v19, 5  ;;  %v1366_v38 = vshll.u32 %v5157_v21, 16  ;;  %v4434_v11 = vld [vmem:[%s6485_s1 + $0x18] sm:$0xff]  }
  0x88   : > { %v1033_v26 = vrot.slane %v1031_v32, 5  ;;  %v1358_v58 = vshll.u32 %v5170_v24, 16  ;;  %v1347_v63 = vsel %vm4816_vm8, %v1342_v44, %v1346_v13  ;;  %v1372_v33 = vshll.u32 %v5185_v12, 16  ;;  %4313 = vmatprep.subr.bf16.mxu0 %v4434_v11  ;;  %v5225_v32 = vld [vmem:[#allocation2 + $0x78] sm:$0xf] }
  0x89   : > { %v1355_v61 = vor.u32 %v1354_v42, %v1351_v31  ;;  %v363_v60 = vsel %vm4668_vm2, 0, %v362_v3  ;;  %v1020_v53 = vsel %vm4816_vm8, %v1015_v39, %v1019_v36  ;;  %v463_v57 = vrot.slane %v5153_v29, 4  ;;  %4314 = vmatpush3.bf16.msra.mxu0 %v4434_v11  ;;  %v1067_v3 = vld [vmem:[#allocation2 + $0x28] sm:$0xe]  ;;  %v5227_v13 = vld [vmem:[#allocation2 + $0x80] sm:$0xf] }
  0x8a   : > { %v1034_v56 = vsel %vm4816_vm8, %v1029_v17, %v1033_v26  ;;  %v1368_v18 = vrot.slane %v1366_v38, 5  ;;  %364 = vst [vmem:[#allocation2 + $0x3c] sm:$0x1] %v363_v60  ;;  %v941_v55 = vld [vmem:[#allocation2 + $0x38] sm:$0xf]  ;;  %v4095_v23 = vcombine.low %v1333_v47, %v1347_v63  ;;  %v1360_v34 = vrot.slane %v1358_v58, 5  ;;  %4315 = vmatprep.subr.bf16.mxu0 %v4435_v16 }
  0x8b   : > { %1686 = vrot.lane.b32.xlu0 %v4088_v10, %s4483_s30  ;;  %v4073_v62 = vcombine.low %v1020_v53, %v1034_v56  ;;  %v1356_v59 = vrot.slane %v1355_v61, 4  ;;  %v1036_v28 = vshrl.u32 %v941_v55, 16  ;;  %v1039_v25 = vshll.u32 %v941_v55, 16  ;;  %v558_v58 = vld [vmem:[#allocation2 + $0x90] sm:$0x1] }
  0x8c   : > { %v1369_v37 = vor.u32 %v1368_v18, %v1365_v52  ;;  %v366_v8 = vsel %vm4668_vm2, 0, %v365_v35  ;;  %v1374_v44 = vrot.slane %v1372_v33, 5  ;;  %v4047_v43 = vrot.slane %v1432_v41, 9  ;;  %v1068_v52 = vld [vmem:[#allocation2 + $0x30] sm:$0xe] }
  0x8d   : > { %1600 = vrot.lane.b32.xlu1 %v4073_v62, %s4481_s28  ;;  %v942_v6 = vld [vmem:[#allocation2 + $0x40] sm:$0xf]  ;;  %367 = vst [vmem:[#allocation2 + $0x44] sm:$0x1] %v366_v8  ;;  %v1458_v1 = vrot.slane %v5100_v9, 5  ;;  %v4048_v10 = vrot.slane %v1433_v4, 9  ;;  %v1361_v47 = vsel %vm4816_vm8, %v1356_v59, %v1360_v34  ;;  %4316 = vmatpush3.bf16.msra.mxu0 %v4435_v16  ;;  %v4092_v17 = vcombine.low %v5150_v54, %v5157_v21 }
  0x8e   : > { %v1038_v46 = vrot.slane %v1036_v28, 4  ;;  %v1041_v7 = vrot.slane %v1039_v25, 5  ;;  %v1050_v30 = vshrl.u32 %v942_v6, 16  ;;  %v1053_v2 = vshll.u32 %v942_v6, 16  ;;  %v258_v4 = vld [vmem:[%s4555_s23 + $0x78] sm:$0xff]  ;;  %s4238_s23 = sshll.u32 %s6698_s19, 6 }
  0x8f   : > { %v4070_v15 = vcombine.low %v941_v55, %v942_v6  ;;  %v1370_v5 = vrot.slane %v1369_v37, 4  ;;  %v1462_v45 = vrot.slane %v5155_v20, 5  ;;  %v1459_v9 = vsel %vm4712_vm0, %v4047_v43, %v1458_v1  ;;  %v5242_v11 = vld [vmem:[#allocation2 + $0x88] sm:$0xf]  ;;  %v5247_v61 = vld [vmem:[#allocation2 + $0x38] sm:$0xe] }
  0x90   : > { %v1052_v39 = vrot.slane %v1050_v30, 4  ;;  %v1055_v19 = vrot.slane %v1053_v2, 5  ;;  %v1042_v42 = vor.u32 %v1041_v7, %v1038_v46  ;;  %v4035_v54 = vrot.slane %v1067_v3, 9  ;;  %v582_v33 = vld [vmem:[#allocation2 + $0x94] sm:$0x1]  ;;  %v4436_v43 = vld [vmem:[%s6485_s1 + $0x28] sm:$0xff]  }
  0x91   : > { %1582 = vrot.lane.b32.xlu0 %v4070_v15, %s4478_s25  ;;  %1732 = vrot.lane.b32.xlu1 %v4095_v23, %s4484_s16  ;;  %v1375_v20 = vsel %vm4816_vm8, %v1370_v5, %v1374_v44  ;;  %v521_v31 = vld [vmem:[#allocation2 + $0x3c] sm:$0x1]  ;;  %v1105_v21 = vrot.slane %v5172_v22, 5  ;;  %v1463_v38 = vsel %vm4712_vm0, %v4048_v10, %v1462_v45  ;;  %v1192_v41 = vshrl.u32 %v5225_v32, 16  ;;  %v1435_v62 = vld [vmem:[#allocation2 + $0x28] sm:$0xe] }
  0x92   : > { %v4096_v35 = vcombine.low %v1361_v47, %v1375_v20  ;;  %v522_v36 = vsel %vm4527_vm3, %v455_v48, %v521_v31  ;;  %v1056_v26 = vor.u32 %v1055_v19, %v1052_v39  ;;  %v4036_v63 = vrot.slane %v1068_v52, 9  ;;  %v1434_v48 = vld [vmem:[#allocation2 + $0x20] sm:$0xe]  ;;  %v5266_v34 = vld [vmem:[#allocation2 + $0x8c] sm:$0x1]  ;;  %4317 = vmatprep.subr.bf16.mxu0 %v4436_v43  ;;  %v4437_v20 = vld [vmem:[%s6485_s1 + $0x30] sm:$0xff]  }
  0x93   : > { %523 = vst [vmem:[#allocation2 + $0x3c] sm:$0x1] %v522_v36  ;;  %v1195_v22 = vshll.u32 %v5225_v32, 16  ;;  %v4081_v14 = vcombine.low %v5225_v32, %v5227_v13  ;;  %v5255_v53 = vrot.slane %v1042_v42, 4  ;;  %v4099_v56 = vcombine.low %v1459_v9, %v1463_v38  ;;  %v1070_v8 = vld [vmem:[#allocation2 + $0x40] sm:$0xe]  ;;  %4318 = vmatpush3.bf16.msra.mxu0 %v4436_v43 }
  0x94   : > { %v527_v16 = vld [vmem:[#allocation2 + $0x44] sm:$0x1]  ;;  %v5259_v18 = vsel %vm4712_vm0, %v4035_v54, %v1105_v21  ;;  %v5261_v55 = vrot.slane %v1056_v26, 4  ;;  %v1109_v23 = vrot.slane %v5174_v27, 5  ;;  %v1206_v59 = vshrl.u32 %v5227_v13, 16  ;;  %4319 = vmatprep.subr.bf16.mxu0 %v4437_v20 }
  0x95   : > { %1714 = vrot.lane.b32.xlu0 %v4092_v17, %s4483_s30  ;;  %1734 = vrot.lane.b32.xlu1 %v4096_v35, %s4484_s16  ;;  %v528_v60 = vsel %vm4527_vm3, %v463_v57, %v527_v16  ;;  %v1209_v29 = vshll.u32 %v5227_v13, 16  ;;  %v5268_v57 = vrot.slane %v1192_v41, 4  ;;  %vm274_vm14 = vcmp.ge.f32.partialorder %v258_v4, 0.0  ;;  %v5290_v13 = vld [vmem:[#allocation2 + $0x7c] sm:$0x1] }
  0x96   : > { %529 = vst [vmem:[#allocation2 + $0x44] sm:$0x1] %v528_v60  ;;  %v290_v28 = vmul.f32 0.2, %v258_v4  ;;  %v559_v25 = vsel %vm4527_vm3, 0, %v558_v58  ;;  %v5272_v37 = vrot.slane %v1195_v22, 5 }
  0x97   : > { %v4037_v6 = vrot.slane %v5247_v61, 9  ;;  %560 = vst [vmem:[#allocation2 + $0x90] sm:$0x1] %v559_v25  ;;  %v1220_v27 = vshrl.u32 %v5242_v11, 16  ;;  %v1223_v44 = vshll.u32 %v5242_v11, 16  ;;  %v4049_v10 = vrot.slane %v1434_v48, 9  ;;  %4320 = vmatpush3.bf16.msra.mxu0 %v4437_v20 }
  0x98   : > { %v306_v1 = vsel %vm274_vm14, %v258_v4, %v290_v28  ;;  %v1466_v46 = vrot.slane %v5170_v24, 5  ;;  %v583_v7 = vsel %vm4668_vm2, 0, %v582_v33  ;;  %v4050_v47 = vrot.slane %v1435_v62, 9  ;;  %v5296_v21 = vld [vmem:[#allocation2 + $0x84] sm:$0x1]  ;;  %v4438_v33 = vld [vmem:[%s6485_s1 + $0x38] sm:$0xff]  }
  0x99   : > { %1752 = vrot.lane.b32.xlu1 %v4099_v56, %s4477_s24  ;;  %v4254_v2 = vpack.c.bf16 %v306_v1, %v306_v1  ;;  %v1222_v3 = vrot.slane %v1220_v27, 4  ;;  %v1225_v15 = vrot.slane %v1223_v44, 5  ;;  %584 = vst [vmem:[#allocation2 + $0x94] sm:$0x1] %v583_v7  ;;  %v1470_v39 = vrot.slane %v5185_v12, 5  ;;  %4321 = vmatprep.subr.bf16.mxu0 %v4438_v33 }
  0x9a   : > { %v949_v30 = vld [vmem:[#allocation2 + $0x3c] sm:$0x1]  ;;  %v1229_v19 = vshll.u32 %v5266_v34, 16  ;;  %v5288_v24 = vsel %vm4712_vm0, %v4036_v63, %v1109_v23  ;;  %v1208_v17 = vrot.slane %v1206_v59, 4  ;;  %v1211_v52 = vrot.slane %v1209_v29, 5 }
  0x9b   : > { %v1045_v5 = vshll.u32 %v949_v30, 16  ;;  %v1113_v45 = vrot.slane %v949_v30, 5  ;;  %v674_v9 = vshrl.u32 %v4254_v2, 16  ;;  %v677_v32 = vshll.u32 %v4254_v2, 16  ;;  %v5333_v25 = vld [vmem:[#allocation2 + $0x88] sm:$0xe]  ;;  %4322 = vmatpush3.bf16.msra.mxu0 %v4438_v33 }
  0x9c   : > { %v4038_v12 = vrot.slane %v1070_v8, 9  ;;  %v1226_v54 = vor.u32 %v1225_v15, %v1222_v3  ;;  %v5300_v38 = vsel %vm4712_vm0, %v4049_v10, %v1466_v46  ;;  %v5308_v4 = vsel %vm4712_vm0, %v4050_v47, %v1470_v39  ;;  %v5335_v27 = vld [vmem:[#allocation2 + $0x48] sm:$0xf]  ;;  %v5345_v46 = vld [vmem:[#allocation2 + $0x40] sm:$0xf] }
  0x9d   : > { %v950_v31 = vld [vmem:[#allocation2 + $0x44] sm:$0x1]  ;;  %v1047_v42 = vrot.slane %v1045_v5, 5  ;;  %1648 = vrot.lane.b32.xlu1 %v4081_v14, %s4479_s26  ;;  %v676_v26 = vrot.slane %v674_v9, 7  ;;  %v5304_v58 = vsel %vm4712_vm0, %v4037_v6, %v1113_v45  ;;  %v5310_v16 = vrot.slane %v1229_v19, 5 }
  0x9e   : > { %v1059_v35 = vshll.u32 %v950_v31, 16  ;;  %v1117_v36 = vrot.slane %v950_v31, 5  ;;  %v739_v41 = vld [vmem:[#allocation2 + $0x90] sm:$0xf]  ;;  %v1198_v63 = vor.u32 %v5272_v37, %v5268_v57  ;;  %v5322_v62 = vrot.slane %v1226_v54, 4 }
  0x9f   : > { %v1048_v22 = vsel %vm4816_vm8, %v5255_v53, %v1047_v42  ;;  %v679_v61 = vor.u32 %v677_v32, %v676_v26  ;;  %v680_v48 = vrot.slane %v676_v26, 4  ;;  %v1201_v23 = vshll.u32 %v5290_v13, 16  ;;  %v1251_v37 = vld [vmem:[#allocation2 + $0x78] sm:$0xe]  ;;  %v1252_v6 = vld [vmem:[#allocation2 + $0x80] sm:$0xe] }
  0xa0   : > { %v1061_v14 = vrot.slane %v1059_v35, 5  ;;  %v1118_v60 = vsel %vm4712_vm0, %v4038_v12, %v1117_v36  ;;  %v742_v56 = vld [vmem:[#allocation2 + $0x94] sm:$0x1]  ;;  %v1212_v59 = vor.u32 %v1211_v52, %v1208_v17  ;;  %v1215_v28 = vshll.u32 %v5296_v21, 16  ;;  %v5351_v15 = vld [vmem:[#allocation2 + $0x38] sm:$0xf] }
  0xa1   : > { %v740_v29 = vsel %vm4580_vm10, %v679_v61, %v739_v41  ;;  %v743_v57 = vsel %vm4527_vm3, %v680_v48, %v742_v56  ;;  %v4077_v44 = vcombine.low %v5259_v18, %v5288_v24  ;;  %v4078_v43 = vcombine.low %v5304_v58, %v1118_v60  ;;  %v5377_v60 = vld [vmem:[#allocation2 + $0x44] sm:$0x1] }
  0xa2   : > { %v1062_v53 = vsel %vm4816_vm8, %v5261_v55, %v1061_v14  ;;  %741 = vst [vmem:[#allocation2 + $0x90] sm:$0xf] %v740_v29  ;;  %744 = vst [vmem:[#allocation2 + $0x94] sm:$0x1] %v743_v57  ;;  %v5337_v55 = vld [vmem:[#allocation2 + $0x30] sm:$0xf]  ;;  %v4100_v1 = vcombine.low %v5300_v38, %v5308_v4  ;;  %v1232_v7 = vsel %vm4816_vm8, %v5322_v62, %v5310_v16 }
  0xa3   : > { %v4074_v8 = vcombine.low %v1048_v22, %v1062_v53  ;;  %v1199_v10 = vrot.slane %v1198_v63, 4  ;;  %v1203_v30 = vrot.slane %v1201_v23, 5  ;;  %v1213_v2 = vrot.slane %v1212_v59, 4  ;;  %v5371_v22 = vld [vmem:[#allocation2 + $0x34] sm:$0x1] }
  0xa4   : > { %v1217_v3 = vrot.slane %v1215_v28, 5  ;;  %v4045_v18 = vrot.slane %v5333_v25, 9  ;;  %v1297_v47 = vrot.slane %v5266_v34, 5  ;;  %v4043_v5 = vrot.slane %v1251_v37, 9  ;;  %v5379_v53 = vld [vmem:[#allocation2 + $0x3c] sm:$0x1] }
  0xa5   : > { %1602 = vrot.lane.b32.xlu0 %v4074_v8, %s4481_s28  ;;  %v1289_v45 = vrot.slane %v5290_v13, 5  ;;  %v4044_v39 = vrot.slane %v1252_v6, 9  ;;  %v1293_v19 = vrot.slane %v5296_v21, 5  ;;  %v1405_v24 = vshrl.u32 %v5345_v46, 16  ;;  %v1319_v8 = vld [vmem:[#allocation2 + $0x4c] sm:$0x1] }
  0xa6   : > { %v1408_v17 = vshll.u32 %v5345_v46, 16  ;;  %v1419_v9 = vshrl.u32 %v5335_v27, 16  ;;  %v1377_v32 = vshrl.u32 %v5337_v55, 16  ;;  %v1380_v20 = vshll.u32 %v5337_v55, 16  ;;  %s4487_s28 = smov 16  }
  0xa7   : > { %v1391_v34 = vshrl.u32 %v5351_v15, 16  ;;  %v1204_v13 = vsel %vm4816_vm8, %v1199_v10, %v1203_v30  ;;  %v1218_v52 = vsel %vm4816_vm8, %v1213_v2, %v1217_v3  ;;  %v1422_v12 = vshll.u32 %v5335_v27, 16 }
  0xa8   : > { %v1394_v54 = vshll.u32 %v5351_v15, 16  ;;  %v1407_v58 = vrot.slane %v1405_v24, 4  ;;  %v1410_v41 = vrot.slane %v1408_v17, 5  ;;  %v1379_v4 = vrot.slane %v1377_v32, 4  ;;  %v5393_v17 = vpop.permute.xlu1 %1510 }
  0xa9   : > { %1620 = vrot.lane.b32.xlu0 %v4077_v44, %s4479_s26  ;;  %v1126_v31 = vld [vmem:[#allocation2 + $0x90] sm:$0xf]  ;;  %v1134_v42 = vld [vmem:[#allocation2 + $0x94] sm:$0x1]  ;;  %v1382_v63 = vrot.slane %v1380_v20, 5  ;;  %v1290_v48 = vsel %vm4712_vm0, %v4043_v5, %v1289_v45  ;;  %v1393_v33 = vrot.slane %v1391_v34, 4  ;;  %v1294_v37 = vsel %vm4712_vm0, %v4044_v39, %v1293_v19 }
  0xaa   : > { %v1234_v21 = vshrl.u32 %v1126_v31, 16  ;;  %v1237_v35 = vshll.u32 %v1126_v31, 16  ;;  %v4082_v36 = vcombine.low %v5242_v11, %v1126_v31  ;;  %v1243_v26 = vshll.u32 %v1134_v42, 16  ;;  %v1254_v38 = vld [vmem:[#allocation2 + $0x90] sm:$0xe] }
  0xab   : > { %v4085_v11 = vcombine.low %v1204_v13, %v1218_v52  ;;  %v1421_v56 = vrot.slane %v1419_v9, 4  ;;  %v1424_v23 = vrot.slane %v1422_v12, 5  ;;  %v1396_v59 = vrot.slane %v1394_v54, 5  ;;  %v1438_v13 = vld [vmem:[#allocation2 + $0x40] sm:$0xe] }
  0xac   : > { %v1236_v14 = vrot.slane %v1234_v21, 4  ;;  %v1239_v61 = vrot.slane %v1237_v35, 5  ;;  %1650 = vrot.lane.b32.xlu1 %v4082_v36, %s4479_s26  ;;  %v1245_v57 = vrot.slane %v1243_v26, 5  ;;  %v4046_v28 = vrot.slane %v1254_v38, 9  ;;  %v1436_v54 = vld [vmem:[#allocation2 + $0x30] sm:$0xe] }
  0xad   : > { %1622 = vrot.lane.b32.xlu0 %v4078_v43, %s4479_s26  ;;  %v1301_v25 = vrot.slane %v1134_v42, 5  ;;  %v1411_v6 = vor.u32 %v1410_v41, %v1407_v58  ;;  %v1414_v44 = vshll.u32 %v5377_v60, 16  ;;  %v1383_v43 = vor.u32 %v1382_v63, %v1379_v4  ;;  %v1437_v21 = vld [vmem:[#allocation2 + $0x38] sm:$0xe]  ;;  %v5413_v58 = vpop.permute.xlu1 %1578  ;;  %s4486_s26 = smov 48  }
  0xae   : > { %v1240_v29 = vor.u32 %v1239_v61, %v1236_v14  ;;  %v1386_v30 = vshll.u32 %v5371_v22, 16  ;;  %v1397_v2 = vor.u32 %v1396_v59, %v1393_v33  ;;  %v1400_v3 = vshll.u32 %v5379_v53, 16 }
  0xaf   : > { %v1298_v5 = vsel %vm4712_vm0, %v4045_v18, %v1297_v47  ;;  %v1302_v39 = vsel %vm4712_vm0, %v4046_v28, %v1301_v25  ;;  %v1425_v19 = vor.u32 %v1424_v23, %v1421_v56  ;;  %v1428_v24 = vshll.u32 %v1319_v8, 16 }
  0xb0   : > { %v1241_v10 = vrot.slane %v1240_v29, 4  ;;  %v4089_v9 = vcombine.low %v1290_v48, %v1294_v37  ;;  %v1412_v32 = vrot.slane %v1411_v6, 4  ;;  %v1416_v20 = vrot.slane %v1414_v44, 5  ;;  %v1509_v48 = vpop.permute.xlu0 %1508 }
  0xb1   : > { %1754 = vrot.lane.b32.xlu0 %v4100_v1, %s4477_s24  ;;  %v1384_v18 = vrot.slane %v1383_v43, 4  ;;  %v1388_v47 = vrot.slane %v1386_v30, 5  ;;  %v1398_v34 = vrot.slane %v1397_v2, 4  ;;  %v1402_v31 = vrot.slane %v1400_v3, 5 }
  0xb2   : > { %v1246_v45 = vsel %vm4816_vm8, %v1241_v10, %v1245_v57  ;;  %v4090_v42 = vcombine.low %v1298_v5, %v1302_v39  ;;  %v1426_v52 = vrot.slane %v1425_v19, 4  ;;  %v1430_v12 = vrot.slane %v1428_v24, 5 }
  0xb3   : > { %v4086_v1 = vcombine.low %v1232_v7, %v1246_v45  ;;  %v4094_v16 = vcombine.low %v5345_v46, %v5335_v27  ;;  %v4093_v62 = vcombine.low %v5337_v55, %v5351_v15  ;;  %v1439_v7 = vld [vmem:[#allocation2 + $0x48] sm:$0xe]  ;;  %v1417_v35 = vsel %vm4816_vm8, %v1412_v32, %v1416_v20  ;;  %v5431_v23 = vpop.permute.xlu1 %1512 }
  0xb4   : > { %v1389_v36 = vsel %vm4816_vm8, %v1384_v18, %v1388_v47  ;;  %v1403_v26 = vsel %vm4816_vm8, %v1398_v34, %v1402_v31  ;;  %v4053_v38 = vrot.slane %v1438_v13, 9  ;;  %v4051_v27 = vrot.slane %v1436_v54, 9  ;;  %v1577_v29 = vpop.permute.xlu0 %1576 }
  0xb5   : > { %1668 = vrot.lane.b32.xlu0 %v4085_v11, %s4482_s29  ;;  %1670 = vrot.lane.b32.xlu1 %v4086_v1, %s4482_s29  ;;  %v1474_v55 = vrot.slane %v5371_v22, 5  ;;  %v4052_v46 = vrot.slane %v1437_v21, 9  ;;  %v1478_v15 = vrot.slane %v5379_v53, 5  ;;  %v1431_v41 = vsel %vm4816_vm8, %v1426_v52, %v1430_v12 }
  0xb6   : > { %v1482_v4 = vrot.slane %v5377_v60, 5  ;;  %v4054_v63 = vrot.slane %v1439_v7, 9  ;;  %v1486_v14 = vrot.slane %v1319_v8, 5  ;;  %v4097_v61 = vcombine.low %v1389_v36, %v1403_v26 }
  0xb7   : > { %v4098_v33 = vcombine.low %v1417_v35, %v1431_v41  ;;  %v1475_v22 = vsel %vm4712_vm0, %v4051_v27, %v1474_v55  ;;  %v1479_v11 = vsel %vm4712_vm0, %v4052_v46, %v1478_v15  ;;  %v5436_v57 = vpop.permute.xlu1 %1646  ;;  %vm6492_vm15 = vcmask 64512  }
  0xb8   : > { %v1483_v56 = vsel %vm4712_vm0, %v4053_v38, %v1482_v4  ;;  %v1487_v60 = vsel %vm4712_vm0, %v4054_v63, %v1486_v14  ;;  %v4101_v59 = vcombine.low %v1475_v22, %v1479_v11  ;;  %v1645_v28 = vpop.permute.xlu0 %1644  ;;  %vm6494_vm1 = vcmask 130048  }
  0xb9   : > { %1688 = vrot.lane.b32.xlu0 %v4089_v9, %s4483_s30  ;;  %1690 = vrot.lane.b32.xlu1 %v4090_v42, %s4483_s30  ;;  %v4102_v53 = vcombine.low %v1483_v56, %v1487_v60  ;;  %vm6495_vm4 = vcmask 195584   ;;  %vm6500_vm5 = vcmask 261120   ;;  %vm6490_vm6 = vcmask 326656  }
  0xba   : > { %vm6501_vm7 = vcmask 392192   ;;  %vm6491_vm9 = vcmask 457728   ;;  %vm6497_vm11 = vcmask 523264   ;;  %vm6493_vm12 = vcmask 588800  }
  0xbb   : > { %vm1837_vm13 = vcmask 654336   ;;  %vm6499_vm14 = vcmask 719872  }
  0xbd   : > { %1716 = vrot.lane.b32.xlu0 %v4093_v62, %s4483_s30  ;;  %1718 = vrot.lane.b32.xlu1 %v4094_v16, %s4483_s30 }
  0xc1   : > { %1736 = vrot.lane.b32.xlu0 %v4097_v61, %s4484_s16  ;;  %1738 = vrot.lane.b32.xlu1 %v4098_v33, %s4484_s16 }
  0xc2   : > { %v1549_v37 = vpop.permute.xlu0 %1548 }
  0xc5   : > { %1756 = vrot.lane.b32.xlu0 %v4101_v59, %s4477_s24  ;;  %1758 = vrot.lane.b32.xlu1 %v4102_v53, %s4477_s24  ;;  %s4485_s24 = smov 32  }
  0xc6   : > { %v5439_v25 = vpop.permute.xlu1 %1514 }
  0xc9   : > { %v1617_v6 = vpop.permute.xlu0 %1616 }
  0xcd   : > { %v1529_v43 = vpop.permute.xlu0 %1528 }
  0xce   : > { %v1763_v45 = vsel %vm6492_vm15, %v1509_v48, %v1529_v43 }
  0xcf   : > { %v1774_v19 = vsel %vm6494_vm1, %v1763_v45, %v1529_v43 }
  0xd0   : > { %v1551_v8 = vpop.permute.xlu1 %1550  ;;  %v1780_v1 = vsel %vm6495_vm4, %v1774_v19, %v1549_v37 }
  0xd1   : > { %v1597_v30 = vpop.permute.xlu0 %1596  ;;  %v1789_v32 = vsel %vm6500_vm5, %v1780_v1, %v1577_v29 }
  0xd2   : > { %v1798_v18 = vsel %vm6490_vm6, %v1789_v32, %v1597_v30  ;;  %vm6498_vm6 = vcmask 785408  }
  0xd3   : > { %v1806_v31 = vsel %vm6501_vm7, %v1798_v18, %v1597_v30 }
  0xd4   : > { %v1812_v42 = vsel %vm6491_vm9, %v1806_v31, %v1617_v6  ;;  %vm6496_vm9 = vcmask 850944  }
  0xd5   : > { %v1821_v12 = vsel %vm6497_vm11, %v1812_v42, %v1645_v28 }
  0xd6   : > { %v1619_v44 = vpop.permute.xlu1 %1618 }
  0xda   : > { %v1531_v10 = vpop.permute.xlu1 %1530 }
  0xdb   : > { %v5441_v3 = vpop.permute.xlu0 %1532  ;;  %v1766_v54 = vsel %vm6492_vm15, %v5393_v17, %v1531_v10  ;;  %vm1869_vm15 = vcmask 916480  }
  0xdc   : > { %v1775_v62 = vsel %vm6494_vm1, %v1766_v54, %v1531_v10  ;;  %vm6522_vm1 = vcmask 326656  }
  0xdd   : > { %v1782_v27 = vsel %vm6495_vm4, %v1775_v62, %v1551_v8  ;;  %vm6523_vm4 = vcmask 457728  }
  0xde   : > { %v1599_v2 = vpop.permute.xlu1 %1598  ;;  %v1791_v55 = vsel %vm6500_vm5, %v1782_v27, %v5413_v58 }
  0xdf   : > { %v1665_v39 = vpop.permute.xlu0 %1664  ;;  %v1800_v63 = vsel %vm6522_vm1, %v1791_v55, %v1599_v2  ;;  %vm6525_vm1 = vcmask 850944  }
  0xe0   : > { %v1830_v21 = vsel %vm6493_vm12, %v1821_v12, %v1665_v39  ;;  %vm1874_vm12 = vcmask 982016   ;;  %v1807_v14 = vsel %vm6501_vm7, %v1800_v63, %v1599_v2  ;;  %v2052_v63 = vld [vmem:[#allocation3 + $0x1c] sm:$0x1] }
  0xe1   : > { %v1838_v7 = vsel %vm1837_vm13, %v1830_v21, %v1665_v39  ;;  %v1814_v48 = vsel %vm6523_vm4, %v1807_v14, %v1619_v44  ;;  %vm6526_vm4 = vcmask 64512  }
  0xe2   : > { %v1667_v5 = vpop.permute.xlu1 %1666  ;;  %v1823_v33 = vsel %vm6497_vm11, %v1814_v48, %v5436_v57  ;;  %v1769_v37 = vsel %vm6526_vm4, %v5431_v23, %v5441_v3  ;;  %vm6527_vm11 = vmmov %vm6526_vm4  ;;  %v2022_v48 = vld [vmem:[#allocation3 + $0x8] sm:$0x1] }
  0xe6   : > { %v1685_v24 = vpop.permute.xlu1 %1684 }
  0xe7   : > { %v1844_v36 = vsel %vm6499_vm14, %v1838_v7, %v1685_v24 }
  0xf1   : > { %v1535_v9 = vpop.permute.xlu0 %1534 }
  0xf2   : > { %v1772_v57 = vsel %vm6527_vm11, %v5439_v25, %v1535_v9 }
  0xf4   : > { %v1581_v20 = vpop.permute.xlu1 %1580 }
  0xf5   : > { %v1553_v47 = vpop.permute.xlu0 %1552 }
  0xf8   : > { %v1713_v34 = vpop.permute.xlu1 %1712 }
  0xf9   : > { %v1555_v13 = vpop.permute.xlu0 %1554  ;;  %v1853_v26 = vsel %vm6498_vm6, %v1844_v36, %v1713_v34 }
  0xfd   : > { %v1687_v35 = vpop.permute.xlu0 %1686 }
  0xff   : > { %v1601_v52 = vpop.permute.xlu1 %1600 }
 0x103   : > { %v1733_v16 = vpop.permute.xlu1 %1732  ;;  %v1583_v46 = vpop.permute.xlu0 %1582 }
 0x104   : > { %v1862_v17 = vsel %vm6496_vm9, %v1853_v26, %v1733_v16  ;;  %vm6524_vm9 = vcmask 588800  }
 0x105   : > { %v1870_v15 = vsel %vm1869_vm15, %v1862_v17, %v1733_v16  ;;  %v1832_v58 = vsel %vm6524_vm9, %v1823_v33, %v1667_v5  ;;  %vm6528_vm9 = vcmask 130048   ;;  %v2046_v33 = vld [vmem:[#allocation3 + $0xc] sm:$0x1] }
 0x106   : > { %v1839_v60 = vsel %vm1837_vm13, %v1832_v58, %v1667_v5  ;;  %v1776_v10 = vsel %vm6528_vm9, %v1769_v37, %v5441_v3  ;;  %v2047_v58 = vsel %vm4668_vm2, 0, %v2046_v33 }
 0x107   : > { %v1735_v38 = vpop.permute.xlu1 %1734  ;;  %v1715_v61 = vpop.permute.xlu0 %1714  ;;  %v1846_v59 = vsel %vm6499_vm14, %v1839_v60, %v1687_v35  ;;  %vm6532_vm14 = vcmask 326656   ;;  %2048 = vst [vmem:[#allocation3 + $0xc] sm:$0x1] %v2047_v58 }
 0x108   : > { %v1855_v53 = vsel %vm6498_vm6, %v1846_v59, %v1715_v61  ;;  %vm6529_vm6 = vmmov %vm6528_vm9  ;;  %vm6535_vm9 = vcmask 523264   ;;  %v2053_v61 = vsel %vm4668_vm2, 0, %v2052_v63 }
 0x109   : > { %v1864_v28 = vsel %vm6525_vm1, %v1855_v53, %v1735_v38  ;;  %v1777_v30 = vsel %vm6529_vm6, %v1772_v57, %v1535_v9  ;;  %vm6530_vm1 = vcmask 195584   ;;  %vm6533_vm11 = vmmov %vm6532_vm14  ;;  %vm6534_vm6 = vcmask 457728   ;;  %2054 = vst [vmem:[#allocation3 + $0x1c] sm:$0x1] %v2053_v61  ;;  %v2025_v53 = vld [vmem:[#allocation3 + $0x10] sm:$0x1] }
 0x10a   : > { %v1871_v6 = vsel %vm1869_vm15, %v1864_v28, %v1735_v38  ;;  %v1784_v2 = vsel %vm6530_vm1, %v1776_v10, %v1553_v47  ;;  %vm6531_vm4 = vmmov %vm6530_vm1  ;;  %v2026_v28 = vsel %vm4527_vm3, 0, %v2025_v53  ;;  %v2064_v57 = vld [vmem:[#allocation3 + $0x3c] sm:$0x1]  ;;  %v2058_v10 = vld [vmem:[#allocation3 + $0x2c] sm:$0x1] }
 0x10b   : > { %v1753_v41 = vpop.permute.xlu1 %1752  ;;  %v1793_v5 = vsel %vm6500_vm5, %v1784_v2, %v1581_v20  ;;  %v1786_v23 = vsel %vm6531_vm4, %v1777_v30, %v1555_v13  ;;  %vm6536_vm1 = vmmov %vm6534_vm6  ;;  %2027 = vst [vmem:[#allocation3 + $0x10] sm:$0x1] %v2026_v28  ;;  %v2059_v2 = vsel %vm4668_vm2, 0, %v2058_v10 }
 0x10c   : > { %v1876_v4 = vsel %vm1874_vm12, %v1870_v15, %v1753_v41  ;;  %v1802_v25 = vsel %vm6532_vm14, %v1793_v5, %v1601_v52  ;;  %v1795_v39 = vsel %vm6500_vm5, %v1786_v23, %v1583_v46  ;;  %vm6537_vm4 = vmmov %vm6535_vm9  ;;  %vm6538_vm14 = vcmask 588800   ;;  %v2043_v5 = vld [vmem:[#allocation3 + $0x40] sm:$0x1]  ;;  %v2067_v23 = vld [vmem:[#allocation3 + $0x44] sm:$0x1] }
 0x10d   : > { %4323 = vmatprep.mubr.bf16.mxu0 %v1876_v4  ;;  %v1808_v1 = vsel %vm6501_vm7, %v1802_v25, %v1601_v52  ;;  %vm6539_vm5 = vmmov %vm6538_vm14  ;;  %v2028_v4 = vld [vmem:[#allocation3 + $0x18] sm:$0x1]  ;;  %2060 = vst [vmem:[#allocation3 + $0x2c] sm:$0x1] %v2059_v2  ;;  %v2068_v25 = vsel %vm4668_vm2, 0, %v2067_v23 }
 0x10e   : > { %v2029_v14 = vsel %vm4527_vm3, 0, %v2028_v4  ;;  %2069 = vst [vmem:[#allocation3 + $0x44] sm:$0x1] %v2068_v25  ;;  %v5558_v23 = vld [vmem:[#allocation3 + $0x4] sm:$0x1] }
 0x10f   : > { %v1649_v56 = vpop.permute.xlu1 %1648  ;;  %2030 = vst [vmem:[#allocation3 + $0x18] sm:$0x1] %v2029_v14 }
 0x117   : > { %v1603_v22 = vpop.permute.xlu0 %1602 }
 0x118   : > { %v1804_v24 = vsel %vm6533_vm11, %v1795_v39, %v1603_v22  ;;  %vm6540_vm11 = vcmask 719872   ;;  %v2037_v39 = vld [vmem:[#allocation3 + $0x30] sm:$0x1] }
 0x119   : > { %v1809_v32 = vsel %vm6501_vm7, %v1804_v24, %v1603_v22  ;;  %vm6542_vm7 = vcmask 785408   ;;  %v2023_v22 = vsel %vm4527_vm3, 0, %v2022_v48  ;;  %v2038_v24 = vsel %vm4527_vm3, 0, %v2037_v39 }
 0x11a   : > { %2024 = vst [vmem:[#allocation3 + $0x8] sm:$0x1] %v2023_v22  ;;  %2039 = vst [vmem:[#allocation3 + $0x30] sm:$0x1] %v2038_v24  ;;  %v2264_v39 = vshll.u32 %v5558_v23, 16 }
 0x11b   : > { %v1621_v11 = vpop.permute.xlu0 %1620 }
 0x11c   : > { %v1816_v9 = vsel %vm6534_vm6, %v1808_v1, %v1621_v11  ;;  %vm6541_vm6 = vmmov %vm6540_vm11  ;;  %v2031_v11 = vld [vmem:[#allocation3 + $0x20] sm:$0x1] }
 0x11d   : > { %v1825_v20 = vsel %vm6535_vm9, %v1816_v9, %v1649_v56  ;;  %vm6543_vm9 = vmmov %vm6542_vm7  ;;  %v2055_v56 = vld [vmem:[#allocation3 + $0x24] sm:$0x1]  ;;  %v2032_v60 = vsel %vm4527_vm3, 0, %v2031_v11 }
 0x11e   : > { %v1651_v8 = vpop.permute.xlu1 %1650  ;;  %v2056_v59 = vsel %vm4668_vm2, 0, %v2055_v56  ;;  %2033 = vst [vmem:[#allocation3 + $0x20] sm:$0x1] %v2032_v60 }
 0x11f   : > { %v1623_v29 = vpop.permute.xlu0 %1622  ;;  %2057 = vst [vmem:[#allocation3 + $0x24] sm:$0x1] %v2056_v59 }
 0x120   : > { %v1818_v47 = vsel %vm6536_vm1, %v1809_v32, %v1623_v29  ;;  %vm6544_vm1 = vcmask 850944   ;;  %v2049_v29 = vld [vmem:[#allocation3 + $0x14] sm:$0x1] }
 0x121   : > { %v1827_v34 = vsel %vm6537_vm4, %v1818_v47, %v1651_v8  ;;  %vm6545_vm4 = vmmov %vm6544_vm1  ;;  %v2050_v37 = vsel %vm4668_vm2, 0, %v2049_v29  ;;  %v2040_v8 = vld [vmem:[#allocation3 + $0x38] sm:$0x1]  ;;  %v2196_v29 = vld [vmem:[#allocation3 + $0x10] sm:$0xf] }
 0x122   : > { %2051 = vst [vmem:[#allocation3 + $0x14] sm:$0x1] %v2050_v37 }
 0x123   : > { %v1755_v44 = vpop.permute.xlu0 %1754 }
 0x124   : > { %v1879_v43 = vsel %vm1874_vm12, %v1871_v6, %v1755_v44  ;;  %v2041_v6 = vsel %vm4527_vm3, 0, %v2040_v8  ;;  %v2065_v44 = vsel %vm4668_vm2, 0, %v2064_v57 }
 0x125   : > { %4324 = vmatmul.mubr.bf16.vlgmr.msra.gmra.mrb[0].mxu0 %v1879_v43  ;;  %2042 = vst [vmem:[#allocation3 + $0x38] sm:$0x1] %v2041_v6  ;;  %2066 = vst [vmem:[#allocation3 + $0x3c] sm:$0x1] %v2065_v44  ;;  %v2034_v43 = vld [vmem:[#allocation3 + $0x28] sm:$0x1] }
 0x126   : > { %v2035_v30 = vsel %vm4527_vm3, 0, %v2034_v43  ;;  %v2208_v61 = vld [vmem:[#allocation3 + $0x20] sm:$0xf]  ;;  %v2211_v22 = vld [vmem:[#allocation3 + $0x24] sm:$0x1] }
 0x127   : > { %v1669_v45 = vpop.permute.xlu0 %1668  ;;  %v1671_v19 = vpop.permute.xlu1 %1670  ;;  %2036 = vst [vmem:[#allocation3 + $0x28] sm:$0x1] %v2035_v30 }
 0x128   : > { %v1834_v31 = vsel %vm6538_vm14, %v1825_v20, %v1669_v45  ;;  %v1836_v42 = vsel %vm6539_vm5, %v1827_v34, %v1671_v19 }
 0x129   : > { %v1840_v52 = vsel %vm1837_vm13, %v1834_v31, %v1669_v45  ;;  %v1841_v54 = vsel %vm1837_vm13, %v1836_v42, %v1671_v19  ;;  %v2044_v45 = vsel %vm4527_vm3, 0, %v2043_v5  ;;  %v2061_v19 = vld [vmem:[#allocation3 + $0x34] sm:$0x1] }
 0x12a   : > { %2045 = vst [vmem:[#allocation3 + $0x40] sm:$0x1] %v2044_v45  ;;  %v2062_v1 = vsel %vm4668_vm2, 0, %v2061_v19  ;;  %v2199_v28 = vld [vmem:[#allocation3 + $0x14] sm:$0x1]  ;;  %vm6548_vm2 = vcmask 392192  }
 0x12b   : > { %v1689_v3 = vpop.permute.xlu0 %1688  ;;  %v1691_v18 = vpop.permute.xlu1 %1690  ;;  %2063 = vst [vmem:[#allocation3 + $0x34] sm:$0x1] %v2062_v1  ;;  %v5560_v45 = vld [vmem:[#allocation3] sm:$0xe]  ;;  %vm6552_vm5 = vmmov %vm6548_vm2 }
 0x12c   : > { %v1848_v21 = vsel %vm6540_vm11, %v1840_v52, %v1689_v3  ;;  %v1850_v16 = vsel %vm6541_vm6, %v1841_v54, %v1691_v18  ;;  %vm6556_vm14 = vmmov %vm6548_vm2 }
 0x12f   : > { %v1717_v13 = vpop.permute.xlu0 %1716  ;;  %v1719_v12 = vpop.permute.xlu1 %1718 }
 0x130   : > { %v1857_v62 = vsel %vm6542_vm7, %v1848_v21, %v1717_v13  ;;  %v1859_v35 = vsel %vm6543_vm9, %v1850_v16, %v1719_v12  ;;  %v2238_v12 = vld [vmem:[#allocation3] sm:$0xf]  ;;  %v2202_v21 = vld [vmem:[#allocation3 + $0x18] sm:$0xf]  ;;  %v2205_v16 = vld [vmem:[#allocation3 + $0x1c] sm:$0x1] }
 0x133   : > { %v1737_v7 = vpop.permute.xlu0 %1736  ;;  %v1739_v36 = vpop.permute.xlu1 %1738 }
 0x134   : > { %v1866_v26 = vsel %vm6544_vm1, %v1857_v62, %v1737_v7  ;;  %v1868_v38 = vsel %vm6545_vm4, %v1859_v35, %v1739_v36  ;;  %vm6561_vm4 = vmmov %vm6548_vm2 }
 0x135   : > { %v1872_v27 = vsel %vm1869_vm15, %v1866_v26, %v1737_v7  ;;  %v1873_v55 = vsel %vm1869_vm15, %v1868_v38, %v1739_v36  ;;  %v2190_v36 = vld [vmem:[#allocation3 + $0x8] sm:$0xf]  ;;  %v2255_v38 = vshrl.u32 %v2238_v12, 16 }
 0x137   : > { %v1757_v17 = vpop.permute.xlu0 %1756  ;;  %v1759_v46 = vpop.permute.xlu1 %1758  ;;  %v2257_v2 = vrot.slane %v2255_v38, 4 }
 0x138   : > { %v1882_v15 = vsel %vm1874_vm12, %v1872_v27, %v1757_v17  ;;  %v1885_v41 = vsel %vm1874_vm12, %v1873_v55, %v1759_v46  ;;  %v2193_v55 = vld [vmem:[#allocation3 + $0xc] sm:$0x1] }
 0x139   : > { %4327 = vmatprep.mubr.bf16.mxu0 %v1882_v15  ;;  %v2258_v15 = vshll.u32 %v2238_v12, 16 }
 0x13a   : > { %4328 = vmatmul.mubr.bf16.gmra.mrb[4].mxu0 %v1885_v41 }
 0x13b   : > { %v2260_v5 = vrot.slane %v2258_v15, 5 }
 0x13d   : > { %v2261_v25 = vor.u32 %v2260_v5, %v2257_v2 }
 0x1f8   : > { %v4325_v3 = vpop.f32.mrb[0].mxu0 }
 0x1f9   : > { %v2072_v32 = vmax.f32 %v4325_v3, 0.0  ;;  %v1985_v9 = vpop.f32.mrb[1].mxu0 }
 0x1fa   : > { %v2070_v18 = vmax.f32 %v1985_v9, 0.0  ;;  %v4326_v20 = vpop.f32.mrb[2].mxu0 }
 0x1fb   : > { %v4257_v47 = vpack.c.bf16 %v2072_v32, %v2072_v32  ;;  %v2073_v34 = vmax.f32 %v4326_v20, 0.0  ;;  %v1988_v31 = vpop.f32.mrb[3].mxu0  ;;  %v2392_v20 = vrot.slane %v5558_v23, 5 }
 0x1fc   : > { %v4255_v42 = vpack.c.bf16 %v2070_v18, %v2070_v18  ;;  %v2071_v13 = vmax.f32 %v1988_v31, 0.0  ;;  %v4119_v18 = vrot.slane %v5560_v45, 9 }
 0x1fd   : > { %v2127_v52 = vshrl.u32 %v4257_v47, 16  ;;  %v4258_v54 = vpack.c.bf16 %v2073_v34, %v2073_v34  ;;  %v2130_v35 = vshll.u32 %v4257_v47, 16 }
 0x1fe   : > { %v2111_v62 = vshrl.u32 %v4255_v42, 16  ;;  %v4256_v51 = vpack.c.bf16 %v2071_v13, %v2071_v13  ;;  %v2114_v17 = vshll.u32 %v4255_v42, 16 }
 0x1ff   : > { %v2129_v7 = vrot.slane %v2127_v52, 7  ;;  %v2135_v26 = vshrl.u32 %v4258_v54, 16  ;;  %v2138_v14 = vshll.u32 %v4258_v54, 16  ;;  %v5579_v54 = vrot.slane %v2261_v25, 4 }
 0x200   : > { %v2113_v27 = vrot.slane %v2111_v62, 7  ;;  %v2119_v46 = vshrl.u32 %v4256_v51, 16  ;;  %v2122_v11 = vshll.u32 %v4256_v51, 16 }
 0x201   : > { %v2132_v41 = vor.u32 %v2130_v35, %v2129_v7  ;;  %v2133_v4 = vrot.slane %v2129_v7, 4  ;;  %v2137_v63 = vrot.slane %v2135_v26, 7 }
 0x202   : > { %v2116_v48 = vor.u32 %v2114_v17, %v2113_v27  ;;  %v2117_v33 = vrot.slane %v2113_v27, 4  ;;  %v2121_v58 = vrot.slane %v2119_v46, 7  ;;  %v2226_v27 = vld [vmem:[#allocation3 + $0x38] sm:$0xf]  ;;  %v2229_v17 = vld [vmem:[#allocation3 + $0x3c] sm:$0x1] }
 0x203   : > { %v2203_v56 = vsel %vm4580_vm10, %v2132_v41, %v2202_v21  ;;  %v2206_v60 = vsel %vm4527_vm3, %v2133_v4, %v2205_v16  ;;  %v2140_v59 = vor.u32 %v2138_v14, %v2137_v63  ;;  %v2141_v53 = vrot.slane %v2137_v63, 4  ;;  %v2214_v14 = vld [vmem:[#allocation3 + $0x28] sm:$0xf] }
 0x204   : > { %2204 = vst [vmem:[#allocation3 + $0x18] sm:$0xf] %v2203_v56  ;;  %2207 = vst [vmem:[#allocation3 + $0x1c] sm:$0x1] %v2206_v60  ;;  %v2191_v37 = vsel %vm4580_vm10, %v2116_v48, %v2190_v36  ;;  %v2194_v8 = vsel %vm4527_vm3, %v2117_v33, %v2193_v55  ;;  %v2124_v57 = vor.u32 %v2122_v11, %v2121_v58  ;;  %v2125_v6 = vrot.slane %v2121_v58, 4 }
 0x205   : > { %2192 = vst [vmem:[#allocation3 + $0x8] sm:$0xf] %v2191_v37  ;;  %2195 = vst [vmem:[#allocation3 + $0xc] sm:$0x1] %v2194_v8  ;;  %v2209_v44 = vsel %vm4580_vm10, %v2140_v59, %v2208_v61  ;;  %v2212_v43 = vsel %vm4527_vm3, %v2141_v53, %v2211_v22  ;;  %v5581_v21 = vrot.slane %v2264_v39, 5 }
 0x206   : > { %2210 = vst [vmem:[#allocation3 + $0x20] sm:$0xf] %v2209_v44  ;;  %2213 = vst [vmem:[#allocation3 + $0x24] sm:$0x1] %v2212_v43  ;;  %v2197_v10 = vsel %vm4580_vm10, %v2124_v57, %v2196_v29  ;;  %v2200_v30 = vsel %vm4527_vm3, %v2125_v6, %v2199_v28  ;;  %v2217_v11 = vld [vmem:[#allocation3 + $0x2c] sm:$0x1] }
 0x207   : > { %2198 = vst [vmem:[#allocation3 + $0x10] sm:$0xf] %v2197_v10  ;;  %2201 = vst [vmem:[#allocation3 + $0x14] sm:$0x1] %v2200_v30  ;;  %v2232_v28 = vld [vmem:[#allocation3 + $0x40] sm:$0xf] }
 0x208   : > { %v2235_v6 = vld [vmem:[#allocation3 + $0x44] sm:$0x1]  ;;  %v2220_v39 = vld [vmem:[#allocation3 + $0x30] sm:$0xf] }
 0x20b   : > { %v5563_v24 = vld [vmem:[#allocation3 + $0x18] sm:$0xf]  ;;  %v5596_v10 = vld [vmem:[#allocation3 + $0x1c] sm:$0x1] }
 0x20c   : > { %v5573_v31 = vld [vmem:[#allocation3 + $0x8] sm:$0xf]  ;;  %v5575_v42 = vld [vmem:[#allocation3 + $0x18] sm:$0xe]  ;;  %v2467_v62 = vshrl.u32 %v5563_v24, 16  ;;  %v2470_v51 = vshll.u32 %v5563_v24, 16 }
 0x20d   : > { %v4329_v19 = vpop.f32.mrb[4].mxu0  ;;  %v5565_v1 = vld [vmem:[#allocation3 + $0x20] sm:$0xf]  ;;  %v2439_v26 = vshrl.u32 %v5573_v31, 16  ;;  %v4129_v38 = vrot.slane %v5575_v42, 9  ;;  %v2442_v41 = vshll.u32 %v5573_v31, 16 }
 0x20e   : > { %v2076_v3 = vmax.f32 %v4329_v19, 0.0  ;;  %v2001_v32 = vpop.f32.mrb[5].mxu0  ;;  %v5569_v9 = vcombine.low %v5563_v24, %v5565_v1  ;;  %v2481_v46 = vshrl.u32 %v5565_v1, 16  ;;  %v2484_v48 = vshll.u32 %v5565_v1, 16  ;;  %v5590_v33 = vld [vmem:[#allocation3 + $0x10] sm:$0xf] }
 0x20f   : > { %v2074_v47 = vmax.f32 %v2001_v32, 0.0  ;;  %v4330_v34 = vpop.f32.mrb[6].mxu0  ;;  %v5594_v43 = vcombine.low %v5573_v31, %v5590_v33  ;;  %v2223_v19 = vld [vmem:[#allocation3 + $0x34] sm:$0x1]  ;;  %v5627_v49 = vld [vmem:[#allocation3 + $0x1c] sm:$0x1] }
 0x210   : > { %v4261_v13 = vpack.c.bf16 %v2076_v3, %v2076_v3  ;;  %v2077_v12 = vmax.f32 %v4330_v34, 0.0  ;;  %2853 = vrot.lane.b32.xlu1 %v5569_v9, %s4485_s24  ;;  %v2004_v52 = vpop.f32.mrb[7].mxu0  ;;  %v2453_v0 = vshrl.u32 %v5590_v33, 16  ;;  %v2550_v23 = vld [vmem:[#allocation3 + $0x8] sm:$0xe] }
 0x211   : > { %v4259_v16 = vpack.c.bf16 %v2074_v47, %v2074_v47  ;;  %v2075_v7 = vmax.f32 %v2004_v52, 0.0  ;;  %2851 = vrot.lane.b32.xlu0 %v5594_v43, %s4485_s24  ;;  %v2553_v47 = vld [vmem:[#allocation3 + $0x20] sm:$0xe]  ;;  %v5612_v52 = vld [vmem:[#allocation3 + $0x24] sm:$0x1] }
 0x212   : > { %v2159_v35 = vshrl.u32 %v4261_v13, 16  ;;  %v4262_v36 = vpack.c.bf16 %v2077_v12, %v2077_v12  ;;  %v2162_v63 = vshll.u32 %v4261_v13, 16  ;;  %v2469_v12 = vrot.slane %v2467_v62, 4  ;;  %v2551_v42 = vld [vmem:[#allocation3 + $0x10] sm:$0xe] }
 0x213   : > { %v2143_v55 = vshrl.u32 %v4259_v16, 16  ;;  %v4260_v15 = vpack.c.bf16 %v2075_v7, %v2075_v7  ;;  %v2146_v58 = vshll.u32 %v4259_v16, 16  ;;  %v2584_v16 = vrot.slane %v5596_v10, 5 }
 0x214   : > { %v2161_v4 = vrot.slane %v2159_v35, 7  ;;  %v2167_v61 = vshrl.u32 %v4262_v36, 16  ;;  %v2170_v56 = vshll.u32 %v4262_v36, 16  ;;  %v2472_v7 = vrot.slane %v2470_v51, 5 }
 0x215   : > { %v2145_v22 = vrot.slane %v2143_v55, 7  ;;  %v2151_v60 = vshrl.u32 %v4260_v15, 16  ;;  %v2154_v37 = vshll.u32 %v4260_v15, 16  ;;  %v2483_v35 = vrot.slane %v2481_v46, 4  ;;  %v5621_v15 = vld [vmem:[#allocation3 + $0x18] sm:$0xf] }
 0x216   : > { %v2164_v59 = vor.u32 %v2162_v63, %v2161_v4  ;;  %v2165_v53 = vrot.slane %v2161_v4, 4  ;;  %v2169_v29 = vrot.slane %v2167_v61, 7  ;;  %v2486_v55 = vrot.slane %v2484_v48, 5  ;;  %v2368_v4 = vld [vmem:[#allocation3 + $0x10] sm:$0xe] }
 0x217   : > { %v2148_v8 = vor.u32 %v2146_v58, %v2145_v22  ;;  %v2149_v57 = vrot.slane %v2145_v22, 4  ;;  %v2153_v44 = vrot.slane %v2151_v60, 7  ;;  %v4130_v62 = vrot.slane %v2553_v47, 9  ;;  %v5625_v46 = vld [vmem:[#allocation3 + $0x14] sm:$0x1] }
 0x218   : > { %v2227_v30 = vsel %vm4580_vm10, %v2164_v59, %v2226_v27  ;;  %v2230_v2 = vsel %vm4527_vm3, %v2165_v53, %v2229_v17  ;;  %v2172_v5 = vor.u32 %v2170_v56, %v2169_v29  ;;  %v2173_v25 = vrot.slane %v2169_v29, 4  ;;  %v5619_v17 = vld [vmem:[#allocation3 + $0x10] sm:$0xf]  ;;  %v2369_v48 = vld [vmem:[#allocation3 + $0x18] sm:$0xe] }
 0x219   : > { %2228 = vst [vmem:[#allocation3 + $0x38] sm:$0xf] %v2227_v30  ;;  %2231 = vst [vmem:[#allocation3 + $0x3c] sm:$0x1] %v2230_v2  ;;  %v2215_v24 = vsel %vm4580_vm10, %v2148_v8, %v2214_v14  ;;  %v2218_v1 = vsel %vm4527_vm3, %v2149_v57, %v2217_v11  ;;  %v2156_v3 = vor.u32 %v2154_v37, %v2153_v44  ;;  %v2157_v32 = vrot.slane %v2153_v44, 4 }
 0x21a   : > { %2216 = vst [vmem:[#allocation3 + $0x28] sm:$0xf] %v2215_v24  ;;  %2219 = vst [vmem:[#allocation3 + $0x2c] sm:$0x1] %v2218_v1  ;;  %v2233_v34 = vsel %vm4580_vm10, %v2172_v5, %v2232_v28  ;;  %v2236_v13 = vsel %vm4527_vm3, %v2173_v25, %v2235_v6  ;;  %v2476_v63 = vshll.u32 %v5596_v10, 16  ;;  %v2588_v51 = vrot.slane %v5612_v52, 5 }
 0x21b   : > { %2234 = vst [vmem:[#allocation3 + $0x40] sm:$0xf] %v2233_v34  ;;  %2237 = vst [vmem:[#allocation3 + $0x44] sm:$0x1] %v2236_v13  ;;  %v2221_v36 = vsel %vm4580_vm10, %v2156_v3, %v2220_v39  ;;  %v2224_v27 = vsel %vm4527_vm3, %v2157_v32, %v2223_v19  ;;  %v2456_v14 = vshll.u32 %v5590_v33, 16  ;;  %v4191_v61 = vcombine.low %v5619_v17, %v5621_v15 }
 0x21c   : > { %2222 = vst [vmem:[#allocation3 + $0x30] sm:$0xf] %v2221_v36  ;;  %2225 = vst [vmem:[#allocation3 + $0x34] sm:$0x1] %v2224_v27  ;;  %v2367_v22 = vld [vmem:[#allocation3 + $0x8] sm:$0xe]  ;;  %v2393_v58 = vsel %vm4712_vm0, %v4119_v18, %v2392_v20  ;;  %v2585_v33 = vsel %vm4712_vm0, %v4129_v38, %v2584_v16  ;;  %v2589_v56 = vsel %vm4712_vm0, %v4130_v62, %v2588_v51 }
 0x21d   : > { %v2441_v11 = vrot.slane %v2439_v26, 4  ;;  %v4121_v60 = vrot.slane %v2368_v4, 9  ;;  %v5647_v59 = vld [vmem:[#allocation3 + $0xc] sm:$0x1]  ;;  %v2473_v53 = vor.u32 %v2472_v7, %v2469_v12  ;;  %v2487_v45 = vor.u32 %v2486_v55, %v2483_v35  ;;  %3326 = vrot.lane.b32.xlu0 %v4191_v61, %s4485_s24  ;;  %v4447_v16 = vld [vmem:[%s6486_s2] sm:$0xff]  }
 0x21e   : > { %v2444_v18 = vrot.slane %v2442_v41, 5  ;;  %v4172_v20 = vcombine.low %v2585_v33, %v2589_v56  ;;  %v5652_v26 = vld [vmem:[#allocation3 + $0xc] sm:$0x1]  ;;  %v2400_v38 = vrot.slane %v5625_v46, 5  ;;  %v4122_v29 = vrot.slane %v2369_v48, 9  ;;  %4331 = vmatprep.subr.bf16.mxu1 %v4447_v16 }
 0x21f   : > { %v2404_v28 = vrot.slane %v5627_v49, 5  ;;  %v4120_v37 = vrot.slane %v2367_v22, 9  ;;  %v2455_v8 = vrot.slane %v2453_v0, 4  ;;  %v2458_v57 = vrot.slane %v2456_v14, 5  ;;  %v5658_v41 = vld [vmem:[#allocation3 + $0x14] sm:$0x1]  ;;  %4332 = vmatpush3.bf16.msra.mxu1 %v4447_v16 }
 0x220   : > { %3106 = vrot.lane.b32.xlu1 %v4172_v20, %s4486_s26  ;;  %v2396_v31 = vrot.slane %v5647_v59, 5  ;;  %v4127_v6 = vrot.slane %v2550_v23, 9  ;;  %v2401_v44 = vsel %vm4712_vm0, %v4121_v60, %v2400_v38  ;;  %v2576_v30 = vrot.slane %v5652_v26, 5  ;;  %v2428_v12 = vld [vmem:[#allocation3 + $0x38] sm:$0xf] }
 0x221   : > { %v2405_v10 = vsel %vm4712_vm0, %v4122_v29, %v2404_v28  ;;  %v4128_v2 = vrot.slane %v2551_v42, 9  ;;  %v2445_v5 = vor.u32 %v2444_v18, %v2441_v11  ;;  %v2490_v25 = vshll.u32 %v5612_v52, 16  ;;  %v5690_v55 = vld [vmem:[#allocation3 + $0x8] sm:$0xf]  ;;  %v2609_v61 = vld [vmem:[#allocation3 + $0x20] sm:$0xf] }
 0x222   : > { %v4168_v39 = vcombine.low %v2401_v44, %v2405_v10  ;;  %v2397_v19 = vsel %vm4712_vm0, %v4120_v37, %v2396_v31  ;;  %v2624_v24 = vshrl.u32 %v5619_v17, 16  ;;  %v2627_v1 = vshll.u32 %v5619_v17, 16  ;;  %v2429_v17 = vld [vmem:[#allocation3 + $0x40] sm:$0xf]  ;;  %v2610_v18 = vld [vmem:[#allocation3 + $0x28] sm:$0xf] }
 0x223   : > { %v4167_v3 = vcombine.low %v2393_v58, %v2397_v19  ;;  %v2580_v32 = vrot.slane %v5658_v41, 5  ;;  %v5671_v47 = vrot.slane %v2473_v53, 4  ;;  %v5673_v34 = vrot.slane %v2487_v45, 4  ;;  %v4449_v45 = vld [vmem:[%s6486_s2 + $0x8] sm:$0xff]   ;;  %v5726_v44 = vld [vmem:[#allocation3 + $0x10] sm:$0xf] }
 0x224   : > { %v2459_v13 = vor.u32 %v2458_v57, %v2455_v8  ;;  %3078 = vrot.lane.b32.xlu1 %v4168_v39, %s4487_s28  ;;  %v2267_v52 = vsel %vm4816_vm8, %v5579_v54, %v5581_v21  ;;  %v2638_v7 = vshrl.u32 %v5621_v15, 16  ;;  %v2641_v35 = vshll.u32 %v5621_v15, 16  ;;  %4333 = vmatprep.subr.bf16.mxu1 %v4449_v45 }
 0x225   : > { %3076 = vrot.lane.b32.xlu0 %v4167_v3, %s4487_s28  ;;  %v2577_v36 = vsel %vm4712_vm0, %v4127_v6, %v2576_v30  ;;  %v2581_v27 = vsel %vm4712_vm0, %v4128_v2, %v2580_v32  ;;  %v5692_v62 = vrot.slane %v2445_v5, 4  ;;  %v2478_v4 = vrot.slane %v2476_v63, 5  ;;  %4334 = vmatpush3.bf16.msra.mxu1 %v4449_v45  ;;  %v5776_v45 = vld [vmem:[#allocation3 + $0x1c] sm:$0x1] }
 0x226   : > { %v2492_v51 = vrot.slane %v2490_v25, 5  ;;  %v4171_v0 = vcombine.low %v2577_v36, %v2581_v27  ;;  %v5694_v14 = vrot.slane %v2624_v24, 4  ;;  %v5696_v15 = vrot.slane %v2627_v1, 5  ;;  %v5732_v25 = vld [vmem:[#allocation3 + $0x18] sm:$0xf] }
 0x227   : > { %v2523_v48 = vshrl.u32 %v2428_v12, 16  ;;  %v2526_v22 = vshll.u32 %v2428_v12, 16  ;;  %v2448_v58 = vshll.u32 %v5652_v26, 16  ;;  %v5700_v11 = vcombine.low %v2428_v12, %v2429_v17 }
 0x228   : > { %3540 = vrot.lane.b32.xlu1 %v4171_v0, %s4487_s28  ;;  %v2269_v33 = vshrl.u32 %v5690_v55, 16  ;;  %v2272_v63 = vshll.u32 %v5690_v55, 16  ;;  %v5704_v56 = vrot.slane %v2459_v13, 4  ;;  %v5706_v60 = vrot.slane %v2638_v7, 4 }
 0x229   : > { %v5708_v23 = vrot.slane %v2641_v35, 5  ;;  %v2462_v53 = vshll.u32 %v5658_v41, 16  ;;  %3542 = vrot.lane.b32.xlu0 %v4172_v20, %s4487_s28  ;;  %v2652_v26 = vshrl.u32 %v2609_v61, 16  ;;  %v2278_v29 = vshll.u32 %v5647_v59, 16  ;;  %v4450_v20 = vld [vmem:[%s6486_s2 + $0x10] sm:$0xff]  }
 0x22a   : > { %v2271_v42 = vrot.slane %v2269_v33, 4  ;;  %v2274_v38 = vrot.slane %v2272_v63, 5  ;;  %v2525_v28 = vrot.slane %v2523_v48, 4  ;;  %v2528_v37 = vrot.slane %v2526_v22, 5  ;;  %4335 = vmatprep.subr.bf16.mxu1 %v4450_v20  ;;  %v5751_v35 = vld [vmem:[#allocation3 + $0x14] sm:$0x1] }
 0x22b   : > { %v2537_v8 = vshrl.u32 %v2429_v17, 16  ;;  %v2493_v57 = vsel %vm4816_vm8, %v5673_v34, %v2492_v51  ;;  %v5722_v31 = vrot.slane %v2448_v58, 5  ;;  %v2655_v41 = vshll.u32 %v2609_v61, 16  ;;  %4336 = vmatpush3.bf16.msra.mxu1 %v4450_v20 }
 0x22c   : > { %2857 = vrot.lane.b32.xlu1 %v5700_v11, %s4485_s24  ;;  %v2540_v6 = vshll.u32 %v2429_v17, 16  ;;  %v2275_v59 = vor.u32 %v2274_v38, %v2271_v42  ;;  %v4192_v10 = vcombine.low %v2609_v61, %v2610_v18  ;;  %v2666_v30 = vshrl.u32 %v2610_v18, 16  ;;  %v5801_v38 = vld [vmem:[#allocation3 + $0x24] sm:$0x1] }
 0x22d   : > { %3104 = vrot.lane.b32.xlu0 %v4171_v0, %s4486_s26  ;;  %v2669_v2 = vshll.u32 %v2610_v18, 16  ;;  %v2479_v5 = vsel %vm4816_vm8, %v5671_v47, %v2478_v4  ;;  %v5734_v39 = vrot.slane %v2462_v53, 5  ;;  %v2280_v24 = vrot.slane %v2278_v29, 5  ;;  %v5760_v4 = vld [vmem:[#allocation3 + $0x28] sm:$0xf] }
 0x22e   : > { %v2276_v19 = vrot.slane %v2275_v59, 4  ;;  %v5736_v1 = vcombine.low %v2479_v5, %v2493_v57  ;;  %v5738_v3 = vrot.slane %v2652_v26, 4  ;;  %v2529_v32 = vor.u32 %v2528_v37, %v2525_v28  ;;  %v5762_v0 = vld [vmem:[#allocation3 + $0x30] sm:$0xf]  ;;  %v5803_v29 = vld [vmem:[#allocation3 + $0x2c] sm:$0x1] }
 0x22f   : > { %v5740_v34 = vrot.slane %v2537_v8, 4  ;;  %v2283_v13 = vshrl.u32 %v5726_v44, 16  ;;  %v5743_v12 = vrot.slane %v2540_v6, 5  ;;  %v2286_v16 = vshll.u32 %v5726_v44, 16  ;;  %v2370_v28 = vld [vmem:[#allocation3 + $0x20] sm:$0xe] }
 0x230   : > { %v2281_v47 = vsel %vm4816_vm8, %v2276_v19, %v2280_v24  ;;  %2873 = vrot.lane.b32.xlu1 %v5736_v1, %s4486_s26  ;;  %v2297_v7 = vshrl.u32 %v5732_v25, 16  ;;  %v5753_v36 = vrot.slane %v2655_v41, 5  ;;  %v5756_v27 = vrot.slane %v2666_v30, 4  ;;  %v2371_v37 = vld [vmem:[#allocation3 + $0x28] sm:$0xe] }
 0x231   : > { %3328 = vrot.lane.b32.xlu0 %v4192_v10, %s4485_s24  ;;  %v5758_v17 = vrot.slane %v2669_v2, 5  ;;  %v2285_v51 = vrot.slane %v2283_v13, 4  ;;  %v2288_v61 = vrot.slane %v2286_v16, 5  ;;  %v2292_v48 = vshll.u32 %v5625_v46, 16  ;;  %v4451_v46 = vld [vmem:[%s6486_s2 + $0x18] sm:$0xff]   ;;  %v4453_v13 = vld [vmem:[%s6486_s2 + $0x40] sm:$0xff]  }
 0x232   : > { %v2299_v22 = vrot.slane %v2297_v7, 4  ;;  %v2300_v58 = vshll.u32 %v5732_v25, 16  ;;  %v5766_v33 = vrot.slane %v2529_v32, 4  ;;  %v5773_v63 = vcombine.low %v2267_v52, %v2281_v47  ;;  %4337 = vmatprep.subr.bf16.mxu1 %v4451_v46  ;;  %v5806_v6 = vld [vmem:[#allocation3 + $0x3c] sm:$0x1]  ;;  %4363 = vmatprep.subr.bf16.mxu0 %v4453_v13 }
 0x233   : > { %v2306_v53 = vshll.u32 %v5627_v49, 16  ;;  %v2630_v18 = vor.u32 %v5696_v15, %v5694_v14  ;;  %v2543_v26 = vor.u32 %v5743_v12, %v5740_v34  ;;  %v2495_v54 = vshrl.u32 %v5760_v4, 16  ;;  %4338 = vmatpush3.bf16.msra.mxu1 %v4451_v46  ;;  %v5813_v10 = vld [vmem:[#allocation3 + $0x44] sm:$0x1]  ;;  %v2556_v19 = vld [vmem:[#allocation3 + $0x38] sm:$0xe]  ;;  %4364 = vmatpush3.bf16.msra.mxu0 %v4453_v13 }
 0x234   : > { %3086 = vrot.lane.b32.xlu1 %v5736_v1, %s4485_s24  ;;  %v2289_v21 = vor.u32 %v2288_v61, %v2285_v51  ;;  %v2302_v52 = vrot.slane %v2300_v58, 5  ;;  %v5792_v49 = vcombine.low %v5760_v4, %v5762_v0  ;;  %v2465_v14 = vsel %vm4816_vm8, %v5704_v56, %v5734_v39  ;;  %v2557_v34 = vld [vmem:[#allocation3 + $0x40] sm:$0xe] }
 0x235   : > { %2823 = vrot.lane.b32.xlu0 %v5773_v63, %s4487_s28  ;;  %v2633_v15 = vshll.u32 %v5751_v35, 16  ;;  %v2644_v42 = vor.u32 %v5708_v23, %v5706_v60  ;;  %v2294_v57 = vrot.slane %v2292_v48, 5  ;;  %v2647_v41 = vshll.u32 %v5776_v45, 16  ;;  %v5838_v58 = vld [vmem:[#allocation3 + $0x20] sm:$0xf] }
 0x236   : > { %v2290_v8 = vrot.slane %v2289_v21, 4  ;;  %v2303_v20 = vor.u32 %v2302_v52, %v2299_v22  ;;  %v2509_v56 = vshrl.u32 %v5762_v0, 16  ;;  %v2451_v60 = vsel %vm4816_vm8, %v5692_v62, %v5722_v31  ;;  %v5836_v22 = vld [vmem:[#allocation3 + $0x28] sm:$0xe]  ;;  %v5844_v52 = vld [vmem:[#allocation3 + $0x34] sm:$0x1] }
 0x237   : > { %v2308_v23 = vrot.slane %v2306_v53, 5  ;;  %v2631_v59 = vrot.slane %v2630_v18, 4  ;;  %v4124_v5 = vrot.slane %v2371_v37, 9  ;;  %v2412_v39 = vrot.slane %v5803_v29, 5 }
 0x238   : > { %3300 = vrot.lane.b32.xlu1 %v5736_v1, %s4487_s28  ;;  %v2295_v30 = vsel %vm4816_vm8, %v2290_v8, %v2294_v57  ;;  %v2304_v2 = vrot.slane %v2303_v20, 4  ;;  %v2512_v62 = vshll.u32 %v5762_v0, 16  ;;  %v5823_v31 = vcombine.low %v2451_v60, %v2465_v14  ;;  %v2555_v14 = vld [vmem:[#allocation3 + $0x30] sm:$0xe]  ;;  %v4454_v57 = vld [vmem:[%s6486_s2 + $0x48] sm:$0xff]  }
 0x239   : > { %2855 = vrot.lane.b32.xlu0 %v5792_v49, %s4485_s24  ;;  %v2635_v24 = vrot.slane %v2633_v15, 5  ;;  %v2645_v32 = vrot.slane %v2644_v42, 4  ;;  %v2649_v47 = vrot.slane %v2647_v41, 5  ;;  %v4123_v16 = vrot.slane %v2370_v28, 9  ;;  %v5846_v15 = vld [vmem:[#allocation3 + $0x34] sm:$0x1]  ;;  %4365 = vmatprep.subr.bf16.mxu0 %v4454_v57 }
 0x23a   : > { %v2309_v12 = vsel %vm4816_vm8, %v2304_v2, %v2308_v23  ;;  %v2408_v7 = vrot.slane %v5801_v38, 5  ;;  %v4133_v61 = vrot.slane %v2556_v19, 9  ;;  %v2600_v48 = vrot.slane %v5806_v6, 5  ;;  %v2372_v8 = vld [vmem:[#allocation3 + $0x30] sm:$0xe]  ;;  %4366 = vmatpush3.bf16.msra.mxu0 %v4454_v57  ;;  %v5909_v57 = vld [vmem:[%s6486_s2 + $0x20] sm:$0xff]  }
 0x23b   : > { %v5831_v51 = vcombine.low %v2295_v30, %v2309_v12  ;;  %v2636_v0 = vsel %vm4816_vm8, %v2631_v59, %v2635_v24  ;;  %v2498_v53 = vshll.u32 %v5760_v4, 16  ;;  %v2413_v18 = vsel %vm4712_vm0, %v4124_v5, %v2412_v39  ;;  %v5872_v60 = vld [vmem:[#allocation3 + $0x28] sm:$0xf]  ;;  %v2373_v5 = vld [vmem:[#allocation3 + $0x38] sm:$0xe]  ;;  %v4455_v39 = vld [vmem:[%s6486_s2 + $0x50] sm:$0xff]   ;;  %4347 = vmatprep.subr.bf16.mxu1 %v5909_v57 }
 0x23c   : > { %v4134_v46 = vrot.slane %v2557_v34, 9  ;;  %v2604_v21 = vrot.slane %v5813_v10, 5  ;;  %v5848_v42 = vrot.slane %v2543_v26, 4  ;;  %v5850_v28 = vrot.slane %v2495_v54, 4  ;;  %v5883_v19 = vld [vmem:[#allocation3 + $0x2c] sm:$0x1]  ;;  %4367 = vmatprep.subr.bf16.mxu0 %v4455_v39 }
 0x23d   : > { %v5852_v37 = vrot.slane %v2509_v56, 4  ;;  %2871 = vrot.lane.b32.xlu0 %v5823_v31, %s4486_s26  ;;  %2825 = vrot.lane.b32.xlu1 %v5831_v51, %s4487_s28  ;;  %v2650_v4 = vsel %vm4816_vm8, %v2645_v32, %v2649_v47  ;;  %v5863_v26 = vrot.slane %v2512_v62, 5  ;;  %v2409_v20 = vsel %vm4712_vm0, %v4123_v16, %v2408_v7  ;;  %v5870_v56 = vld [vmem:[#allocation3 + $0x3c] sm:$0x1] }
 0x23e   : > { %v5865_v54 = vcombine.low %v2636_v0, %v2650_v4  ;;  %v2532_v41 = vshll.u32 %v5806_v6, 16  ;;  %v4169_v23 = vcombine.low %v2409_v20, %v2413_v18  ;;  %v2546_v59 = vshll.u32 %v5813_v10, 16  ;;  %4368 = vmatpush3.bf16.msra.mxu0 %v4455_v39 }
 0x23f   : > { %v2601_v30 = vsel %vm4712_vm0, %v4133_v61, %v2600_v48  ;;  %v4131_v2 = vrot.slane %v5836_v22, 9  ;;  %v2605_v6 = vsel %vm4712_vm0, %v4134_v46, %v2604_v21  ;;  %v4125_v62 = vrot.slane %v2372_v8, 9  ;;  %v4457_v8 = vld [vmem:[%s6486_s2 + $0x58] sm:$0xff]  }
 0x240   : > { %v2416_v24 = vrot.slane %v5846_v15, 5  ;;  %v2311_v10 = vshrl.u32 %v5838_v58, 16  ;;  %v4132_v32 = vrot.slane %v2555_v14, 9  ;;  %v2596_v34 = vrot.slane %v5844_v52, 5  ;;  %4369 = vmatprep.subr.bf16.mxu0 %v4457_v8 }
 0x241   : > { %3084 = vrot.lane.b32.xlu0 %v5823_v31, %s4485_s24  ;;  %3346 = vrot.lane.b32.xlu1 %v5865_v54, %s4486_s26  ;;  %v2314_v13 = vshll.u32 %v5838_v58, 16  ;;  %v2325_v12 = vshrl.u32 %v5872_v60, 16  ;;  %v4126_v47 = vrot.slane %v2373_v5, 9  ;;  %v2420_v16 = vrot.slane %v5870_v56, 5 }
 0x242   : > { %v2313_v7 = vrot.slane %v2311_v10, 4  ;;  %v2328_v0 = vshll.u32 %v5872_v60, 16  ;;  %v5896_v61 = vcombine.low %v2601_v30, %v2605_v6  ;;  %v2592_v48 = vrot.slane %v5883_v19, 5  ;;  %4370 = vmatpush3.bf16.msra.mxu0 %v4457_v8 }
 0x243   : > { %v2316_v22 = vrot.slane %v2314_v13, 5  ;;  %v2327_v18 = vrot.slane %v2325_v12, 4  ;;  %v2417_v46 = vsel %vm4712_vm0, %v4125_v62, %v2416_v24  ;;  %v2320_v21 = vshll.u32 %v5801_v38, 16  ;;  %v5920_v24 = vld [vmem:[#allocation3 + $0x30] sm:$0xf] }
 0x244   : > { %v2330_v14 = vrot.slane %v2328_v0, 5  ;;  %v2334_v4 = vshll.u32 %v5803_v29, 16  ;;  %v2500_v20 = vrot.slane %v2498_v53, 5  ;;  %v2515_v30 = vor.u32 %v5863_v26, %v5852_v37  ;;  %v5936_v12 = vld [vmem:[#allocation3 + $0x24] sm:$0x1] }
 0x245   : > { %3080 = vrot.lane.b32.xlu0 %v4169_v23, %s4487_s28  ;;  %v2548_v38 = vrot.slane %v2546_v59, 5  ;;  %3110 = vrot.lane.b32.xlu1 %v5896_v61, %s4486_s26  ;;  %v2597_v29 = vsel %vm4712_vm0, %v4132_v32, %v2596_v34  ;;  %v2534_v5 = vrot.slane %v2532_v41, 5  ;;  %v2421_v39 = vsel %vm4712_vm0, %v4126_v47, %v2420_v16  ;;  %v5928_v23 = vld [vmem:[#allocation3 + $0x2c] sm:$0x1]  ;;  %v5932_v59 = vld [vmem:[#allocation3 + $0x38] sm:$0xf] }
 0x246   : > { %v2317_v6 = vor.u32 %v2316_v22, %v2313_v7  ;;  %v2331_v62 = vor.u32 %v2330_v14, %v2327_v18  ;;  %v2593_v53 = vsel %vm4712_vm0, %v4131_v2, %v2592_v48  ;;  %v4170_v37 = vcombine.low %v2417_v46, %v2421_v39 }
 0x247   : > { %v2549_v26 = vsel %vm4816_vm8, %v5848_v42, %v2548_v38  ;;  %v2672_v41 = vor.u32 %v5758_v17, %v5756_v27  ;;  %v5934_v10 = vcombine.low %v2593_v53, %v2597_v29  ;;  %v2322_v32 = vrot.slane %v2320_v21, 5 }
 0x248   : > { %v2332_v34 = vrot.slane %v2331_v62, 4  ;;  %v2336_v13 = vrot.slane %v2334_v4, 5  ;;  %v2535_v42 = vsel %vm4816_vm8, %v5766_v33, %v2534_v5  ;;  %v2658_v27 = vor.u32 %v5753_v36, %v5738_v3 }
 0x249   : > { %3298 = vrot.lane.b32.xlu0 %v5823_v31, %s4487_s28  ;;  %3082 = vrot.lane.b32.xlu1 %v4170_v37, %s4487_s28  ;;  %v2339_v17 = vshrl.u32 %v5920_v24, 16  ;;  %v2342_v2 = vshll.u32 %v5920_v24, 16  ;;  %v2318_v47 = vrot.slane %v2317_v6, 4  ;;  %v5948_v16 = vcombine.low %v2535_v42, %v2549_v26  ;;  %v2736_v42 = vld [vmem:[#allocation3 + $0x18] sm:$0xe] }
 0x24a   : > { %v2675_v7 = vshll.u32 %v5928_v23, 16  ;;  %v2353_v0 = vshrl.u32 %v5932_v59, 16  ;;  %v2661_v48 = vshll.u32 %v5936_v12, 16  ;;  %v2673_v22 = vrot.slane %v2672_v41, 4 }
 0x24b   : > { %v2341_v18 = vrot.slane %v2339_v17, 4  ;;  %v2344_v46 = vrot.slane %v2342_v2, 5  ;;  %v2337_v33 = vsel %vm4816_vm8, %v2332_v34, %v2336_v13  ;;  %v2348_v3 = vshll.u32 %v5846_v15, 16 }
 0x24c   : > { %v2355_v36 = vrot.slane %v2353_v0, 4  ;;  %v2356_v21 = vshll.u32 %v5932_v59, 16  ;;  %v2501_v14 = vor.u32 %v2500_v20, %v5850_v28  ;;  %v2518_v4 = vshll.u32 %v5844_v52, 16 }
 0x24d   : > { %3108 = vrot.lane.b32.xlu0 %v5934_v10, %s4486_s26  ;;  %2877 = vrot.lane.b32.xlu1 %v5948_v16, %s4486_s26  ;;  %v2659_v8 = vrot.slane %v2658_v27, 4  ;;  %v2345_v38 = vor.u32 %v2344_v46, %v2341_v18  ;;  %v2323_v29 = vsel %vm4816_vm8, %v2318_v47, %v2322_v32  ;;  %v2677_v5 = vrot.slane %v2675_v7, 5  ;;  %v5988_v46 = vld [vmem:[#allocation3 + $0x48] sm:$0xf] }
 0x24e   : > { %v2358_v15 = vrot.slane %v2356_v21, 5  ;;  %v2362_v39 = vshll.u32 %v5870_v56, 16  ;;  %v2516_v6 = vrot.slane %v2515_v30, 4  ;;  %v2504_v28 = vshll.u32 %v5883_v19, 16  ;;  %v2735_v56 = vld [vmem:[#allocation3 + $0x10] sm:$0xe] }
 0x24f   : > { %v5967_v20 = vcombine.low %v2323_v29, %v2337_v33  ;;  %v2346_v52 = vrot.slane %v2345_v38, 4  ;;  %v2663_v62 = vrot.slane %v2661_v48, 5  ;;  %v2678_v53 = vsel %vm4816_vm8, %v2673_v22, %v2677_v5  ;;  %v2613_v21 = vld [vmem:[#allocation3 + $0x40] sm:$0xf]  ;;  %v2611_v38 = vld [vmem:[#allocation3 + $0x30] sm:$0xf] }
 0x250   : > { %v2350_v37 = vrot.slane %v2348_v3, 5  ;;  %v2359_v26 = vor.u32 %v2358_v15, %v2355_v36  ;;  %v2502_v41 = vrot.slane %v2501_v14, 4  ;;  %v2520_v34 = vrot.slane %v2518_v4, 5  ;;  %v2738_v36 = vld [vmem:[#allocation3 + $0x28] sm:$0xe] }
 0x251   : > { %2827 = vrot.lane.b32.xlu0 %v5967_v20, %s4487_s28  ;;  %3090 = vrot.lane.b32.xlu1 %v5948_v16, %s4485_s24  ;;  %v2664_v19 = vsel %vm4816_vm8, %v2659_v8, %v2663_v62  ;;  %v2364_v13 = vrot.slane %v2362_v39, 5  ;;  %v2506_v27 = vrot.slane %v2504_v28, 5  ;;  %v4135_v7 = vrot.slane %v2735_v56, 9  ;;  %v2737_v8 = vld [vmem:[#allocation3 + $0x20] sm:$0xe] }
 0x252   : > { %v2351_v30 = vsel %vm4816_vm8, %v2346_v52, %v2350_v37  ;;  %v2360_v32 = vrot.slane %v2359_v26, 4  ;;  %v4196_v17 = vcombine.low %v2664_v19, %v2678_v53  ;;  %v2521_v2 = vsel %vm4816_vm8, %v2516_v6, %v2520_v34  ;;  %v2612_v37 = vld [vmem:[#allocation3 + $0x38] sm:$0xf] }
 0x253   : > { %v2761_v0 = vrot.slane %v5751_v35, 5  ;;  %v4136_v22 = vrot.slane %v2736_v42, 9  ;;  %v2765_v18 = vrot.slane %v5776_v45, 5  ;;  %v2507_v33 = vsel %vm4816_vm8, %v2502_v41, %v2506_v27 }
 0x254   : > { %v2365_v47 = vsel %vm4816_vm8, %v2360_v32, %v2364_v13  ;;  %v5992_v3 = vcombine.low %v2507_v33, %v2521_v2  ;;  %v2722_v14 = vshrl.u32 %v5988_v46, 16  ;;  %v2725_v4 = vshll.u32 %v5988_v46, 16  ;;  %v2621_v2 = vld [vmem:[#allocation3 + $0x44] sm:$0x1] }
 0x255   : > { %3348 = vrot.lane.b32.xlu0 %v4196_v17, %s4486_s26  ;;  %v5985_v48 = vcombine.low %v2351_v30, %v2365_v47  ;;  %v2762_v35 = vsel %vm4712_vm0, %v4135_v7, %v2761_v0  ;;  %v2766_v45 = vsel %vm4712_vm0, %v4136_v22, %v2765_v18  ;;  %v4138_v29 = vrot.slane %v2738_v36, 9  ;;  %v2622_v47 = vld [vmem:[#allocation3 + $0x4c] sm:$0x1] }
 0x256   : > { %v2773_v5 = vrot.slane %v5928_v23, 5  ;;  %v2708_v15 = vshrl.u32 %v2613_v21, 16  ;;  %v2711_v39 = vshll.u32 %v2613_v21, 16  ;;  %v4215_v6 = vcombine.low %v2762_v35, %v2766_v45 }
 0x257   : > { %2829 = vrot.lane.b32.xlu1 %v5985_v48, %s4487_s28  ;;  %v4137_v28 = vrot.slane %v2737_v8, 9  ;;  %v2769_v52 = vrot.slane %v5936_v12, 5  ;;  %v2724_v62 = vrot.slane %v2722_v14, 4  ;;  %v2727_v53 = vrot.slane %v2725_v4, 5  ;;  %v2619_v14 = vld [vmem:[#allocation3 + $0x34] sm:$0x1] }
 0x258   : > { %v2680_v26 = vshrl.u32 %v2611_v38, 16  ;;  %v2683_v41 = vshll.u32 %v2611_v38, 16  ;;  %v4144_v34 = vcombine.low %v5726_v44, %v5732_v25  ;;  %v4145_v23 = vcombine.low %v5838_v58, %v5872_v60  ;;  %v4461_v44 = vld [vmem:[%s6486_s2 + $0x30] sm:$0xff]  }
 0x259   : > { %2875 = vrot.lane.b32.xlu0 %v5992_v3, %s4486_s26  ;;  %v2774_v56 = vsel %vm4712_vm0, %v4138_v29, %v2773_v5  ;;  %v2713_v19 = vrot.slane %v2711_v39, 5  ;;  %v4146_v12 = vcombine.low %v5920_v24, %v5932_v59  ;;  %v4193_v30 = vcombine.low %v2611_v38, %v2612_v37  ;;  %v2620_v5 = vld [vmem:[#allocation3 + $0x3c] sm:$0x1] }
 0x25a   : > { %v2694_v32 = vshrl.u32 %v2612_v37, 16  ;;  %v2697_v13 = vshll.u32 %v2612_v37, 16  ;;  %v2770_v42 = vsel %vm4712_vm0, %v4137_v28, %v2769_v52  ;;  %v2728_v7 = vor.u32 %v2727_v53, %v2724_v62 }
 0x25b   : > { %3548 = vrot.lane.b32.xlu1 %v5865_v54, %s4485_s24  ;;  %v2710_v54 = vrot.slane %v2708_v15, 4  ;;  %v4216_v27 = vcombine.low %v2770_v42, %v2774_v56  ;;  %v2682_v0 = vrot.slane %v2680_v26, 4  ;;  %v2685_v22 = vrot.slane %v2683_v41, 5  ;;  %v2739_v26 = vld [vmem:[#allocation3 + $0x30] sm:$0xe] }
 0x25c   : > { %v2731_v33 = vshll.u32 %v2622_v47, 16  ;;  %v2696_v36 = vrot.slane %v2694_v32, 4  ;;  %v2699_v35 = vrot.slane %v2697_v13, 5  ;;  %v2729_v45 = vrot.slane %v2728_v7, 4 }
 0x25d   : > { %3568 = vrot.lane.b32.xlu0 %v4215_v6, %s4486_s26  ;;  %v2714_v18 = vor.u32 %v2713_v19, %v2710_v54  ;;  %v2686_v38 = vor.u32 %v2685_v22, %v2682_v0  ;;  %v4194_v29 = vcombine.low %v2613_v21, %v5988_v46  ;;  %v2689_v39 = vshll.u32 %v2619_v14, 16  ;;  %v2742_v54 = vld [vmem:[#allocation3 + $0x48] sm:$0xe]  ;;  %v2740_v19 = vld [vmem:[#allocation3 + $0x38] sm:$0xe] }
 0x25e   : > { %v2733_v8 = vrot.slane %v2731_v33, 5  ;;  %v2700_v6 = vor.u32 %v2699_v35, %v2696_v36  ;;  %v2703_v53 = vshll.u32 %v2620_v5, 16  ;;  %v2777_v13 = vrot.slane %v2619_v14, 5 }
 0x25f   : > { %3550 = vrot.lane.b32.xlu1 %v4196_v17, %s4485_s24  ;;  %v2717_v17 = vshll.u32 %v2621_v2, 16  ;;  %v2715_v4 = vrot.slane %v2714_v18, 4  ;;  %v2687_v62 = vrot.slane %v2686_v38, 4  ;;  %v2691_v46 = vrot.slane %v2689_v39, 5 }
 0x260   : > { %v2734_v52 = vsel %vm4816_vm8, %v2729_v45, %v2733_v8  ;;  %v2701_v21 = vrot.slane %v2700_v6, 4  ;;  %v2705_v56 = vrot.slane %v2703_v53, 5  ;;  %v4140_v7 = vrot.slane %v2740_v19, 9 }
 0x261   : > { %3330 = vrot.lane.b32.xlu0 %v4193_v30, %s4485_s24  ;;  %v2719_v15 = vrot.slane %v2717_v17, 5  ;;  %v2692_v41 = vsel %vm4816_vm8, %v2687_v62, %v2691_v46  ;;  %v2741_v30 = vld [vmem:[#allocation3 + $0x40] sm:$0xe]  ;;  %v2781_v0 = vrot.slane %v2620_v5, 5  ;;  %v2785_v18 = vrot.slane %v2621_v2, 5 }
 0x262   : > { %v2706_v32 = vsel %vm4816_vm8, %v2701_v21, %v2705_v56  ;;  %v4141_v22 = vrot.slane %v2741_v30, 9  ;;  %v4467_v62 = vld [vmem:[#allocation3] sm:$0xf]  ;;  %vm6546_vm3 = vcmask 130048   ;;  %vm6547_vm10 = vcmask 261120  }
 0x263   : > { %3570 = vrot.lane.b32.xlu1 %v4216_v27, %s4486_s26  ;;  %v2720_v28 = vsel %vm4816_vm8, %v2715_v4, %v2719_v15  ;;  %v4197_v42 = vcombine.low %v2692_v41, %v2706_v32  ;;  %v2789_v27 = vrot.slane %v2622_v47, 5  ;;  %v2782_v40 = vsel %vm4712_vm0, %v4140_v7, %v2781_v0  ;;  %vm6551_vm15 = vmmov %vm6547_vm10  ;;  %v4463_v0 = vld [vmem:[%s6486_s2 + $0x60] sm:$0xff]  }
 0x264   : > { %v4198_v37 = vcombine.low %v2720_v28, %v2734_v52  ;;  %v2786_v36 = vsel %vm4712_vm0, %v4141_v22, %v2785_v18  ;;  %v4143_v53 = vcombine.low %v4467_v62, %v5690_v55  ;;  %vm6550_vm8 = vcmask 523264   ;;  %v4460_v55 = vld [vmem:[%s6486_s2 + $0x28] sm:$0xff]   ;;  %vm6555_vm13 = vmmov %vm6547_vm10 }
 0x265   : > { %3088 = vrot.lane.b32.xlu0 %v5992_v3, %s4485_s24  ;;  %vm6553_vm7 = vmmov %vm6550_vm8 }
 0x266   : > { %vm6557_vm11 = vmmov %vm6553_vm7 }
 0x267   : > { %3304 = vrot.lane.b32.xlu1 %v5948_v16, %s4487_s28  ;;  %vm6559_vm9 = vmmov %vm6547_vm10 }
 0x269   : > { %3332 = vrot.lane.b32.xlu0 %v4194_v29, %s4485_s24 }
 0x26b   : > { %3544 = vrot.lane.b32.xlu1 %v5934_v10, %s4487_s28  ;;  %v4139_v10 = vrot.slane %v2739_v26, 9 }
 0x26d   : > { %3546 = vrot.lane.b32.xlu0 %v5896_v61, %s4487_s28  ;;  %v4142_v61 = vrot.slane %v2742_v54, 9  ;;  %v2778_v33 = vsel %vm4712_vm0, %v4139_v10, %v2777_v13 }
 0x26e   : > { %v4217_v35 = vcombine.low %v2778_v33, %v2782_v40 }
 0x26f   : > { %3554 = vrot.lane.b32.xlu1 %v4198_v37, %s4485_s24  ;;  %v2790_v47 = vsel %vm4712_vm0, %v4142_v61, %v2789_v27  ;;  %vm6549_vm0 = vmmov %vm6546_vm3 }
 0x270   : > { %v4218_v2 = vcombine.low %v2786_v36, %v2790_v47  ;;  %vm6554_vm12 = vmmov %vm6549_vm0 }
 0x271   : > { %3352 = vrot.lane.b32.xlu0 %v4198_v37, %s4486_s26  ;;  %vm6558_vm6 = vmmov %vm6549_vm0 }
 0x272   : > { %vm6560_vm1 = vmmov %vm6549_vm0 }
 0x273   : > { %3350 = vrot.lane.b32.xlu1 %v4197_v42, %s4486_s26 }
 0x275   : > { %3302 = vrot.lane.b32.xlu0 %v5992_v3, %s4487_s28 }
 0x277   : > { %3552 = vrot.lane.b32.xlu1 %v4197_v42, %s4485_s24  ;;  %v4462_v42 = vld [vmem:[%s6486_s2 + $0x38] sm:$0xff]   ;;  %s6435_s24 = scalar_lea.vmem %s6487_s3, %s4238_s23 }
 0x279   : > { %3572 = vrot.lane.b32.xlu0 %v4217_v35, %s4486_s26 }
 0x27b   : > { %3574 = vrot.lane.b32.xlu1 %v4218_v2, %s4486_s26 }
 0x282   : > { %v2854_v14 = vpop.permute.xlu1 %2853 }
 0x283   : > { %v2852_v17 = vpop.permute.xlu0 %2851 }
 0x28f   : > { %v3327_v4 = vpop.permute.xlu0 %3326 }
 0x292   : > { %v6056_v45 = vpop.permute.xlu1 %3106 }
 0x296   : > { %v6058_v8 = vpop.permute.xlu1 %3078 }
 0x297   : > { %v3077_v38 = vpop.permute.xlu0 %3076 }
 0x29a   : > { %v6060_v29 = vpop.permute.xlu1 %3540 }
 0x29b   : > { %v6062_v50 = vpop.permute.xlu0 %3542 }
 0x29e   : > { %v2858_v5 = vpop.permute.xlu1 %2857 }
 0x29f   : > { %v6064_v15 = vpop.permute.xlu0 %3104 }
 0x2a2   : > { %v2874_v39 = vpop.permute.xlu1 %2873 }
 0x2a3   : > { %v3329_v6 = vpop.permute.xlu0 %3328 }
 0x2a6   : > { %v6066_v28 = vpop.permute.xlu1 %3086 }
 0x2a7   : > { %v2824_v52 = vpop.permute.xlu0 %2823 }
 0x2a8   : > { %v2881_v37 = vsel %vm6546_vm3, %v4143_v53, %v2824_v52  ;;  %vm6562_vm3 = vmmov %vm6553_vm7  ;;  %v4464_v53 = vld [vmem:[%s6486_s2 + $0x68] sm:$0xff]  }
 0x2a9   : > { %v2892_v41 = vsel %vm6547_vm10, %v2881_v37, %v2852_v17  ;;  %vm6563_vm10 = vmmov %vm6549_vm0 }
 0x2aa   : > { %v3301_v46 = vpop.permute.xlu1 %3300 }
 0x2ab   : > { %v2856_v21 = vpop.permute.xlu0 %2855 }
 0x2af   : > { %v2872_v26 = vpop.permute.xlu0 %2871  ;;  %v2826_v56 = vpop.permute.xlu1 %2825 }
 0x2b0   : > { %v2900_v54 = vsel %vm6548_vm2, %v2892_v41, %v2872_v26  ;;  %v2884_v19 = vsel %vm6549_vm0, %v4144_v34, %v2826_v56  ;;  %vm6564_vm2 = vmmov %vm6549_vm0 }
 0x2b1   : > { %4339 = vmatprep.mubr.msk.bf16.mxu1 %vm6550_vm8, %v2900_v54  ;;  %v2894_v30 = vsel %vm6551_vm15, %v2884_v19, %v2854_v14  ;;  %vm6565_vm0 = vmmov %vm6559_vm9 }
 0x2b2   : > { %v2902_v32 = vsel %vm6552_vm5, %v2894_v30, %v2874_v39  ;;  %vm6566_vm8 = vmmov %vm6565_vm0 }
 0x2b3   : > { %v3085_v10 = vpop.permute.xlu0 %3084  ;;  %v3347_v13 = vpop.permute.xlu1 %3346  ;;  %4340 = vmatmul.mubr.msk.bf16.vlgmr.msra.gmra.mrb[0].mxu1 %vm6553_vm7, %v2902_v32  ;;  %vm6567_vm15 = vmmov %vm6565_vm0 }
 0x2b4   : > { %4348 = vmatpush3.bf16.msra.mxu1 %v5909_v57  ;;  %vm6568_vm5 = vmmov %vm6561_vm4 }
 0x2b5   : > { %4349 = vmatprep.subr.bf16.mxu1 %v4460_v55  ;;  %vm6569_vm7 = vmmov %vm6561_vm4 }
 0x2b7   : > { %v3081_v25 = vpop.permute.xlu0 %3080  ;;  %v6087_v34 = vpop.permute.xlu1 %3110 }
 0x2b8   : > { %4350 = vmatpush3.bf16.msra.mxu1 %v4460_v55 }
 0x2b9   : > { %4351 = vmatprep.subr.bf16.mxu1 %v4461_v44 }
 0x2bb   : > { %v3299_v61 = vpop.permute.xlu0 %3298  ;;  %v3083_v27 = vpop.permute.xlu1 %3082 }
 0x2bc   : > { %v3356_v7 = vsel %vm6554_vm12, %v5594_v43, %v3299_v61  ;;  %4352 = vmatpush3.bf16.msra.mxu1 %v4461_v44  ;;  %v3359_v43 = vsel %vm6558_vm6, %v5569_v9, %v3301_v46  ;;  %vm6570_vm12 = vmmov %vm6562_vm3 }
 0x2bd   : > { %v3367_v57 = vsel %vm6555_vm13, %v3356_v7, %v3327_v4  ;;  %4353 = vmatprep.subr.bf16.mxu1 %v4462_v42  ;;  %v3369_v47 = vsel %vm6559_vm9, %v3359_v43, %v3329_v6  ;;  %v3114_v4 = vsel %vm6563_vm10, %v5773_v63, %v3077_v38  ;;  %vm6571_vm13 = vmmov %vm6562_vm3 }
 0x2be   : > { %v3375_v22 = vsel %vm6556_vm14, %v3367_v57, %v3347_v13  ;;  %v3125_v39 = vsel %vm6565_vm0, %v3114_v4, %v3085_v10  ;;  %vm6572_vm14 = vmmov %vm6561_vm4 }
 0x2bf   : > { %4371 = vmatprep.mubr.msk.bf16.mxu0 %vm6557_vm11, %v3375_v22  ;;  %v3109_v18 = vpop.permute.xlu0 %3108  ;;  %v2878_v33 = vpop.permute.xlu1 %2877  ;;  %v3133_v63 = vsel %vm6572_vm14, %v3125_v39, %v6064_v15  ;;  %vm6573_vm11 = vmmov %vm6562_vm3 }
 0x2c0   : > { %4354 = vmatpush3.bf16.msra.mxu1 %v4462_v42  ;;  %vm6574_vm6 = vmmov %vm6560_vm1 }
 0x2c1   : > { %4379 = vmatprep.subr.bf16.mxu1 %v4463_v0  ;;  %v3117_v59 = vsel %vm6574_vm6, %v5831_v51, %v6058_v8  ;;  %vm6575_vm9 = vmmov %vm6565_vm0  ;;  %v4465_v8 = vld [vmem:[%s6486_s2 + $0x70] sm:$0xff]  }
 0x2c2   : > { %v3127_v38 = vsel %vm6575_vm9, %v3117_v59, %v6066_v28  ;;  %vm6579_vm10 = vmmov %vm6565_vm0  ;;  %v3123_v28 = vsel %vm6564_vm2, %v5985_v48, %v3083_v27  ;;  %v4466_v48 = vld [vmem:[%s6486_s2 + $0x78] sm:$0xff]  }
 0x2c3   : > { %v2828_v40 = vpop.permute.xlu0 %2827  ;;  %v3091_v36 = vpop.permute.xlu1 %3090  ;;  %vm6589_vm6 = vmmov %vm6564_vm2 }
 0x2c4   : > { %v2887_v2 = vsel %vm6560_vm1, %v4145_v23, %v2828_v40  ;;  %vm6576_vm1 = vmmov %vm6561_vm4  ;;  %v3581_v32 = vsel %vm6589_vm6, %v5736_v1, %v6062_v50 }
 0x2c5   : > { %v2896_v58 = vsel %vm6567_vm15, %v2887_v2, %v2856_v21  ;;  %v3135_v46 = vsel %vm6576_vm1, %v3127_v38, %v6056_v45  ;;  %vm6580_vm0 = vmmov %vm6576_vm1 }
 0x2c6   : > { %vm6582_vm15 = vmmov %vm6575_vm9 }
 0x2c7   : > { %v3349_v35 = vpop.permute.xlu0 %3348  ;;  %vm6591_vm1 = vmmov %vm6580_vm0 }
 0x2c8   : > { %v3377_v17 = vsel %vm6561_vm4, %v3369_v47, %v3349_v35  ;;  %vm6577_vm4 = vmmov %vm6562_vm3 }
 0x2c9   : > { %4372 = vmatmul.mubr.msk.bf16.vlgmr.msra.gmra.mrb[8].mxu0 %vm6562_vm3, %v3377_v17  ;;  %v2830_v14 = vpop.permute.xlu1 %2829  ;;  %vm6578_vm3 = vmmov %vm6564_vm2 }
 0x2ca   : > { %v2890_v9 = vsel %vm6564_vm2, %v4146_v12, %v2830_v14  ;;  %v3120_v21 = vsel %vm6578_vm3, %v5967_v20, %v3081_v25  ;;  %v3131_v20 = vsel %vm6582_vm15, %v3123_v28, %v3091_v36  ;;  %vm6587_vm14 = vmmov %vm6577_vm4 }
 0x2cb   : > { %v2898_v6 = vsel %vm6566_vm8, %v2890_v9, %v2858_v5  ;;  %v2876_v60 = vpop.permute.xlu0 %2875  ;;  %vm6581_vm8 = vmmov %vm6564_vm2 }
 0x2cc   : > { %v2904_v23 = vsel %vm6568_vm5, %v2896_v58, %v2876_v60  ;;  %v2906_v52 = vsel %vm6569_vm7, %v2898_v6, %v2878_v33  ;;  %v3578_v41 = vsel %vm6581_vm8, %v5823_v31, %v6060_v29  ;;  %vm6583_vm5 = vmmov %vm6577_vm4 }
 0x2cd   : > { %4343 = vmatprep.mubr.msk.bf16.mxu1 %vm6570_vm12, %v2904_v23  ;;  %v3549_v62 = vpop.permute.xlu1 %3548  ;;  %vm6584_vm7 = vmmov %vm6575_vm9 }
 0x2ce   : > { %4344 = vmatmul.mubr.msk.bf16.gmra.mrb[4].mxu1 %vm6571_vm13, %v2906_v52  ;;  %v3589_v56 = vsel %vm6584_vm7, %v3578_v41, %v3549_v62  ;;  %vm6585_vm12 = vmmov %vm6580_vm0 }
 0x2cf   : > { %v3569_v24 = vpop.permute.xlu0 %3568  ;;  %4355 = vmatprep.mubr.msk.bf16.mxu1 %vm6573_vm11, %v3133_v63  ;;  %v3139_v30 = vsel %vm6585_vm12, %v3131_v20, %v6087_v34  ;;  %vm6586_vm13 = vmmov %vm6580_vm0 }
 0x2d0   : > { %v3597_v55 = vsel %vm6586_vm13, %v3589_v56, %v3569_v24  ;;  %vm6588_vm11 = vmmov %vm6577_vm4 }
 0x2d1   : > { %v3551_v12 = vpop.permute.xlu1 %3550  ;;  %vm6590_vm9 = vmmov %vm6584_vm7 }
 0x2d2   : > { %v3591_v13 = vsel %vm6590_vm9, %v3581_v32, %v3551_v12  ;;  %vm6592_vm3 = vmmov %vm6564_vm2 }
 0x2d3   : > { %v3331_v5 = vpop.permute.xlu0 %3330  ;;  %vm6599_vm12 = vmmov %vm6577_vm4 }
 0x2d4   : > { %vm6600_vm13 = vmmov %vm6564_vm2 }
 0x2d5   : > { %v3571_v15 = vpop.permute.xlu1 %3570  ;;  %vm6604_vm9 = vmmov %vm6577_vm4 }
 0x2d6   : > { %4356 = vmatmul.mubr.msk.bf16.vlgmr.msra.gmra.mrb[8].mxu1 %vm6577_vm4, %v3135_v46  ;;  %v3599_v44 = vsel %vm6591_vm1, %v3591_v13, %v3571_v15 }
 0x2d7   : > { %v3089_v37 = vpop.permute.xlu0 %3088  ;;  %4380 = vmatpush3.bf16.msra.mxu1 %v4463_v0 }
 0x2d8   : > { %v3129_v51 = vsel %vm6579_vm10, %v3120_v21, %v3089_v37  ;;  %4381 = vmatprep.subr.bf16.mxu1 %v4464_v53  ;;  %vm6593_vm10 = vmmov %vm6564_vm2 }
 0x2d9   : > { %v3137_v45 = vsel %vm6580_vm0, %v3129_v51, %v3109_v18  ;;  %v3305_v26 = vpop.permute.xlu1 %3304  ;;  %vm6594_vm0 = vmmov %vm6584_vm7 }
 0x2da   : > { %4359 = vmatprep.mubr.msk.bf16.mxu1 %vm6583_vm5, %v3137_v45  ;;  %v3365_v34 = vsel %vm6592_vm3, %v5700_v11, %v3305_v26  ;;  %vm6595_vm8 = vmmov %vm6594_vm0  ;;  %vm6605_vm3 = vcmask 64512  }
 0x2db   : > { %v3333_v54 = vpop.permute.xlu0 %3332  ;;  %4382 = vmatpush3.bf16.msra.mxu1 %v4464_v53  ;;  %vm6596_vm15 = vmmov %vm6594_vm0 }
 0x2dc   : > { %4383 = vmatprep.subr.bf16.mxu1 %v4465_v8  ;;  %v3373_v7 = vsel %vm6595_vm8, %v3365_v34, %v3333_v54  ;;  %vm6597_vm5 = vmmov %vm6591_vm1 }
 0x2dd   : > { %v3545_v19 = vpop.permute.xlu1 %3544  ;;  %vm6598_vm7 = vmmov %vm6591_vm1 }
 0x2de   : > { %4360 = vmatmul.mubr.msk.bf16.gmra.mrb[12].mxu1 %vm6587_vm14, %v3139_v30  ;;  %v3584_v27 = vsel %vm6564_vm2, %v5992_v3, %v3545_v19  ;;  %vm6601_vm14 = vmmov %vm6591_vm1 }
 0x2df   : > { %v3547_v31 = vpop.permute.xlu0 %3546  ;;  %4384 = vmatpush3.bf16.msra.mxu1 %v4465_v8  ;;  %4387 = vmatprep.mubr.msk.bf16.mxu1 %vm6588_vm11, %v3597_v55  ;;  %vm6602_vm11 = vmmov %vm6577_vm4 }
 0x2e0   : > { %4385 = vmatprep.subr.bf16.mxu1 %v4466_v48  ;;  %vm6603_vm6 = vmmov %vm6594_vm0 }
 0x2e1   : > { %v3555_v29 = vpop.permute.xlu1 %3554  ;;  %vm6607_vm2 = vmmov %vm6605_vm3 }
 0x2e3   : > { %v3353_v10 = vpop.permute.xlu0 %3352  ;;  %4386 = vmatpush3.bf16.msra.mxu1 %v4466_v48 }
 0x2e4   : > { %v3381_v22 = vsel %vm6598_vm7, %v3373_v7, %v3353_v10 }
 0x2e5   : > { %v3351_v25 = vpop.permute.xlu1 %3350 }
 0x2e6   : > { %4388 = vmatmul.mubr.msk.bf16.vlgmr.msra.gmra.mrb[16].mxu1 %vm6577_vm4, %v3599_v44 }
 0x2e7   : > { %v3303_v42 = vpop.permute.xlu0 %3302 }
 0x2e8   : > { %v3362_v61 = vsel %vm6593_vm10, %v5792_v49, %v3303_v42  ;;  %v3587_v49 = vsel %vm6600_vm13, %v5948_v16, %v3547_v31  ;;  %vm6606_vm10 = vmmov %vm6605_vm3 }
 0x2e9   : > { %v3371_v1 = vsel %vm6594_vm0, %v3362_v61, %v3331_v5  ;;  %v3553_v50 = vpop.permute.xlu1 %3552  ;;  %v3595_v3 = vsel %vm6603_vm6, %v3587_v49, %v3555_v29  ;;  %vm6608_vm0 = vmmov %vm6607_vm2 }
 0x2ea   : > { %v3593_v57 = vsel %vm6596_vm15, %v3584_v27, %v3553_v50  ;;  %v3379_v0 = vsel %vm6597_vm5, %v3371_v1, %v3351_v25  ;;  %vm6609_vm8 = vmmov %vm6608_vm0 }
 0x2eb   : > { %4375 = vmatprep.mubr.msk.bf16.mxu0 %vm6599_vm12, %v3379_v0  ;;  %v3573_v11 = vpop.permute.xlu0 %3572  ;;  %vm6610_vm15 = vmmov %vm6608_vm0 }
 0x2ec   : > { %v3601_v18 = vsel %vm6601_vm14, %v3593_v57, %v3573_v11  ;;  %4376 = vmatmul.mubr.msk.bf16.gmra.mrb[12].mxu0 %vm6602_vm11, %v3381_v22  ;;  %vm6611_vm5 = vmmov %vm6608_vm0 }
 0x2ed   : > { %4391 = vmatprep.mubr.msk.bf16.mxu1 %vm6604_vm9, %v3601_v18  ;;  %v3575_v33 = vpop.permute.xlu1 %3574  ;;  %vm6612_vm7 = vmmov %vm6608_vm0 }
 0x2ee   : > { %v3603_v40 = vsel %vm6591_vm1, %v3595_v3, %v3575_v33  ;;  %vm6613_vm12 = vmmov %vm6608_vm0 }
 0x2ef   : > { %4392 = vmatmul.mubr.msk.bf16.gmra.mrb[20].mxu1 %vm6577_vm4, %v3603_v40  ;;  %vm6614_vm13 = vmmov %vm6608_vm0 }
 0x2f0   : > { %vm6615_vm14 = vmmov %vm6608_vm0 }
 0x2f1   : > { %vm6616_vm11 = vmmov %vm6608_vm0 }
 0x2f2   : > { %vm6617_vm6 = vmmov %vm6608_vm0 }
 0x2f3   : > { %vm6618_vm9 = vmmov %vm6608_vm0 }
 0x2f4   : > { %vm6619_vm1 = vmmov %vm6608_vm0 }
 0x2f5   : > { %vm6620_vm4 = vmmov %vm6608_vm0 }
 0x386   : > { %v6185_v36 = vpop.f32.mrb[0].mxu1 }
 0x387   : > { %v6187_v43 = vpop.f32.mrb[1].mxu1  ;;  %v3036_v2 = vmul.f32 %v6185_v36, %v6185_v36  ;;  %v3015_v39 = vsel %vm6607_vm2, %v6185_v36, 0.0  ;;  %vm6623_vm2 = vmmov %vm6608_vm0 }
 0x388   : > { %v3034_v16 = vmul.f32 %v6187_v43, %v6187_v43  ;;  %v6191_v47 = vpop.f32.mrb[2].mxu1  ;;  %v3012_v17 = vsel %vm6605_vm3, %v6187_v43, 0.0  ;;  %vm6621_vm3 = vmmov %vm6608_vm0 }
 0x389   : > { %v6193_v35 = vpop.f32.mrb[3].mxu1  ;;  %v3037_v58 = vmul.f32 %v6191_v47, %v6191_v47  ;;  %v3045_v62 = vsel %vm6610_vm15, %v3036_v2, 0.0  ;;  %v3017_v63 = vsel %vm6611_vm5, %v6191_v47, 0.0  ;;  %vm6625_vm15 = vmmov %vm6608_vm0 }
 0x38a   : > { %v3013_v14 = vsel %vm6606_vm10, %v6193_v35, 0.0  ;;  %v3035_v4 = vmul.f32 %v6193_v35, %v6193_v35  ;;  %v3042_v6 = vsel %vm6608_vm0, %v3034_v16, 0.0  ;;  %vm6622_vm10 = vmmov %vm6608_vm0 }
 0x38b   : > { %v3014_v9 = vadd.f32 %v3013_v14, %v3012_v17  ;;  %v3047_v12 = vsel %vm6612_vm7, %v3037_v58, 0.0  ;;  %vm6626_vm5 = vmmov %vm6608_vm0 }
 0x38c   : > { %v3043_v60 = vsel %vm6609_vm8, %v3035_v4, 0.0  ;;  %vm6624_vm8 = vmmov %vm6608_vm0 }
 0x38d   : > { %v3016_v23 = vadd.f32 %v3015_v39, %v3014_v9  ;;  %v3044_v52 = vadd.f32 %v3043_v60, %v3042_v6  ;;  %vm6627_vm7 = vmmov %vm6608_vm0 }
 0x38f   : > { %v3046_v24 = vadd.f32 %v3045_v62, %v3044_v52  ;;  %v3018_v59 = vadd.f32 %v3017_v63, %v3016_v23 }
 0x391   : > { %v3048_v38 = vadd.f32 %v3047_v12, %v3046_v24 }
 0x39c   : > { %v4373_v5 = vpop.f32.mrb[8].mxu0 }
 0x39d   : > { %3806 = vrot.lane.b32.xlu0 %v4373_v5, %s4487_s28  ;;  %v3457_v53 = vpop.f32.mrb[9].mxu0  ;;  %v3512_v37 = vmul.f32 %v4373_v5, %v4373_v5  ;;  %v3491_v41 = vsel %vm6615_vm14, %v4373_v5, 0.0  ;;  %vm6630_vm14 = vmmov %vm6608_vm0 }
 0x39e   : > { %v3510_v46 = vmul.f32 %v3457_v53, %v3457_v53  ;;  %v4374_v15 = vpop.f32.mrb[10].mxu0  ;;  %v3488_v51 = vsel %vm6613_vm12, %v3457_v53, 0.0  ;;  %vm6628_vm12 = vmmov %vm6608_vm0 }
 0x39f   : > { %3808 = vrot.lane.b32.xlu1 %v4374_v15, %s4487_s28  ;;  %v3460_v21 = vpop.f32.mrb[11].mxu0  ;;  %v3513_v56 = vmul.f32 %v4374_v15, %v4374_v15  ;;  %v3521_v32 = vsel %vm6619_vm1, %v3512_v37, 0.0  ;;  %v3493_v10 = vsel %vm6620_vm4, %v4374_v15, 0.0  ;;  %vm6634_vm1 = vmmov %vm6608_vm0 }
 0x3a0   : > { %v3489_v8 = vsel %vm6614_vm13, %v3460_v21, 0.0  ;;  %v3511_v28 = vmul.f32 %v3460_v21, %v3460_v21  ;;  %v3518_v20 = vsel %vm6616_vm11, %v3510_v46, 0.0  ;;  %vm6629_vm13 = vmmov %vm6608_vm0 }
 0x3a1   : > { %v3490_v45 = vadd.f32 %v3489_v8, %v3488_v51  ;;  %3802 = vrot.lane.b32.xlu0 %v3457_v53, %s4487_s28  ;;  %v6218_v26 = vpop.f32.mrb[4].mxu1  ;;  %v3523_v1 = vsel %vm6623_vm2, %v3513_v56, 0.0  ;;  %vm6631_vm11 = vmmov %vm6608_vm0 }
 0x3a2   : > { %v3519_v54 = vsel %vm6617_vm6, %v3511_v28, 0.0  ;;  %v6223_v48 = vpop.f32.mrb[5].mxu1  ;;  %v3040_v13 = vmul.f32 %v6218_v26, %v6218_v26  ;;  %v3023_v0 = vsel %vm6608_vm0, %v6218_v26, 0.0  ;;  %vm6632_vm6 = vmmov %vm6608_vm0 }
 0x3a3   : > { %v3492_v19 = vadd.f32 %v3491_v41, %v3490_v45  ;;  %v3520_v30 = vadd.f32 %v3519_v54, %v3518_v20  ;;  %3804 = vrot.lane.b32.xlu1 %v3460_v21, %s4487_s28  ;;  %v3019_v55 = vsel %vm6618_vm9, %v6223_v48, 0.0  ;;  %v3038_v31 = vmul.f32 %v6223_v48, %v6223_v48  ;;  %v6230_v29 = vpop.f32.mrb[6].mxu1  ;;  %vm6633_vm9 = vmmov %vm6608_vm0 }
 0x3a4   : > { %v3020_v44 = vadd.f32 %v3019_v55, %v3018_v59  ;;  %v6236_v25 = vpop.f32.mrb[7].mxu1  ;;  %v3041_v22 = vmul.f32 %v6230_v29, %v6230_v29  ;;  %v3053_v33 = vsel %vm6625_vm15, %v3040_v13, 0.0  ;;  %v3025_v40 = vsel %vm6626_vm5, %v6230_v29, 0.0  ;;  %vm6635_vm4 = vmmov %vm6608_vm0 }
 0x3a5   : > { %v3522_v34 = vadd.f32 %v3521_v32, %v3520_v30  ;;  %v3049_v42 = vsel %vm6621_vm3, %v3038_v31, 0.0  ;;  %v3021_v61 = vsel %vm6622_vm10, %v6236_v25, 0.0  ;;  %v3039_v27 = vmul.f32 %v6236_v25, %v6236_v25  ;;  %vm6636_vm3 = vmmov %vm6608_vm0 }
 0x3a6   : > { %v3050_v50 = vadd.f32 %v3049_v42, %v3048_v38  ;;  %v3022_v7 = vadd.f32 %v3021_v61, %v3020_v44  ;;  %v6244_v57 = vadd.f32 %v3493_v10, %v3492_v19  ;;  %v3055_v4 = vsel %vm6627_vm7, %v3041_v22, 0.0  ;;  %vm6637_vm10 = vmmov %vm6608_vm0 }
 0x3a7   : > { %v3051_v11 = vsel %vm6624_vm8, %v3039_v27, 0.0  ;;  %v6251_v49 = vadd.f32 %v3523_v1, %v3522_v34  ;;  %vm6638_vm2 = vmmov %vm6608_vm0 }
 0x3a8   : > { %v3024_v18 = vadd.f32 %v3023_v0, %v3022_v7  ;;  %v3052_v3 = vadd.f32 %v3051_v11, %v3050_v50  ;;  %vm6639_vm8 = vmmov %vm6608_vm0 }
 0x3a9   : > { %v6256_v16 = vpop.f32.mrb[8].mxu1  ;;  %vm6640_vm15 = vmmov %vm6608_vm0 }
 0x3aa   : > { %v3026_v2 = vadd.f32 %v3025_v40, %v3024_v18  ;;  %v3054_v17 = vadd.f32 %v3053_v33, %v3052_v3  ;;  %v6258_v14 = vpop.f32.mrb[9].mxu1  ;;  %v3270_v23 = vmul.f32 %v6256_v16, %v6256_v16  ;;  %v3249_v12 = vsel %vm6630_vm14, %v6256_v16, 0.0  ;;  %vm6641_vm5 = vmmov %vm6608_vm0 }
 0x3ab   : > { %v3268_v9 = vmul.f32 %v6258_v14, %v6258_v14  ;;  %v6263_v39 = vpop.f32.mrb[10].mxu1  ;;  %v3246_v52 = vsel %vm6628_vm12, %v6258_v14, 0.0  ;;  %vm6642_vm7 = vmmov %vm6608_vm0 }
 0x3ac   : > { %v3027_v6 = vrot.slane %v3026_v2, 4  ;;  %v3056_v58 = vadd.f32 %v3055_v4, %v3054_v17  ;;  %v6265_v60 = vpop.f32.mrb[11].mxu1  ;;  %v3271_v5 = vmul.f32 %v6263_v39, %v6263_v39  ;;  %v3279_v37 = vsel %vm6633_vm9, %v3270_v23, 0.0  ;;  %vm6643_vm12 = vmmov %vm6608_vm0 }
 0x3ad   : > { %v3247_v62 = vsel %vm6629_vm13, %v6265_v60, 0.0  ;;  %v3269_v63 = vmul.f32 %v6265_v60, %v6265_v60  ;;  %v3276_v38 = vsel %vm6631_vm11, %v3268_v9, 0.0  ;;  %v3251_v28 = vsel %vm6634_vm1, %v6263_v39, 0.0  ;;  %vm6644_vm13 = vmmov %vm6608_vm0 }
 0x3ae   : > { %v3028_v24 = vadd.f32 %v3027_v6, %v3026_v2  ;;  %v3248_v59 = vadd.f32 %v3247_v62, %v3246_v52  ;;  %v3057_v46 = vrot.slane %v3056_v58, 4  ;;  %v3281_v20 = vsel %vm6635_vm4, %v3271_v5, 0.0  ;;  %vm6645_vm14 = vmmov %vm6608_vm0 }
 0x3af   : > { %v3277_v53 = vsel %vm6632_vm6, %v3269_v63, 0.0  ;;  %vm6646_vm11 = vmmov %vm6608_vm0 }
 0x3b0   : > { %v3250_v15 = vadd.f32 %v3249_v12, %v3248_v59  ;;  %v3278_v21 = vadd.f32 %v3277_v53, %v3276_v38  ;;  %v3029_v8 = vrot.slane %v3028_v24, 2  ;;  %v3058_v55 = vadd.f32 %v3057_v46, %v3056_v58  ;;  %vm6647_vm6 = vmmov %vm6608_vm0 }
 0x3b1   : > { %v6282_v51 = vpop.f32.mrb[12].mxu1  ;;  %vm6648_vm9 = vmmov %vm6608_vm0 }
 0x3b2   : > { %v3280_v45 = vadd.f32 %v3279_v37, %v3278_v21  ;;  %v6286_v41 = vpop.f32.mrb[13].mxu1  ;;  %v3252_v56 = vadd.f32 %v3251_v28, %v3250_v15  ;;  %v3030_v44 = vadd.f32 %v3029_v8, %v3028_v24  ;;  %v3274_v61 = vmul.f32 %v6282_v51, %v6282_v51  ;;  %vm6649_vm1 = vmmov %vm6608_vm0 }
 0x3b3   : > { %v3253_v54 = vsel %vm6636_vm3, %v6286_v41, 0.0  ;;  %v3272_v19 = vmul.f32 %v6286_v41, %v6286_v41  ;;  %v6293_v30 = vpop.f32.mrb[14].mxu1  ;;  %v3059_v50 = vrot.slane %v3058_v55, 2  ;;  %v3257_v7 = vsel %vm6608_vm0, %v6282_v51, 0.0  ;;  %vm6650_vm4 = vmmov %vm6608_vm0 }
 0x3b4   : > { %v3282_v31 = vadd.f32 %v3281_v20, %v3280_v45  ;;  %v6295_v32 = vpop.f32.mrb[15].mxu1  ;;  %v3254_v10 = vadd.f32 %v3253_v54, %v3252_v56  ;;  %v3275_v0 = vmul.f32 %v6293_v30, %v6293_v30  ;;  %v3031_v3 = vrot.slane %v3030_v44, 1  ;;  %vm6651_vm3 = vmmov %vm6608_vm0 }
 0x3b5   : > { %v3283_v13 = vsel %vm6637_vm10, %v3272_v19, 0.0  ;;  %v3255_v42 = vsel %vm6638_vm2, %v6295_v32, 0.0  ;;  %v3273_v1 = vmul.f32 %v6295_v32, %v6295_v32  ;;  %v3259_v33 = vsel %vm6640_vm15, %v6293_v30, 0.0  ;;  %vm6652_vm10 = vmmov %vm6608_vm0 }
 0x3b6   : > { %v3284_v34 = vadd.f32 %v3283_v13, %v3282_v31  ;;  %v3256_v27 = vadd.f32 %v3255_v42, %v3254_v10  ;;  %v3287_v17 = vsel %vm6641_vm5, %v3274_v61, 0.0  ;;  %v6320_v58 = vadd.f32 %v3059_v50, %v3058_v55  ;;  %vm6653_vm2 = vmmov %vm6608_vm0 }
 0x3b7   : > { %v3285_v11 = vsel %vm6639_vm8, %v3273_v1, 0.0  ;;  %v3289_v23 = vsel %vm6642_vm7, %v3275_v0, 0.0  ;;  %v3032_v5 = vadd.f32 %v3031_v3, %v3030_v44  ;;  %vm6654_vm8 = vmmov %vm6608_vm0 }
 0x3b8   : > { %v3258_v22 = vadd.f32 %v3257_v7, %v3256_v27  ;;  %v3286_v40 = vadd.f32 %v3285_v11, %v3284_v34  ;;  %v3061_v20 = vrot.slane %v6320_v58, 1  ;;  %vm6655_vm15 = vmmov %vm6608_vm0 }
 0x3b9   : > { %v6309_v18 = vpop.f32.mrb[16].mxu1  ;;  %vm6656_vm5 = vmmov %vm6608_vm0 }
 0x3ba   : > { %v6313_v2 = vpop.f32.mrb[17].mxu1  ;;  %v3260_v4 = vadd.f32 %v3259_v33, %v3258_v22  ;;  %v3288_v52 = vadd.f32 %v3287_v17, %v3286_v40  ;;  %v3734_v62 = vmul.f32 %v6309_v18, %v6309_v18  ;;  %v3713_v46 = vsel %vm6645_vm14, %v6309_v18, 0.0  ;;  %vm6657_vm7 = vmmov %vm6608_vm0 }
 0x3bb   : > { %v3732_v9 = vmul.f32 %v6313_v2, %v6313_v2  ;;  %v6318_v6 = vpop.f32.mrb[18].mxu1  ;;  %v3710_v59 = vsel %vm6643_vm12, %v6313_v2, 0.0  ;;  %vm6658_vm12 = vmmov %vm6608_vm0 }
 0x3bc   : > { %v6325_v63 = vpop.f32.mrb[19].mxu1  ;;  %v3261_v24 = vrot.slane %v3260_v4, 4  ;;  %v3290_v53 = vadd.f32 %v3289_v23, %v3288_v52  ;;  %v3735_v8 = vmul.f32 %v6318_v6, %v6318_v6  ;;  %v3743_v10 = vsel %vm6648_vm9, %v3734_v62, 0.0  ;;  %vm6660_vm14 = vmmov %vm6608_vm0 }
 0x3bd   : > { %v3711_v12 = vsel %vm6644_vm13, %v6325_v63, 0.0  ;;  %v3733_v38 = vmul.f32 %v6325_v63, %v6325_v63  ;;  %v3740_v37 = vsel %vm6646_vm11, %v3732_v9, 0.0  ;;  %v3715_v61 = vsel %vm6650_vm4, %v6318_v6, 0.0  ;;  %vm6659_vm13 = vmmov %vm6608_vm0 }
 0x3be   : > { %v3712_v15 = vadd.f32 %v3711_v12, %v3710_v59  ;;  %v3262_v21 = vadd.f32 %v3261_v24, %v3260_v4  ;;  %v3291_v56 = vrot.slane %v3290_v53, 4  ;;  %v3745_v22 = vsel %vm6651_vm3, %v3735_v8, 0.0  ;;  %vm6661_vm11 = vmmov %vm6608_vm0 }
 0x3bf   : > { %v3741_v28 = vsel %vm6647_vm6, %v3733_v38, 0.0  ;;  %v4377_v45 = vpop.f32.mrb[12].mxu0  ;;  %vm6662_vm6 = vmmov %vm6608_vm0  ;;  %vm3890_vm3 = vcmask 57344  }
 0x3c0   : > { %v3714_v54 = vadd.f32 %v3713_v46, %v3712_v15  ;;  %v3742_v19 = vadd.f32 %v3741_v28, %v3740_v37  ;;  %3814 = vrot.lane.b32.xlu0 %v4377_v45, %s4487_s28  ;;  %v3473_v55 = vpop.f32.mrb[13].mxu0  ;;  %v3263_v31 = vrot.slane %v3262_v21, 2  ;;  %v3292_v42 = vadd.f32 %v3291_v56, %v3290_v53  ;;  %vm6663_vm9 = vmmov %vm6608_vm0 }
 0x3c1   : > { %v3495_v13 = vsel %vm6649_vm1, %v3473_v55, 0.0  ;;  %v3514_v44 = vmul.f32 %v3473_v55, %v3473_v55  ;;  %v4378_v34 = vpop.f32.mrb[14].mxu0  ;;  %v3516_v11 = vmul.f32 %v4377_v45, %v4377_v45  ;;  %v3499_v52 = vsel %vm6608_vm0, %v4377_v45, 0.0  ;;  %vm6664_vm1 = vmmov %vm6608_vm0 }
 0x3c2   : > { %v3744_v27 = vadd.f32 %v3743_v10, %v3742_v19  ;;  %v3496_v1 = vadd.f32 %v3495_v13, %v6244_v57  ;;  %3816 = vrot.lane.b32.xlu1 %v4378_v34, %s4487_s28  ;;  %v3476_v50 = vpop.f32.mrb[15].mxu0  ;;  %v6347_v7 = vpop.f32.mrb[20].mxu1  ;;  %v3264_v0 = vadd.f32 %v3263_v31, %v3262_v21  ;;  %v3293_v40 = vrot.slane %v3292_v42, 2  ;;  %vm6665_vm4 = vmmov %vm6608_vm0 }
 0x3c3   : > { %v3525_v3 = vsel %vm6652_vm10, %v3514_v44, 0.0  ;;  %v6351_v33 = vpop.f32.mrb[21].mxu1  ;;  %v3497_v4 = vsel %vm6653_vm2, %v3476_v50, 0.0  ;;  %v3515_v9 = vmul.f32 %v3476_v50, %v3476_v50  ;;  %v3501_v62 = vsel %vm6654_vm8, %v4378_v34, 0.0  ;;  %vm6666_vm10 = vmmov %vm6608_vm0 }
 0x3c4   : > { %v3526_v17 = vadd.f32 %v3525_v3, %v6251_v49  ;;  %3810 = vrot.lane.b32.xlu0 %v3473_v55, %s4487_s28  ;;  %v6356_v57 = vpop.f32.mrb[22].mxu1  ;;  %v3265_v23 = vrot.slane %v3264_v0, 1  ;;  %v3498_v24 = vadd.f32 %v3497_v4, %v3496_v1  ;;  %v3294_v12 = vadd.f32 %v3293_v40, %v3292_v42  ;;  %vm6667_vm2 = vmmov %vm6608_vm0 }
 0x3c5   : > { %v6360_v59 = vpop.f32.mrb[23].mxu1  ;;  %v3517_v38 = vmul.f32 %v4378_v34, %v4378_v34  ;;  %v3527_v53 = vsel %vm6655_vm15, %v3515_v9, 0.0  ;;  %v3716_v49 = vadd.f32 %v3715_v61, %v3714_v54  ;;  %v3717_v37 = vsel %vm6656_vm5, %v6351_v33, 0.0  ;;  %vm6669_vm8 = vmmov %vm6664_vm1 }
 0x3c6   : > { %3812 = vrot.lane.b32.xlu1 %v3476_v50, %s4487_s28  ;;  %v3266_v46 = vadd.f32 %v3265_v23, %v3264_v0  ;;  %v3500_v15 = vadd.f32 %v3499_v52, %v3498_v24  ;;  %v3528_v21 = vadd.f32 %v3527_v53, %v3526_v17  ;;  %v3295_v8 = vrot.slane %v3294_v12, 1 }
 0x3c7   : > { %v3529_v28 = vsel %vm6657_vm7, %v3516_v11, 0.0  ;;  %v3718_v45 = vadd.f32 %v3717_v37, %v3716_v49  ;;  %v3736_v56 = vmul.f32 %v6351_v33, %v6351_v33  ;;  %v3746_v31 = vadd.f32 %v3745_v22, %v3744_v27 }
 0x3c8   : > { %3774 = vrot.lane.b32.xlu0 %v6256_v16, %s4480_s27  ;;  %v3267_v19 = vadd.f32 %v3266_v46, %v3032_v5  ;;  %v3502_v54 = vadd.f32 %v3501_v62, %v3500_v15  ;;  %v3530_v55 = vadd.f32 %v3529_v28, %v3528_v21  ;;  %v3062_v10 = vadd.f32 %v3061_v20, %v6320_v58 }
 0x3c9   : > { %v3296_v13 = vadd.f32 %v3295_v8, %v3294_v12  ;;  %v3531_v44 = vsel %vm6658_vm12, %v3517_v38, 0.0  ;;  %v3747_v34 = vsel %vm6659_vm13, %v3736_v56, 0.0  ;;  %v3719_v16 = vsel %vm6660_vm14, %v6360_v59, 0.0  ;;  %vm6673_vm12 = vmmov %vm6664_vm1 }
 0x3ca   : > { %3776 = vrot.lane.b32.xlu1 %v6263_v39, %s4480_s27  ;;  %v3503_v42 = vrot.slane %v3502_v54, 4  ;;  %v3532_v61 = vadd.f32 %v3531_v44, %v3530_v55  ;;  %v3748_v1 = vadd.f32 %v3747_v34, %v3746_v31  ;;  %v3738_v27 = vmul.f32 %v6347_v7, %v6347_v7 }
 0x3cb   : > { %v3297_v5 = vadd.f32 %v3296_v13, %v3062_v10  ;;  %v3720_v50 = vadd.f32 %v3719_v16, %v3718_v45  ;;  %v3737_v58 = vmul.f32 %v6360_v59, %v6360_v59  ;;  %v3721_v39 = vsel %vm6661_vm11, %v6347_v7, 0.0 }
 0x3cc   : > { %3770 = vrot.lane.b32.xlu0 %v6258_v14, %s4480_s27  ;;  %v3504_v20 = vadd.f32 %v3503_v42, %v3502_v54  ;;  %v3533_v0 = vrot.slane %v3532_v61, 4  ;;  %v3739_v22 = vmul.f32 %v6356_v57, %v6356_v57  ;;  %v3723_v4 = vsel %vm6663_vm9, %v6356_v57, 0.0 }
 0x3cd   : > { %v3722_v11 = vadd.f32 %v3721_v39, %v3720_v50  ;;  %v3749_v3 = vsel %vm6662_vm6, %v3737_v58, 0.0  ;;  %v3751_v9 = vsel %vm6664_vm1, %v3738_v27, 0.0  ;;  %vm6668_vm0 = vcmask 130048   ;;  %vm6677_vm6 = vmmov %vm6664_vm1 }
 0x3ce   : > { %3772 = vrot.lane.b32.xlu1 %v6265_v60, %s4480_s27  ;;  %v3505_v40 = vrot.slane %v3504_v20, 2  ;;  %v3534_v17 = vadd.f32 %v3533_v0, %v3532_v61  ;;  %v3750_v14 = vadd.f32 %v3749_v3, %v3748_v1  ;;  %v3753_v12 = vsel %vm6665_vm4, %v3739_v22, 0.0  ;;  %vm6672_vm7 = vmmov %vm6668_vm0 }
 0x3cf   : > { %v3724_v23 = vadd.f32 %v3723_v4, %v3722_v11  ;;  %vm6670_vm15 = vcmask 195584   ;;  %vm6671_vm5 = vcmask 261120   ;;  %vm6676_vm11 = vmmov %vm6668_vm0 }
 0x3d0   : > { %3782 = vrot.lane.b32.xlu0 %v6282_v51, %s4480_s27  ;;  %v3506_v52 = vadd.f32 %v3505_v40, %v3504_v20  ;;  %v3535_v62 = vrot.slane %v3534_v17, 2  ;;  %v3752_v24 = vadd.f32 %v3751_v9, %v3750_v14  ;;  %vm6674_vm13 = vmmov %vm6670_vm15 }
 0x3d1   : > { %v3725_v38 = vrot.slane %v3724_v23, 4  ;;  %vm6675_vm14 = vmmov %vm6671_vm5 }
 0x3d2   : > { %3784 = vrot.lane.b32.xlu1 %v6293_v30, %s4480_s27  ;;  %v3507_v60 = vrot.slane %v3506_v52, 1  ;;  %v3536_v53 = vadd.f32 %v3535_v62, %v3534_v17  ;;  %v3754_v49 = vadd.f32 %v3753_v12, %v3752_v24  ;;  %vm6678_vm9 = vmmov %vm6674_vm13 }
 0x3d3   : > { %v3726_v46 = vadd.f32 %v3725_v38, %v3724_v23  ;;  %vm6679_vm1 = vmmov %vm6671_vm5 }
 0x3d4   : > { %3778 = vrot.lane.b32.xlu0 %v6286_v41, %s4480_s27  ;;  %v3508_v15 = vadd.f32 %v3507_v60, %v3506_v52  ;;  %v3537_v21 = vrot.slane %v3536_v53, 1  ;;  %v3755_v51 = vrot.slane %v3754_v49, 4  ;;  %vm6680_vm4 = vmmov %vm6668_vm0 }
 0x3d5   : > { %v3727_v37 = vrot.slane %v3726_v46, 2 }
 0x3d6   : > { %3780 = vrot.lane.b32.xlu1 %v6295_v32, %s4480_s27  ;;  %v3509_v8 = vadd.f32 %v3508_v15, %v3267_v19  ;;  %v3538_v28 = vadd.f32 %v3537_v21, %v3536_v53  ;;  %v3756_v45 = vadd.f32 %v3755_v51, %v3754_v49 }
 0x3d7   : > { %v3728_v30 = vadd.f32 %v3727_v37, %v3726_v46 }
 0x3d8   : > { %3838 = vrot.lane.b32.xlu0 %v6309_v18, %s4478_s25  ;;  %v3539_v56 = vadd.f32 %v3538_v28, %v3297_v5  ;;  %v3757_v54 = vrot.slane %v3756_v45, 2 }
 0x3d9   : > { %v3729_v55 = vrot.slane %v3728_v30, 1 }
 0x3da   : > { %3840 = vrot.lane.b32.xlu1 %v6318_v6, %s4478_s25  ;;  %v3758_v41 = vadd.f32 %v3757_v54, %v3756_v45 }
 0x3db   : > { %v3730_v31 = vadd.f32 %v3729_v55, %v3728_v30 }
 0x3dc   : > { %3834 = vrot.lane.b32.xlu0 %v6313_v2, %s4478_s25  ;;  %v3759_v32 = vrot.slane %v3758_v41, 1 }
 0x3dd   : > { %v3731_v19 = vadd.f32 %v3730_v31, %v3509_v8 }
 0x3de   : > { %3836 = vrot.lane.b32.xlu1 %v6325_v63, %s4478_s25  ;;  %v3760_v18 = vadd.f32 %v3759_v32, %v3758_v41 }
 0x3df   : > { %3891 = vst.msk [vmem:[%s238_s17] sm:$0x1] %vm3890_vm3, %v3731_v19 }
 0x3e0   : > { %3842 = vrot.lane.b32.xlu0 %v6351_v33, %s4478_s25  ;;  %v3761_v2 = vadd.f32 %v3760_v18, %v3539_v56 }
 0x3e2   : > { %3844 = vrot.lane.b32.xlu1 %v6360_v59, %s4478_s25  ;;  %3892 = vst.msk [vmem:[%s241_s22] sm:$0x1] %vm3890_vm3, %v3761_v2  ;;  %vm6681_vm3 = vmmov %vm6667_vm2 }
 0x3e4   : > { %3846 = vrot.lane.b32.xlu0 %v6347_v7, %s4478_s25 }
 0x3e6   : > { %3848 = vrot.lane.b32.xlu1 %v6356_v57, %s4478_s25 }
 0x40f   : > { %v3807_v6 = vpop.permute.xlu0 %3806 }
 0x411   : > { %v3809_v63 = vpop.permute.xlu1 %3808 }
 0x413   : > { %v3803_v10 = vpop.permute.xlu0 %3802 }
 0x415   : > { %v3805_v13 = vpop.permute.xlu1 %3804 }
 0x432   : > { %v3815_v44 = vpop.permute.xlu0 %3814 }
 0x434   : > { %v3817_v34 = vpop.permute.xlu1 %3816 }
 0x436   : > { %v3811_v42 = vpop.permute.xlu0 %3810 }
 0x438   : > { %v3813_v33 = vpop.permute.xlu1 %3812 }
 0x43a   : > { %v3775_v61 = vpop.permute.xlu0 %3774 }
 0x43b   : > { %v3860_v7 = vsel %vm6666_vm10, %v6185_v36, %v3775_v61  ;;  %vm6682_vm10 = vmmov %vm6678_vm9 }
 0x43c   : > { %v3777_v1 = vpop.permute.xlu1 %3776  ;;  %v3868_v20 = vsel %vm6668_vm0, %v3860_v7, %v3807_v6 }
 0x43d   : > { %v3861_v58 = vsel %vm6667_vm2, %v6191_v47, %v3777_v1  ;;  %vm6683_vm2 = vmmov %vm6679_vm1 }
 0x43e   : > { %v3771_v16 = vpop.permute.xlu0 %3770  ;;  %v3869_v47 = vsel %vm6672_vm7, %v3861_v58, %v3809_v63  ;;  %vm6687_vm7 = vmmov %vm6668_vm0 }
 0x43f   : > { %v3858_v39 = vsel %vm6669_vm8, %v6187_v43, %v3771_v16  ;;  %vm6684_vm8 = vmmov %vm6681_vm3 }
 0x440   : > { %v3773_v59 = vpop.permute.xlu1 %3772  ;;  %v3866_v40 = vsel %vm6676_vm11, %v3858_v39, %v3803_v10  ;;  %vm6691_vm11 = vmmov %vm6668_vm0 }
 0x441   : > { %v3859_v11 = vsel %vm6673_vm12, %v6193_v35, %v3773_v59  ;;  %vm6688_vm12 = vmmov %vm6681_vm3 }
 0x442   : > { %v3783_v5 = vpop.permute.xlu0 %3782  ;;  %v3867_v14 = vsel %vm6680_vm4, %v3859_v11, %v3805_v13 }
 0x444   : > { %v3785_v27 = vpop.permute.xlu1 %3784 }
 0x446   : > { %v3779_v50 = vpop.permute.xlu0 %3778 }
 0x447   : > { %v3862_v43 = vsel %vm6677_vm6, %v6223_v48, %v3779_v50  ;;  %v3864_v48 = vsel %vm6684_vm8, %v6218_v26, %v3783_v5  ;;  %vm6692_vm6 = vmmov %vm6678_vm9 }
 0x448   : > { %v3781_v57 = vpop.permute.xlu1 %3780  ;;  %v3870_v52 = vsel %vm6668_vm0, %v3862_v43, %v3811_v42  ;;  %v3872_v53 = vsel %vm6691_vm11, %v3864_v48, %v3815_v44  ;;  %vm6695_vm4 = vmmov %vm6692_vm6 }
 0x449   : > { %v3863_v35 = vsel %vm6681_vm3, %v6236_v25, %v3781_v57  ;;  %v3865_v25 = vsel %vm6688_vm12, %v6230_v29, %v3785_v27  ;;  %vm6696_vm3 = vmmov %vm6683_vm2 }
 0x44a   : > { %v3839_v0 = vpop.permute.xlu0 %3838  ;;  %v3871_v12 = vsel %vm6687_vm7, %v3863_v35, %v3813_v33 }
 0x44b   : > { %v3876_v36 = vsel %vm6670_vm15, %v3868_v20, %v3839_v0  ;;  %vm6685_vm15 = vmmov %vm6678_vm9 }
 0x44c   : > { %3884 = vst.msk [vmem:[%s6435_s24 + $0x10] sm:$0xff] %vm6671_vm5, %v3876_v36  ;;  %v3841_v22 = vpop.permute.xlu1 %3840  ;;  %vm6686_vm5 = vmmov %vm6679_vm1 }
 0x44d   : > { %v3877_v3 = vsel %vm6674_vm13, %v3869_v47, %v3841_v22  ;;  %vm6689_vm13 = vmmov %vm6678_vm9 }
 0x44e   : > { %3885 = vst.msk [vmem:[%s6435_s24 + $0x18] sm:$0xff] %vm6675_vm14, %v3877_v3  ;;  %v3835_v17 = vpop.permute.xlu0 %3834  ;;  %vm6690_vm14 = vmmov %vm6679_vm1 }
 0x44f   : > { %v3874_v4 = vsel %vm6678_vm9, %v3866_v40, %v3835_v17  ;;  %vm6693_vm9 = vmmov %vm6679_vm1 }
 0x450   : > { %3882 = vst.msk [vmem:[%s6435_s24] sm:$0xff] %vm6679_vm1, %v3874_v4  ;;  %v3837_v9 = vpop.permute.xlu1 %3836  ;;  %vm6694_vm1 = vmmov %vm6668_vm0 }
 0x451   : > { %v3875_v23 = vsel %vm6682_vm10, %v3867_v14, %v3837_v9  ;;  %v3873_v26 = vsel %vm6694_vm1, %v3865_v25, %v3817_v34 }
 0x452   : > { %3883 = vst.msk [vmem:[%s6435_s24 + $0x8] sm:$0xff] %vm6683_vm2, %v3875_v23  ;;  %v3843_v62 = vpop.permute.xlu0 %3842 }
 0x453   : > { %v3878_v24 = vsel %vm6685_vm15, %v3870_v52, %v3843_v62 }
 0x454   : > { %3886 = vst.msk [vmem:[%s6435_s24 + $0x20] sm:$0xff] %vm6686_vm5, %v3878_v24  ;;  %v3845_v38 = vpop.permute.xlu1 %3844 }
 0x455   : > { %v3879_v60 = vsel %vm6689_vm13, %v3871_v12, %v3845_v38 }
 0x456   : > { %3887 = vst.msk [vmem:[%s6435_s24 + $0x28] sm:$0xff] %vm6690_vm14, %v3879_v60  ;;  %v3847_v49 = vpop.permute.xlu0 %3846 }
 0x457   : > { %v3880_v46 = vsel %vm6692_vm6, %v3872_v53, %v3847_v49 }
 0x458   : > { %3888 = vst.msk [vmem:[%s6435_s24 + $0x30] sm:$0xff] %vm6693_vm9, %v3880_v46  ;;  %v3849_v15 = vpop.permute.xlu1 %3848 }
 0x459   : > { %v3881_v21 = vsel %vm6695_vm4, %v3873_v26, %v3849_v15 }
 0x45a   : > { %3889 = vst.msk [vmem:[%s6435_s24 + $0x38] sm:$0xff] %vm6696_vm3, %v3881_v21 }
 0x45b PF: > { %s16_s18 = sadd.s32 1, %s4474_s18  }
 0x45c   : > { %p13_p4 = scmp.ge.s32.totalorder %s16_s18, 4  }
 0x45e   :  { %15 = sbr.rel (!%p13_p4) target bundleno = 1 (0x1), region = 98 }

</bundles_post_ra>
